<compile_context>
chip_gen: v6e
topology: v6e:2x2x1
jax: 0.10.0
libtpu: 0.0.40
codegen_flags: <defaults>
</compile_context>

<pallas_src>
import jax
import jax.numpy as jnp
import numpy as np
from jax import lax
from jax.experimental import pallas as pl
from jax.experimental.pallas import tpu as pltpu

_LANE = 128


# ------------------------------- Pallas kernel ------------------------------

def _cnn_mnist1_kernel(x_ref, w1_ref, b1_ref, w2_ref, b2_ref,
                       wf1_ref, bf1_ref, wf2_ref, bf2_ref, out_ref):
    """Whole CNNMnist1 forward for one batch tile.

    x_ref:  (28, bt, 28*Cin)  height-major image tile
    w1_ref: (5, 28*Cin, 256)  structured conv1 weights (kw/Cin + width-pool folded)
    w2_ref: (5, 128, 256)     structured conv2 weights
    wf1_ref:(4, 128, 50)      fc1 weights, NCHW-flatten permutation folded in
    wf2_ref:(50, nclass)
    out_ref:(bt, nclass)      log-probabilities
    """
    bt = x_ref.shape[1]
    wc0 = x_ref.shape[2]

    x = x_ref[...]                                       # (28, bt, 28*Cin)

    # ---- layer 1: conv1 (k=5) -> 2x2 max-pool -> relu ----------------------
    acc = jnp.dot(x[0:24].reshape(24 * bt, wc0), w1_ref[0],
                  preferred_element_type=jnp.float32)
    for kh in range(1, 5):
        acc = acc + jnp.dot(x[kh:kh + 24].reshape(24 * bt, wc0), w1_ref[kh],
                            preferred_element_type=jnp.float32)
    acc = acc + b1_ref[...]                              # (24*bt, 256)
    y = jnp.maximum(acc[:, :_LANE], acc[:, _LANE:])      # pool over width pairs
    y = jnp.maximum(y, 0.0)                              # relu (commutes with max)
    y = y.reshape(12, 2, bt, _LANE)
    x2 = jnp.maximum(y[:, 0], y[:, 1])                   # pool over height pairs

    # ---- layer 2: conv2 (k=5) -> dropout2d(identity) -> pool -> relu -------
    # TODO(synk): Dropout2d / F.dropout are identity here (inference
    # semantics); training-mode stochastic masking is not implemented.
    acc2 = jnp.dot(x2[0:8].reshape(8 * bt, _LANE), w2_ref[0],
                   preferred_element_type=jnp.float32)
    for kh in range(1, 5):
        acc2 = acc2 + jnp.dot(x2[kh:kh + 8].reshape(8 * bt, _LANE), w2_ref[kh],
                              preferred_element_type=jnp.float32)
    acc2 = acc2 + b2_ref[...]                            # (8*bt, 256)
    z = jnp.maximum(acc2[:, :_LANE], acc2[:, _LANE:])
    z = jnp.maximum(z, 0.0)
    z = z.reshape(4, 2, bt, _LANE)
    y2 = jnp.maximum(z[:, 0], z[:, 1])                   # (4, bt, 128)

    # ---- fc1 -> relu -> dropout(identity) -> fc2 -> log_softmax ------------
    h = jnp.dot(y2[0], wf1_ref[0], preferred_element_type=jnp.float32)
    for p in range(1, 4):
        h = h + jnp.dot(y2[p], wf1_ref[p], preferred_element_type=jnp.float32)
    h = jnp.maximum(h + bf1_ref[...], 0.0)               # (bt, 50)
    logits = jnp.dot(h, wf2_ref[...],
                     preferred_element_type=jnp.float32) + bf2_ref[...]
    m = jnp.max(logits, axis=-1, keepdims=True)
    lse = jnp.log(jnp.sum(jnp.exp(logits - m), axis=-1, keepdims=True))
    out_ref[...] = logits - m - lse


# --------------------------- structured parameter prep ----------------------

def _round_up(n, m):
    return ((n + m - 1) // m) * m


def _conv_struct(w, win, k_rows):
    """Per-kh matmul weight folding kw/Cin contraction + width-pool pairing.

    out[kh, (2q+dj+kw)*Cin + ci, dj*128 + q*Cout + c] = w[c, ci, kh, kw]
    so X_rows(lanes = jin*Cin+ci) @ out[kh] produces the conv output for pooled
    column q with pool-column parity dj in the two 128-lane halves; everything
    else is zero.  k_rows >= win*Cin (extra rows stay zero).
    """
    cout, cin, k, _ = w.shape
    wp = (win - k + 1) // 2
    kh, dj, q, c, kw, ci = np.meshgrid(
        np.arange(k), np.arange(2), np.arange(wp), np.arange(cout),
        np.arange(k), np.arange(cin), indexing="ij")
    rows = (2 * q + dj + kw) * cin + ci
    cols = dj * _LANE + q * cout + c
    vals = w[c.ravel(), ci.ravel(), kh.ravel(), kw.ravel()].astype(jnp.float32)
    out = jnp.zeros((k, k_rows, 2 * _LANE), jnp.float32)
    return out.at[kh.ravel(), rows.ravel(), cols.ravel()].set(vals)


def _bias_struct(b, wp):
    cout = b.shape[0]
    half = jnp.zeros((_LANE,), jnp.float32).at[: wp * cout].set(
        jnp.tile(b.astype(jnp.float32), wp))
    return jnp.concatenate([half, half]).reshape(1, 2 * _LANE)


def _fc1_struct(fw1, c2=20, h2=4, w2=4):
    """Fold the PyTorch NCHW flatten into fc1's weight; pad rows to 128 lanes."""
    o = fw1.shape[0]
    w = fw1.reshape(o, c2, h2, w2).astype(jnp.float32)    # [o, c, p, q]
    w = jnp.transpose(w, (2, 3, 1, 0))                    # [p, q, c, o]
    w = w.reshape(h2, w2 * c2, o)                         # row index = q*c2 + c
    return jnp.pad(w, ((0, 0), (0, _LANE - w2 * c2), (0, 0)))


# ------------------------------ pallas_call wrapper --------------------------

def _fused_forward(x_hm, w1s, b1s, w2s, b2s, wf1, bf1, wf2, bf2, bt):
    _, bpad, wc0 = x_hm.shape
    grid = bpad // bt
    nclass = wf2.shape[1]
    c0 = wc0 // 28
    flops = bpad * 2 * (24 * 24 * 10 * 25 * c0 + 8 * 8 * 20 * 25 * 10
                        + 320 * 50 + 50 * nclass)
    bytes_accessed = 4 * (int(x_hm.size) + int(w1s.size) + int(w2s.size)
                          + int(wf1.size) + int(wf2.size) + int(b1s.size)
                          + int(b2s.size) + int(bf1.size) + int(bf2.size)
                          + bpad * nclass)
    return pl.pallas_call(
        _cnn_mnist1_kernel,
        out_shape=jax.ShapeDtypeStruct((bpad, nclass), jnp.float32),
        grid=(grid,),
        in_specs=[
            pl.BlockSpec((28, bt, wc0), lambda i: (0, i, 0)),
            pl.BlockSpec(w1s.shape, lambda i: (0, 0, 0)),
            pl.BlockSpec(b1s.shape, lambda i: (0, 0)),
            pl.BlockSpec(w2s.shape, lambda i: (0, 0, 0)),
            pl.BlockSpec(b2s.shape, lambda i: (0, 0)),
            pl.BlockSpec(wf1.shape, lambda i: (0, 0, 0)),
            pl.BlockSpec(bf1.shape, lambda i: (0, 0)),
            pl.BlockSpec(wf2.shape, lambda i: (0, 0)),
            pl.BlockSpec(bf2.shape, lambda i: (0, 0)),
        ],
        out_specs=pl.BlockSpec((bt, nclass), lambda i: (i, 0)),
        compiler_params=pltpu.CompilerParams(dimension_semantics=("parallel",)),
        cost_estimate=pl.CostEstimate(flops=flops,
                                      transcendentals=bpad * (nclass + 1),
                                      bytes_accessed=bytes_accessed),
    )(x_hm, w1s, b1s, w2s, b2s, wf1, bf1, wf2, bf2)


@jax.jit
def cnn_mnist1_forward(x_nchw, params):
    (w1, c1b, w2, c2b, fw1, fb1, fw2, fb2) = params
    B, C0, H, W = x_nchw.shape
    assert (H, W) == (28, 28), "fc1 = Linear(320, 50) pins the 28x28 geometry"

    # structured (matmul-ready) parameters; tiny, built per call.
    w1s = _conv_struct(w1, 28, 28 * C0)
    b1s = _bias_struct(c1b, 12)
    w2s = _conv_struct(w2, 12, _LANE)          # rows padded 120 -> 128
    b2s = _bias_struct(c2b, 4)
    wf1 = _fc1_struct(fw1)
    bf1 = fb1.reshape(1, -1).astype(jnp.float32)
    wf2 = jnp.transpose(fw2).astype(jnp.float32)
    bf2 = fb2.reshape(1, -1).astype(jnp.float32)

    # input: NCHW -> height-major (H, B, W*C); pad batch to the tile size.
    bt = 64 if B > 64 else _round_up(B, 8)
    bpad = _round_up(B, bt)
    x = jnp.transpose(x_nchw.astype(jnp.float32), (2, 0, 3, 1))
    x = x.reshape(28, B, 28 * C0)
    if bpad != B:
        x = jnp.pad(x, ((0, 0), (0, bpad - B), (0, 0)))

    out = _fused_forward(x, w1s, b1s, w2s, b2s, wf1, bf1, wf2, bf2, bt)
    return out[:B]


# ------------------------------ params & reference ---------------------------

def init_params(key, num_channels=1, num_classes=10):
    ks = jax.random.split(key, 8)

    def u(k, shape, fan_in):
        b = 1.0 / jnp.sqrt(float(fan_in))
        return jax.random.uniform(k, shape, jnp.float32, -b, b)

    w1 = u(ks[0], (10, num_channels, 5, 5), num_channels * 25)
    b1 = u(ks[1], (10,), num_channels * 25)
    w2 = u(ks[2], (20, 10, 5, 5), 10 * 25)
    b2 = u(ks[3], (20,), 10 * 25)
    fw1 = u(ks[4], (50, 320), 320)
    fb1 = u(ks[5], (50,), 320)
    fw2 = u(ks[6], (num_classes, 50), 50)
    fb2 = u(ks[7], (num_classes,), 50)
    return (w1, b1, w2, b2, fw1, fb1, fw2, fb2)


def reference_forward(x_nchw, params):
    (w1, b1, w2, b2, fw1, fb1, fw2, fb2) = params
    dn = ('NCHW', 'OIHW', 'NCHW')
    c1 = lax.conv_general_dilated(x_nchw, w1, (1, 1), 'VALID', dimension_numbers=dn,
                                  precision=lax.Precision.HIGHEST) + b1[None, :, None, None]
    p1 = lax.reduce_window(c1, -jnp.inf, lax.max, (1, 1, 2, 2), (1, 1, 2, 2), 'VALID')
    r1 = jnp.maximum(p1, 0.0)
    c2 = lax.conv_general_dilated(r1, w2, (1, 1), 'VALID', dimension_numbers=dn,
                                  precision=lax.Precision.HIGHEST) + b2[None, :, None, None]
    p2 = lax.reduce_window(c2, -jnp.inf, lax.max, (1, 1, 2, 2), (1, 1, 2, 2), 'VALID')
    r2 = jnp.maximum(p2, 0.0)
    flat = r2.reshape(r2.shape[0], -1)
    h = jnp.maximum(flat @ fw1.T + fb1, 0.0)
    z = h @ fw2.T + fb2
    return jax.nn.log_softmax(z, axis=1)


if __name__ == "__main__":
    key = jax.random.PRNGKey(0)
    kx, kp = jax.random.split(key)
    # fc1 = Linear(320, 50) pins the MNIST geometry: 28x28, num_channels=1.
    B, C, H, W = 2, 1, 28, 28
    x = jax.random.normal(kx, (B, C, H, W), jnp.float32)
    params = init_params(kp, num_channels=C, num_classes=10)

    out = jax.block_until_ready(cnn_mnist1_forward(x, params))
    ref = jax.block_until_ready(reference_forward(x, params))

    assert out.shape == (B, 10), out.shape
    err = float(jnp.max(jnp.abs(out - ref)))
    assert jnp.allclose(out, ref, atol=1e-2, rtol=1e-2), err
    print("KERNEL_OK")
</pallas_src>

<mosaic_0001>
module attributes {stable_mosaic.version = 11 : i64} {
  func.func @_cnn_mnist1_kernel(%arg0: i32, %arg1: memref<28x8x28xf32, #tpu.memory_space<vmem>>, %arg2: memref<5x28x256xf32, #tpu.memory_space<vmem>>, %arg3: memref<1x256xf32, #tpu.memory_space<vmem>>, %arg4: memref<5x128x256xf32, #tpu.memory_space<vmem>>, %arg5: memref<1x256xf32, #tpu.memory_space<vmem>>, %arg6: memref<4x128x50xf32, #tpu.memory_space<vmem>>, %arg7: memref<1x50xf32, #tpu.memory_space<vmem>>, %arg8: memref<50x10xf32, #tpu.memory_space<vmem>>, %arg9: memref<1x10xf32, #tpu.memory_space<vmem>>, %arg10: memref<8x10xf32, #tpu.memory_space<vmem>>) attributes {dimension_semantics = [#tpu.dimension_semantics<parallel>], iteration_bounds = array<i64: 1>, scalar_prefetch = 0 : i64, scratch_operands = 0 : i64, tpu.core_type = #tpu.core_type<tc>, window_params = [{transform_indices = @transform_0, window_bounds = array<i64: 28, 8, 28>}, {pipeline_mode = #tpu.pipeline_mode<synchronous>, transform_indices = @transform_1, window_bounds = array<i64: 5, 28, 256>}, {pipeline_mode = #tpu.pipeline_mode<synchronous>, transform_indices = @transform_2, window_bounds = array<i64: 1, 256>}, {pipeline_mode = #tpu.pipeline_mode<synchronous>, transform_indices = @transform_3, window_bounds = array<i64: 5, 128, 256>}, {pipeline_mode = #tpu.pipeline_mode<synchronous>, transform_indices = @transform_4, window_bounds = array<i64: 1, 256>}, {pipeline_mode = #tpu.pipeline_mode<synchronous>, transform_indices = @transform_5, window_bounds = array<i64: 4, 128, 50>}, {pipeline_mode = #tpu.pipeline_mode<synchronous>, transform_indices = @transform_6, window_bounds = array<i64: 1, 50>}, {pipeline_mode = #tpu.pipeline_mode<synchronous>, transform_indices = @transform_7, window_bounds = array<i64: 50, 10>}, {pipeline_mode = #tpu.pipeline_mode<synchronous>, transform_indices = @transform_8, window_bounds = array<i64: 1, 10>}, {transform_indices = @transform_9, window_bounds = array<i64: 8, 10>}]} {
    %c0 = arith.constant 0 : index
    %c0_0 = arith.constant 0 : index
    %c0_1 = arith.constant 0 : index
    %0 = vector.load %arg1[%c0, %c0_0, %c0_1] : memref<28x8x28xf32, #tpu.memory_space<vmem>>, vector<28x8x28xf32>
    %1 = vector.extract_strided_slice %0 {offsets = [0, 0, 0], sizes = [24, 8, 28], strides = [1, 1, 1]} : vector<28x8x28xf32> to vector<24x8x28xf32>
    %2 = vector.shape_cast %1 : vector<24x8x28xf32> to vector<192x28xf32>
    %c0_2 = arith.constant 0 : index
    %c0_3 = arith.constant 0 : index
    %c0_4 = arith.constant 0 : index
    %3 = vector.load %arg2[%c0_2, %c0_3, %c0_4] : memref<5x28x256xf32, #tpu.memory_space<vmem>>, vector<1x28x256xf32>
    %4 = vector.shape_cast %3 : vector<1x28x256xf32> to vector<28x256xf32>
    %cst = arith.constant dense<0.000000e+00> : vector<192x256xf32>
    %5 = tpu.matmul %2, %4, %cst {dimension_numbers = #tpu.dot_dimension_numbers<[1], [0], [0], [1], [0, 0, 1, 1], [], []>} : vector<192x28xf32>, vector<28x256xf32>, vector<192x256xf32> -> vector<192x256xf32>
    %6 = vector.extract_strided_slice %0 {offsets = [1, 0, 0], sizes = [24, 8, 28], strides = [1, 1, 1]} : vector<28x8x28xf32> to vector<24x8x28xf32>
    %7 = vector.shape_cast %6 : vector<24x8x28xf32> to vector<192x28xf32>
    %c1 = arith.constant 1 : index
    %c0_5 = arith.constant 0 : index
    %c0_6 = arith.constant 0 : index
    %8 = vector.load %arg2[%c1, %c0_5, %c0_6] : memref<5x28x256xf32, #tpu.memory_space<vmem>>, vector<1x28x256xf32>
    %9 = vector.shape_cast %8 : vector<1x28x256xf32> to vector<28x256xf32>
    %cst_7 = arith.constant dense<0.000000e+00> : vector<192x256xf32>
    %10 = tpu.matmul %7, %9, %cst_7 {dimension_numbers = #tpu.dot_dimension_numbers<[1], [0], [0], [1], [0, 0, 1, 1], [], []>} : vector<192x28xf32>, vector<28x256xf32>, vector<192x256xf32> -> vector<192x256xf32>
    %11 = arith.addf %5, %10 : vector<192x256xf32>
    %12 = vector.extract_strided_slice %0 {offsets = [2, 0, 0], sizes = [24, 8, 28], strides = [1, 1, 1]} : vector<28x8x28xf32> to vector<24x8x28xf32>
    %13 = vector.shape_cast %12 : vector<24x8x28xf32> to vector<192x28xf32>
    %c2 = arith.constant 2 : index
    %c0_8 = arith.constant 0 : index
    %c0_9 = arith.constant 0 : index
    %14 = vector.load %arg2[%c2, %c0_8, %c0_9] : memref<5x28x256xf32, #tpu.memory_space<vmem>>, vector<1x28x256xf32>
    %15 = vector.shape_cast %14 : vector<1x28x256xf32> to vector<28x256xf32>
    %cst_10 = arith.constant dense<0.000000e+00> : vector<192x256xf32>
    %16 = tpu.matmul %13, %15, %cst_10 {dimension_numbers = #tpu.dot_dimension_numbers<[1], [0], [0], [1], [0, 0, 1, 1], [], []>} : vector<192x28xf32>, vector<28x256xf32>, vector<192x256xf32> -> vector<192x256xf32>
    %17 = arith.addf %11, %16 : vector<192x256xf32>
    %18 = vector.extract_strided_slice %0 {offsets = [3, 0, 0], sizes = [24, 8, 28], strides = [1, 1, 1]} : vector<28x8x28xf32> to vector<24x8x28xf32>
    %19 = vector.shape_cast %18 : vector<24x8x28xf32> to vector<192x28xf32>
    %c3 = arith.constant 3 : index
    %c0_11 = arith.constant 0 : index
    %c0_12 = arith.constant 0 : index
    %20 = vector.load %arg2[%c3, %c0_11, %c0_12] : memref<5x28x256xf32, #tpu.memory_space<vmem>>, vector<1x28x256xf32>
    %21 = vector.shape_cast %20 : vector<1x28x256xf32> to vector<28x256xf32>
    %cst_13 = arith.constant dense<0.000000e+00> : vector<192x256xf32>
    %22 = tpu.matmul %19, %21, %cst_13 {dimension_numbers = #tpu.dot_dimension_numbers<[1], [0], [0], [1], [0, 0, 1, 1], [], []>} : vector<192x28xf32>, vector<28x256xf32>, vector<192x256xf32> -> vector<192x256xf32>
    %23 = arith.addf %17, %22 : vector<192x256xf32>
    %24 = vector.extract_strided_slice %0 {offsets = [4, 0, 0], sizes = [24, 8, 28], strides = [1, 1, 1]} : vector<28x8x28xf32> to vector<24x8x28xf32>
    %25 = vector.shape_cast %24 : vector<24x8x28xf32> to vector<192x28xf32>
    %c4 = arith.constant 4 : index
    %c0_14 = arith.constant 0 : index
    %c0_15 = arith.constant 0 : index
    %26 = vector.load %arg2[%c4, %c0_14, %c0_15] : memref<5x28x256xf32, #tpu.memory_space<vmem>>, vector<1x28x256xf32>
    %27 = vector.shape_cast %26 : vector<1x28x256xf32> to vector<28x256xf32>
    %cst_16 = arith.constant dense<0.000000e+00> : vector<192x256xf32>
    %28 = tpu.matmul %25, %27, %cst_16 {dimension_numbers = #tpu.dot_dimension_numbers<[1], [0], [0], [1], [0, 0, 1, 1], [], []>} : vector<192x28xf32>, vector<28x256xf32>, vector<192x256xf32> -> vector<192x256xf32>
    %29 = arith.addf %23, %28 : vector<192x256xf32>
    %c0_17 = arith.constant 0 : index
    %c0_18 = arith.constant 0 : index
    %30 = vector.load %arg3[%c0_17, %c0_18] : memref<1x256xf32, #tpu.memory_space<vmem>>, vector<1x256xf32>
    %31 = vector.broadcast %30 : vector<1x256xf32> to vector<192x256xf32>
    %32 = arith.addf %29, %31 : vector<192x256xf32>
    %33 = vector.extract_strided_slice %32 {offsets = [0, 0], sizes = [192, 128], strides = [1, 1]} : vector<192x256xf32> to vector<192x128xf32>
    %34 = vector.extract_strided_slice %32 {offsets = [0, 128], sizes = [192, 128], strides = [1, 1]} : vector<192x256xf32> to vector<192x128xf32>
    %35 = arith.maximumf %33, %34 : vector<192x128xf32>
    %cst_19 = arith.constant 0.000000e+00 : f32
    %36 = vector.broadcast %cst_19 : f32 to vector<192x128xf32>
    %37 = arith.maximumf %35, %36 : vector<192x128xf32>
    %38 = vector.shape_cast %37 : vector<192x128xf32> to vector<12x2x8x128xf32>
    %39 = vector.extract_strided_slice %38 {offsets = [0, 0, 0, 0], sizes = [12, 1, 8, 128], strides = [1, 1, 1, 1]} : vector<12x2x8x128xf32> to vector<12x1x8x128xf32>
    %40 = vector.shape_cast %39 : vector<12x1x8x128xf32> to vector<12x8x128xf32>
    %41 = vector.extract_strided_slice %38 {offsets = [0, 1, 0, 0], sizes = [12, 1, 8, 128], strides = [1, 1, 1, 1]} : vector<12x2x8x128xf32> to vector<12x1x8x128xf32>
    %42 = vector.shape_cast %41 : vector<12x1x8x128xf32> to vector<12x8x128xf32>
    %43 = arith.maximumf %40, %42 : vector<12x8x128xf32>
    %44 = vector.extract_strided_slice %43 {offsets = [0, 0, 0], sizes = [8, 8, 128], strides = [1, 1, 1]} : vector<12x8x128xf32> to vector<8x8x128xf32>
    %45 = vector.shape_cast %44 : vector<8x8x128xf32> to vector<64x128xf32>
    %c0_20 = arith.constant 0 : index
    %c0_21 = arith.constant 0 : index
    %c0_22 = arith.constant 0 : index
    %46 = vector.load %arg4[%c0_20, %c0_21, %c0_22] : memref<5x128x256xf32, #tpu.memory_space<vmem>>, vector<1x128x256xf32>
    %47 = vector.shape_cast %46 : vector<1x128x256xf32> to vector<128x256xf32>
    %cst_23 = arith.constant dense<0.000000e+00> : vector<64x256xf32>
    %48 = tpu.matmul %45, %47, %cst_23 {dimension_numbers = #tpu.dot_dimension_numbers<[1], [0], [0], [1], [0, 0, 1, 1], [], []>} : vector<64x128xf32>, vector<128x256xf32>, vector<64x256xf32> -> vector<64x256xf32>
    %49 = vector.extract_strided_slice %43 {offsets = [1, 0, 0], sizes = [8, 8, 128], strides = [1, 1, 1]} : vector<12x8x128xf32> to vector<8x8x128xf32>
    %50 = vector.shape_cast %49 : vector<8x8x128xf32> to vector<64x128xf32>
    %c1_24 = arith.constant 1 : index
    %c0_25 = arith.constant 0 : index
    %c0_26 = arith.constant 0 : index
    %51 = vector.load %arg4[%c1_24, %c0_25, %c0_26] : memref<5x128x256xf32, #tpu.memory_space<vmem>>, vector<1x128x256xf32>
    %52 = vector.shape_cast %51 : vector<1x128x256xf32> to vector<128x256xf32>
    %cst_27 = arith.constant dense<0.000000e+00> : vector<64x256xf32>
    %53 = tpu.matmul %50, %52, %cst_27 {dimension_numbers = #tpu.dot_dimension_numbers<[1], [0], [0], [1], [0, 0, 1, 1], [], []>} : vector<64x128xf32>, vector<128x256xf32>, vector<64x256xf32> -> vector<64x256xf32>
    %54 = arith.addf %48, %53 : vector<64x256xf32>
    %55 = vector.extract_strided_slice %43 {offsets = [2, 0, 0], sizes = [8, 8, 128], strides = [1, 1, 1]} : vector<12x8x128xf32> to vector<8x8x128xf32>
    %56 = vector.shape_cast %55 : vector<8x8x128xf32> to vector<64x128xf32>
    %c2_28 = arith.constant 2 : index
    %c0_29 = arith.constant 0 : index
    %c0_30 = arith.constant 0 : index
    %57 = vector.load %arg4[%c2_28, %c0_29, %c0_30] : memref<5x128x256xf32, #tpu.memory_space<vmem>>, vector<1x128x256xf32>
    %58 = vector.shape_cast %57 : vector<1x128x256xf32> to vector<128x256xf32>
    %cst_31 = arith.constant dense<0.000000e+00> : vector<64x256xf32>
    %59 = tpu.matmul %56, %58, %cst_31 {dimension_numbers = #tpu.dot_dimension_numbers<[1], [0], [0], [1], [0, 0, 1, 1], [], []>} : vector<64x128xf32>, vector<128x256xf32>, vector<64x256xf32> -> vector<64x256xf32>
    %60 = arith.addf %54, %59 : vector<64x256xf32>
    %61 = vector.extract_strided_slice %43 {offsets = [3, 0, 0], sizes = [8, 8, 128], strides = [1, 1, 1]} : vector<12x8x128xf32> to vector<8x8x128xf32>
    %62 = vector.shape_cast %61 : vector<8x8x128xf32> to vector<64x128xf32>
    %c3_32 = arith.constant 3 : index
    %c0_33 = arith.constant 0 : index
    %c0_34 = arith.constant 0 : index
    %63 = vector.load %arg4[%c3_32, %c0_33, %c0_34] : memref<5x128x256xf32, #tpu.memory_space<vmem>>, vector<1x128x256xf32>
    %64 = vector.shape_cast %63 : vector<1x128x256xf32> to vector<128x256xf32>
    %cst_35 = arith.constant dense<0.000000e+00> : vector<64x256xf32>
    %65 = tpu.matmul %62, %64, %cst_35 {dimension_numbers = #tpu.dot_dimension_numbers<[1], [0], [0], [1], [0, 0, 1, 1], [], []>} : vector<64x128xf32>, vector<128x256xf32>, vector<64x256xf32> -> vector<64x256xf32>
    %66 = arith.addf %60, %65 : vector<64x256xf32>
    %67 = vector.extract_strided_slice %43 {offsets = [4, 0, 0], sizes = [8, 8, 128], strides = [1, 1, 1]} : vector<12x8x128xf32> to vector<8x8x128xf32>
    %68 = vector.shape_cast %67 : vector<8x8x128xf32> to vector<64x128xf32>
    %c4_36 = arith.constant 4 : index
    %c0_37 = arith.constant 0 : index
    %c0_38 = arith.constant 0 : index
    %69 = vector.load %arg4[%c4_36, %c0_37, %c0_38] : memref<5x128x256xf32, #tpu.memory_space<vmem>>, vector<1x128x256xf32>
    %70 = vector.shape_cast %69 : vector<1x128x256xf32> to vector<128x256xf32>
    %cst_39 = arith.constant dense<0.000000e+00> : vector<64x256xf32>
    %71 = tpu.matmul %68, %70, %cst_39 {dimension_numbers = #tpu.dot_dimension_numbers<[1], [0], [0], [1], [0, 0, 1, 1], [], []>} : vector<64x128xf32>, vector<128x256xf32>, vector<64x256xf32> -> vector<64x256xf32>
    %72 = arith.addf %66, %71 : vector<64x256xf32>
    %c0_40 = arith.constant 0 : index
    %c0_41 = arith.constant 0 : index
    %73 = vector.load %arg5[%c0_40, %c0_41] : memref<1x256xf32, #tpu.memory_space<vmem>>, vector<1x256xf32>
    %74 = vector.broadcast %73 : vector<1x256xf32> to vector<64x256xf32>
    %75 = arith.addf %72, %74 : vector<64x256xf32>
    %76 = vector.extract_strided_slice %75 {offsets = [0, 0], sizes = [64, 128], strides = [1, 1]} : vector<64x256xf32> to vector<64x128xf32>
    %77 = vector.extract_strided_slice %75 {offsets = [0, 128], sizes = [64, 128], strides = [1, 1]} : vector<64x256xf32> to vector<64x128xf32>
    %78 = arith.maximumf %76, %77 : vector<64x128xf32>
    %cst_42 = arith.constant 0.000000e+00 : f32
    %79 = vector.broadcast %cst_42 : f32 to vector<64x128xf32>
    %80 = arith.maximumf %78, %79 : vector<64x128xf32>
    %81 = vector.shape_cast %80 : vector<64x128xf32> to vector<4x2x8x128xf32>
    %82 = vector.extract_strided_slice %81 {offsets = [0, 0, 0, 0], sizes = [4, 1, 8, 128], strides = [1, 1, 1, 1]} : vector<4x2x8x128xf32> to vector<4x1x8x128xf32>
    %83 = vector.shape_cast %82 : vector<4x1x8x128xf32> to vector<4x8x128xf32>
    %84 = vector.extract_strided_slice %81 {offsets = [0, 1, 0, 0], sizes = [4, 1, 8, 128], strides = [1, 1, 1, 1]} : vector<4x2x8x128xf32> to vector<4x1x8x128xf32>
    %85 = vector.shape_cast %84 : vector<4x1x8x128xf32> to vector<4x8x128xf32>
    %86 = arith.maximumf %83, %85 : vector<4x8x128xf32>
    %87 = vector.extract_strided_slice %86 {offsets = [0, 0, 0], sizes = [1, 8, 128], strides = [1, 1, 1]} : vector<4x8x128xf32> to vector<1x8x128xf32>
    %88 = vector.shape_cast %87 : vector<1x8x128xf32> to vector<8x128xf32>
    %c0_43 = arith.constant 0 : index
    %c0_44 = arith.constant 0 : index
    %c0_45 = arith.constant 0 : index
    %89 = vector.load %arg6[%c0_43, %c0_44, %c0_45] : memref<4x128x50xf32, #tpu.memory_space<vmem>>, vector<1x128x50xf32>
    %90 = vector.shape_cast %89 : vector<1x128x50xf32> to vector<128x50xf32>
    %cst_46 = arith.constant dense<0.000000e+00> : vector<8x50xf32>
    %91 = tpu.matmul %88, %90, %cst_46 {dimension_numbers = #tpu.dot_dimension_numbers<[1], [0], [0], [1], [0, 0, 1, 1], [], []>} : vector<8x128xf32>, vector<128x50xf32>, vector<8x50xf32> -> vector<8x50xf32>
    %92 = vector.extract_strided_slice %86 {offsets = [1, 0, 0], sizes = [1, 8, 128], strides = [1, 1, 1]} : vector<4x8x128xf32> to vector<1x8x128xf32>
    %93 = vector.shape_cast %92 : vector<1x8x128xf32> to vector<8x128xf32>
    %c1_47 = arith.constant 1 : index
    %c0_48 = arith.constant 0 : index
    %c0_49 = arith.constant 0 : index
    %94 = vector.load %arg6[%c1_47, %c0_48, %c0_49] : memref<4x128x50xf32, #tpu.memory_space<vmem>>, vector<1x128x50xf32>
    %95 = vector.shape_cast %94 : vector<1x128x50xf32> to vector<128x50xf32>
    %cst_50 = arith.constant dense<0.000000e+00> : vector<8x50xf32>
    %96 = tpu.matmul %93, %95, %cst_50 {dimension_numbers = #tpu.dot_dimension_numbers<[1], [0], [0], [1], [0, 0, 1, 1], [], []>} : vector<8x128xf32>, vector<128x50xf32>, vector<8x50xf32> -> vector<8x50xf32>
    %97 = arith.addf %91, %96 : vector<8x50xf32>
    %98 = vector.extract_strided_slice %86 {offsets = [2, 0, 0], sizes = [1, 8, 128], strides = [1, 1, 1]} : vector<4x8x128xf32> to vector<1x8x128xf32>
    %99 = vector.shape_cast %98 : vector<1x8x128xf32> to vector<8x128xf32>
    %c2_51 = arith.constant 2 : index
    %c0_52 = arith.constant 0 : index
    %c0_53 = arith.constant 0 : index
    %100 = vector.load %arg6[%c2_51, %c0_52, %c0_53] : memref<4x128x50xf32, #tpu.memory_space<vmem>>, vector<1x128x50xf32>
    %101 = vector.shape_cast %100 : vector<1x128x50xf32> to vector<128x50xf32>
    %cst_54 = arith.constant dense<0.000000e+00> : vector<8x50xf32>
    %102 = tpu.matmul %99, %101, %cst_54 {dimension_numbers = #tpu.dot_dimension_numbers<[1], [0], [0], [1], [0, 0, 1, 1], [], []>} : vector<8x128xf32>, vector<128x50xf32>, vector<8x50xf32> -> vector<8x50xf32>
    %103 = arith.addf %97, %102 : vector<8x50xf32>
    %104 = vector.extract_strided_slice %86 {offsets = [3, 0, 0], sizes = [1, 8, 128], strides = [1, 1, 1]} : vector<4x8x128xf32> to vector<1x8x128xf32>
    %105 = vector.shape_cast %104 : vector<1x8x128xf32> to vector<8x128xf32>
    %c3_55 = arith.constant 3 : index
    %c0_56 = arith.constant 0 : index
    %c0_57 = arith.constant 0 : index
    %106 = vector.load %arg6[%c3_55, %c0_56, %c0_57] : memref<4x128x50xf32, #tpu.memory_space<vmem>>, vector<1x128x50xf32>
    %107 = vector.shape_cast %106 : vector<1x128x50xf32> to vector<128x50xf32>
    %cst_58 = arith.constant dense<0.000000e+00> : vector<8x50xf32>
    %108 = tpu.matmul %105, %107, %cst_58 {dimension_numbers = #tpu.dot_dimension_numbers<[1], [0], [0], [1], [0, 0, 1, 1], [], []>} : vector<8x128xf32>, vector<128x50xf32>, vector<8x50xf32> -> vector<8x50xf32>
    %109 = arith.addf %103, %108 : vector<8x50xf32>
    %c0_59 = arith.constant 0 : index
    %c0_60 = arith.constant 0 : index
    %110 = vector.load %arg7[%c0_59, %c0_60] : memref<1x50xf32, #tpu.memory_space<vmem>>, vector<1x50xf32>
    %111 = vector.broadcast %110 : vector<1x50xf32> to vector<8x50xf32>
    %112 = arith.addf %109, %111 : vector<8x50xf32>
    %cst_61 = arith.constant 0.000000e+00 : f32
    %113 = vector.broadcast %cst_61 : f32 to vector<8x50xf32>
    %114 = arith.maximumf %112, %113 : vector<8x50xf32>
    %c0_62 = arith.constant 0 : index
    %c0_63 = arith.constant 0 : index
    %115 = vector.load %arg8[%c0_62, %c0_63] : memref<50x10xf32, #tpu.memory_space<vmem>>, vector<50x10xf32>
    %cst_64 = arith.constant dense<0.000000e+00> : vector<8x10xf32>
    %116 = tpu.matmul %114, %115, %cst_64 {dimension_numbers = #tpu.dot_dimension_numbers<[1], [0], [0], [1], [0, 0, 1, 1], [], []>} : vector<8x50xf32>, vector<50x10xf32>, vector<8x10xf32> -> vector<8x10xf32>
    %c0_65 = arith.constant 0 : index
    %c0_66 = arith.constant 0 : index
    %117 = vector.load %arg9[%c0_65, %c0_66] : memref<1x10xf32, #tpu.memory_space<vmem>>, vector<1x10xf32>
    %118 = vector.broadcast %117 : vector<1x10xf32> to vector<8x10xf32>
    %119 = arith.addf %116, %118 : vector<8x10xf32>
    %cst_67 = arith.constant dense<0xFF800000> : vector<8xf32>
    %120 = vector.multi_reduction <maximumf>, %119, %cst_67 [1] : vector<8x10xf32> to vector<8xf32>
    %121 = vector.shape_cast %120 : vector<8xf32> to vector<8x1xf32>
    %122 = vector.broadcast %121 : vector<8x1xf32> to vector<8x10xf32>
    %123 = arith.subf %119, %122 : vector<8x10xf32>
    %124 = math.exp %123 : vector<8x10xf32>
    %cst_68 = arith.constant dense<0.000000e+00> : vector<8xf32>
    %125 = vector.multi_reduction <add>, %124, %cst_68 [1] : vector<8x10xf32> to vector<8xf32>
    %126 = vector.shape_cast %125 : vector<8xf32> to vector<8x1xf32>
    %127 = math.log %126 : vector<8x1xf32>
    %128 = vector.broadcast %121 : vector<8x1xf32> to vector<8x10xf32>
    %129 = arith.subf %119, %128 : vector<8x10xf32>
    %130 = vector.broadcast %127 : vector<8x1xf32> to vector<8x10xf32>
    %131 = arith.subf %129, %130 : vector<8x10xf32>
    %c0_69 = arith.constant 0 : index
    %c0_70 = arith.constant 0 : index
    %132 = vector.load %arg10[%c0_69, %c0_70] : memref<8x10xf32, #tpu.memory_space<vmem>>, vector<8x10xf32>
    tpu.vector_store %arg10[%c0_69, %c0_70], %131 {strides = array<i32>} : memref<8x10xf32, #tpu.memory_space<vmem>>, vector<8x10xf32>,
    return
  }
  func.func @transform_0(%arg0: i32) -> (i32, i32, i32) {
    %c0_i32 = arith.constant 0 : i32
    %c0_i32_0 = arith.constant 0 : i32
    %c0_i32_1 = arith.constant 0 : i32
    return %c0_i32, %arg0, %c0_i32_0 : i32, i32, i32
  }
  func.func @transform_1(%arg0: i32) -> (i32, i32, i32) {
    %c0_i32 = arith.constant 0 : i32
    %c0_i32_0 = arith.constant 0 : i32
    %c0_i32_1 = arith.constant 0 : i32
    %c0_i32_2 = arith.constant 0 : i32
    return %c0_i32, %c0_i32_0, %c0_i32_1 : i32, i32, i32
  }
  func.func @transform_2(%arg0: i32) -> (i32, i32) {
    %c0_i32 = arith.constant 0 : i32
    %c0_i32_0 = arith.constant 0 : i32
    %c0_i32_1 = arith.constant 0 : i32
    return %c0_i32, %c0_i32_0 : i32, i32
  }
  func.func @transform_3(%arg0: i32) -> (i32, i32, i32) {
    %c0_i32 = arith.constant 0 : i32
    %c0_i32_0 = arith.constant 0 : i32
    %c0_i32_1 = arith.constant 0 : i32
    %c0_i32_2 = arith.constant 0 : i32
    return %c0_i32, %c0_i32_0, %c0_i32_1 : i32, i32, i32
  }
  func.func @transform_4(%arg0: i32) -> (i32, i32) {
    %c0_i32 = arith.constant 0 : i32
    %c0_i32_0 = arith.constant 0 : i32
    %c0_i32_1 = arith.constant 0 : i32
    return %c0_i32, %c0_i32_0 : i32, i32
  }
  func.func @transform_5(%arg0: i32) -> (i32, i32, i32) {
    %c0_i32 = arith.constant 0 : i32
    %c0_i32_0 = arith.constant 0 : i32
    %c0_i32_1 = arith.constant 0 : i32
    %c0_i32_2 = arith.constant 0 : i32
    return %c0_i32, %c0_i32_0, %c0_i32_1 : i32, i32, i32
  }
  func.func @transform_6(%arg0: i32) -> (i32, i32) {
    %c0_i32 = arith.constant 0 : i32
    %c0_i32_0 = arith.constant 0 : i32
    %c0_i32_1 = arith.constant 0 : i32
    return %c0_i32, %c0_i32_0 : i32, i32
  }
  func.func @transform_7(%arg0: i32) -> (i32, i32) {
    %c0_i32 = arith.constant 0 : i32
    %c0_i32_0 = arith.constant 0 : i32
    %c0_i32_1 = arith.constant 0 : i32
    return %c0_i32, %c0_i32_0 : i32, i32
  }
  func.func @transform_8(%arg0: i32) -> (i32, i32) {
    %c0_i32 = arith.constant 0 : i32
    %c0_i32_0 = arith.constant 0 : i32
    %c0_i32_1 = arith.constant 0 : i32
    return %c0_i32, %c0_i32_0 : i32, i32
  }
  func.func @transform_9(%arg0: i32) -> (i32, i32) {
    %c0_i32 = arith.constant 0 : i32
    %c0_i32_0 = arith.constant 0 : i32
    return %arg0, %c0_i32 : i32, i32
  }
}

</mosaic_0001>

<bundles_post_ra>
// kernel: tile.13
= control target key start
LH: loop header
LB: loop body
LE: loop exit
PB: predicated region body
PF: predicated region fallthrough
CT: control target
= control target key end

     0   :  { %s28_s0 = inlined_call_operand.vmem [shape: f32[10], index: 0, kind: input, shape index: {}]   ;;  %s29_s1 = inlined_call_operand.vmem [shape: f32[12,10], index: 1, kind: output, shape index: {}]  }
   0x1   :  { %v4_v0 = vld [vmem:[%s28_s0] ss:$0 sm:$0xff] }
   0x2   :  { %5 = vst [vmem:[%s29_s1] sm:$0xff] %v4_v0  ;;  %8 = vst [vmem:[%s29_s1 + $0x8] sm:$0xff] %v4_v0 }

// kernel: tile.18
= control target key start
LH: loop header
LB: loop body
LE: loop exit
PB: predicated region body
PF: predicated region fallthrough
CT: control target
= control target key end

     0   :  { %s22_s0 = inlined_call_operand.vmem [shape: f32[20], index: 0, kind: input, shape index: {}]   ;;  %s23_s1 = inlined_call_operand.vmem [shape: f32[4,20], index: 1, kind: output, shape index: {}]  }
   0x1   :  { %v4_v0 = vld [vmem:[%s22_s0] ss:$0 sm:$0xff] }
   0x2   :  { %5 = vst [vmem:[%s23_s1] sm:$0xf] %v4_v0 }

// kernel: cnn_mnist1_forward.1
= control target key start
LH: loop header
LB: loop body
LE: loop exit
PB: predicated region body
PF: predicated region fallthrough
CT: control target
= control target key end

     0   :  { %vm150_vm0 = vcmask 1043456   ;;  %v5626_v3 = vmov 0.0   ;;  %vm77_vm1 = vcmask 228352   ;;  %vm3404_vm2 = vmmov 0   ;;  %s5616_s1 = inlined_call_operand.vmem [shape: f32[5,28,256], index: 1, kind: input, shape index: {}]   ;;  %s5617_s0 = inlined_call_operand.vmem [shape: f32[28,8,28], index: 0, kind: input, shape index: {}]   ;;  %s5618_s3 = inlined_call_operand.vmem [shape: f32[5,128,256], index: 3, kind: input, shape index: {}]   ;;  %s5619_s2 = inlined_call_operand.vmem [shape: f32[1,256], index: 2, kind: input, shape index: {}]   ;;  %s5620_s5 = inlined_call_operand.vmem [shape: f32[4,128,50], index: 5, kind: input, shape index: {}]   ;;  %s5621_s4 = inlined_call_operand.vmem [shape: f32[1,256], index: 4, kind: input, shape index: {}]   ;;  %s5622_s7 = inlined_call_operand.vmem [shape: f32[50,10], index: 7, kind: input, shape index: {}]   ;;  %s5623_s6 = inlined_call_operand.vmem [shape: f32[1,50], index: 6, kind: input, shape index: {}]   ;;  %s5624_s8 = inlined_call_operand.vmem [shape: f32[1,10], index: 8, kind: input, shape index: {}]   ;;  %s5625_s9 = inlined_call_operand.vmem [shape: f32[8,10], index: 9, kind: output, shape index: {}]  }
   0x1   :  { %v2829_v0 = vld [vmem:[%s5616_s1 + $0x78] sm:$0xf]  ;;  %v2828_v2 = vld [vmem:[%s5616_s1 + $0x70] sm:$0xf]  ;;  %221 = vmatprep.mubr.f32.mxu0 %v5626_v3  ;;  %439 = vmatprep.mubr.f32.mxu1 %v5626_v3  ;;  %v2827_v5 = vld [vmem:[%s5616_s1 + $0x68] sm:$0xff]  ;;  %vm2730_vm3 = vcmask 1041408  }
   0x2   :  { %v67_v1 = vld [vmem:[%s5616_s1 + $0x38] sm:$0xf]  ;;  %2830 = vmatprep.subr.msk.mxu0 %vm150_vm0, %v2829_v0  ;;  %v66_v4 = vld [vmem:[%s5616_s1 + $0x30] sm:$0xf]  ;;  %v65_v6 = vld [vmem:[%s5616_s1 + $0x28] sm:$0xff]  ;;  %vm2726_vm4 = vcmask 408576  }
   0x3   :  { %2856 = vmatprep.subr.msk.mxu1 %vm150_vm0, %v67_v1  ;;  %2831 = vmatpush1.msk.msra.mxu0 %vm150_vm0, %v2828_v2  ;;  %v2826_v7 = vld [vmem:[%s5616_s1 + $0x60] sm:$0xff]  ;;  %v2825_v9 = vld [vmem:[%s5616_s1 + $0x58] sm:$0xff]  ;;  %v2824_v11 = vld [vmem:[%s5616_s1 + $0x50] sm:$0xff]  ;;  %vm2804_vm5 = vcmask 80896  }
   0x4   :  { %2857 = vmatpush1.msk.msra.mxu1 %vm150_vm0, %v66_v4  ;;  %v64_v8 = vld [vmem:[%s5616_s1 + $0x20] sm:$0xff]  ;;  %183 = vmatprep.subr.mxu0 %v2827_v5  ;;  %v63_v10 = vld [vmem:[%s5616_s1 + $0x18] sm:$0xff]  ;;  %v62_v12 = vld [vmem:[%s5616_s1 + $0x10] sm:$0xff] }
   0x5   :  { %401 = vmatprep.subr.mxu1 %v65_v6  ;;  %184 = vmatpush1.msra.mxu0 %v2826_v7  ;;  %v2823_v13 = vld [vmem:[%s5616_s1 + $0x48] sm:$0xff]  ;;  %v2822_v15 = vld [vmem:[%s5616_s1 + $0x40] sm:$0xff]  ;;  %v2889_v19 = vld [vmem:[%s5616_s1 + $0xb8] sm:$0xf] }
   0x6   :  { %402 = vmatpush1.msra.mxu1 %v64_v8  ;;  %v61_v14 = vld [vmem:[%s5616_s1 + $0x8] sm:$0xff]  ;;  %185 = vmatprep.subr.mxu0 %v2825_v9  ;;  %v60_v16 = vld [vmem:[%s5616_s1] sm:$0xff]  ;;  %v2888_v20 = vld [vmem:[%s5616_s1 + $0xb0] sm:$0xf] }
   0x7   :  { %403 = vmatprep.subr.mxu1 %v63_v10  ;;  %186 = vmatpush1.msra.mxu0 %v2824_v11  ;;  %v33_v17 = vld [vmem:[%s5617_s0 + $0x8] sm:$0xff]  ;;  %v32_v18 = vld [vmem:[%s5617_s0] sm:$0xff]  ;;  %v3531_v22 = vld [vmem:[%s5617_s0 + $0x10] sm:$0xff] }
   0x8   :  { %404 = vmatpush1.msra.mxu1 %v62_v12  ;;  %187 = vmatprep.subr.mxu0 %v2823_v13  ;;  %v2887_v21 = vld [vmem:[%s5616_s1 + $0xa8] sm:$0xff]  ;;  %v2886_v23 = vld [vmem:[%s5616_s1 + $0xa0] sm:$0xff]  ;;  %v2885_v24 = vld [vmem:[%s5616_s1 + $0x98] sm:$0xff] }
   0x9   :  { %405 = vmatprep.subr.mxu1 %v61_v14  ;;  %188 = vmatpush1.msra.mxu0 %v2822_v15  ;;  %v3549_v25 = vld [vmem:[%s5617_s0 + $0x18] sm:$0xff]  ;;  %v2884_v26 = vld [vmem:[%s5616_s1 + $0x90] sm:$0xff]  ;;  %v2883_v28 = vld [vmem:[%s5616_s1 + $0x88] sm:$0xff] }
   0xa   :  { %406 = vmatpush1.msra.mxu1 %v60_v16  ;;  %2832 = vmatmul.mubr.msk.f32.vlgmr.msra.gmra.mxu0 %vm77_vm1, %v33_v17  ;;  %v2923_v27 = vld [vmem:[%s5616_s1 + $0xf8] sm:$0xf]  ;;  %v2922_v29 = vld [vmem:[%s5616_s1 + $0xf0] sm:$0xf]  ;;  %v3572_v30 = vld [vmem:[%s5617_s0 + $0x20] sm:$0xff] }
   0xb   :  { %2858 = vmatmul.mubr.msk.f32.vlgmr.msra.gmra.mxu1 %vm77_vm1, %v32_v18  ;;  %2890 = vmatprep.subr.msk.mxu0 %vm150_vm0, %v2889_v19  ;;  %v2882_v31 = vld [vmem:[%s5616_s1 + $0x80] sm:$0xff]  ;;  %v2921_v32 = vld [vmem:[%s5616_s1 + $0xe8] sm:$0xff]  ;;  %v2957_v34 = vld [vmem:[%s5616_s1 + $0x138] sm:$0xf] }
   0xc   :  { %227 = vmatprep.mubr.f32.mxu0 %v5626_v3  ;;  %2891 = vmatpush1.msk.msra.mxu0 %vm150_vm0, %v2888_v20  ;;  %v2920_v33 = vld [vmem:[%s5616_s1 + $0xe0] sm:$0xff]  ;;  %v3597_v35 = vld [vmem:[%s5617_s0 + $0x28] sm:$0xff]  ;;  %v2919_v36 = vld [vmem:[%s5616_s1 + $0xd8] sm:$0xff] }
   0xd   :  { %445 = vmatprep.mubr.f32.mxu1 %v5626_v3  ;;  %628 = vmatprep.subr.mxu0 %v2887_v21  ;;  %v2918_v37 = vld [vmem:[%s5616_s1 + $0xd0] sm:$0xff]  ;;  %v2917_v39 = vld [vmem:[%s5616_s1 + $0xc8] sm:$0xff]  ;;  %v2916_v40 = vld [vmem:[%s5616_s1 + $0xc0] sm:$0xff] }
   0xe   :  { %2833 = vmatmul.mubr.msk.f32.gmra.mxu0 %vm77_vm1, %v3531_v22  ;;  %2924 = vmatprep.subr.msk.mxu1 %vm150_vm0, %v2923_v27  ;;  %v3615_v38 = vld [vmem:[%s5617_s0 + $0x30] sm:$0xff]  ;;  %v3632_v41 = vld [vmem:[%s5617_s0 + $0x38] sm:$0xff]  ;;  %v3643_v42 = vld [vmem:[%s5617_s0 + $0x40] sm:$0xff] }
   0xf   :  { %2859 = vmatmul.mubr.msk.f32.gmra.mxu1 %vm77_vm1, %v33_v17  ;;  %233 = vmatprep.mubr.f32.mxu0 %v5626_v3  ;;  %v3654_v43 = vld [vmem:[%s5617_s0 + $0x48] sm:$0xff]  ;;  %v3665_v44 = vld [vmem:[%s5617_s0 + $0x50] sm:$0xff]  ;;  %v3676_v45 = vld [vmem:[%s5617_s0 + $0x58] sm:$0xff] }
  0x10   :  { %451 = vmatprep.mubr.f32.mxu1 %v5626_v3  ;;  %629 = vmatpush1.msra.mxu0 %v2886_v23  ;;  %v3687_v46 = vld [vmem:[%s5617_s0 + $0x60] sm:$0xff]  ;;  %v3698_v47 = vld [vmem:[%s5617_s0 + $0x68] sm:$0xff]  ;;  %v3709_v48 = vld [vmem:[%s5617_s0 + $0x70] sm:$0xff] }
  0x11   :  { %630 = vmatprep.subr.mxu0 %v2885_v24  ;;  %2925 = vmatpush1.msk.msra.mxu1 %vm150_vm0, %v2922_v29  ;;  %v3720_v49 = vld [vmem:[%s5617_s0 + $0x78] sm:$0xff]  ;;  %v3731_v50 = vld [vmem:[%s5617_s0 + $0x80] sm:$0xff]  ;;  %v3742_v51 = vld [vmem:[%s5617_s0 + $0x88] sm:$0xff] }
  0x12   :  { %2834 = vmatmul.mubr.msk.f32.gmra.mxu0 %vm77_vm1, %v3549_v25  ;;  %903 = vmatprep.subr.mxu1 %v2921_v32  ;;  %v3753_v52 = vld [vmem:[%s5617_s0 + $0x90] sm:$0xff]  ;;  %v3764_v53 = vld [vmem:[%s5617_s0 + $0x98] sm:$0xff]  ;;  %v3775_v54 = vld [vmem:[%s5617_s0 + $0xa0] sm:$0xff] }
  0x13   :  { %2860 = vmatmul.mubr.msk.f32.gmra.mxu1 %vm77_vm1, %v3531_v22  ;;  %239 = vmatprep.mubr.f32.mxu0 %v5626_v3  ;;  %v3786_v55 = vld [vmem:[%s5617_s0 + $0xa8] sm:$0xff]  ;;  %v3797_v56 = vld [vmem:[%s5617_s0 + $0xb0] sm:$0xff]  ;;  %v3808_v57 = vld [vmem:[%s5617_s0 + $0xb8] sm:$0xff] }
  0x14   :  { %457 = vmatprep.mubr.f32.mxu1 %v5626_v3  ;;  %631 = vmatpush1.msra.mxu0 %v2884_v26  ;;  %v3819_v58 = vld [vmem:[%s5617_s0 + $0xc0] sm:$0xff]  ;;  %v2956_v59 = vld [vmem:[%s5616_s1 + $0x130] sm:$0xf]  ;;  %v2955_v60 = vld [vmem:[%s5616_s1 + $0x128] sm:$0xff] }
  0x15   :  { %632 = vmatprep.subr.mxu0 %v2883_v28  ;;  %904 = vmatpush1.msra.mxu1 %v2920_v33  ;;  %v2954_v61 = vld [vmem:[%s5616_s1 + $0x120] sm:$0xff]  ;;  %v2953_v62 = vld [vmem:[%s5616_s1 + $0x118] sm:$0xff]  ;;  %v2952_v63 = vld [vmem:[%s5616_s1 + $0x110] sm:$0xff] }
  0x16   :  { %2835 = vmatmul.mubr.msk.f32.gmra.mxu0 %vm77_vm1, %v3572_v30  ;;  %905 = vmatprep.subr.mxu1 %v2919_v36  ;;  %v2951_v0 = vld [vmem:[%s5616_s1 + $0x108] sm:$0xff]  ;;  %v2950_v1 = vld [vmem:[%s5616_s1 + $0x100] sm:$0xff]  ;;  %v3995_v4 = vld [vmem:[%s5617_s0 + $0xd0] sm:$0xff] }
  0x17   :  { %2861 = vmatmul.mubr.msk.f32.gmra.mxu1 %vm77_vm1, %v3549_v25  ;;  %245 = vmatprep.mubr.f32.mxu0 %v5626_v3  ;;  %v3984_v2 = vld [vmem:[%s5617_s0 + $0xc8] sm:$0xff]  ;;  %v3014_v36 = vld [vmem:[%s5618_s3 + $0x1f0] sm:$0xff] }
  0x18   :  { %463 = vmatprep.mubr.f32.mxu1 %v5626_v3  ;;  %633 = vmatpush1.msra.mxu0 %v2882_v31 }
  0x19   :  { %2958 = vmatprep.subr.msk.mxu0 %vm150_vm0, %v2957_v34  ;;  %906 = vmatpush1.msra.mxu1 %v2918_v37 }
  0x1a   :  { %2836 = vmatmul.mubr.msk.f32.gmra.mxu0 %vm77_vm1, %v3597_v35  ;;  %907 = vmatprep.subr.mxu1 %v2917_v39 }
  0x1b   :  { %2862 = vmatmul.mubr.msk.f32.gmra.mxu1 %vm77_vm1, %v3572_v30  ;;  %251 = vmatprep.mubr.f32.mxu0 %v5626_v3 }
  0x1c   :  { %469 = vmatprep.mubr.f32.mxu1 %v5626_v3  ;;  %908 = vmatpush1.msra.mxu1 %v2916_v40 }
  0x1e   :  { %2837 = vmatmul.mubr.msk.f32.gmra.mxu0 %vm77_vm1, %v3615_v38 }
  0x1f   :  { %2863 = vmatmul.mubr.msk.f32.gmra.mxu1 %vm77_vm1, %v3597_v35  ;;  %257 = vmatprep.mubr.f32.mxu0 %v5626_v3 }
  0x20   :  { %475 = vmatprep.mubr.f32.mxu1 %v5626_v3 }
  0x22   :  { %2838 = vmatmul.mubr.msk.f32.gmra.mxu0 %vm77_vm1, %v3632_v41 }
  0x23   :  { %2864 = vmatmul.mubr.msk.f32.gmra.mxu1 %vm77_vm1, %v3615_v38  ;;  %263 = vmatprep.mubr.f32.mxu0 %v5626_v3 }
  0x24   :  { %481 = vmatprep.mubr.f32.mxu1 %v5626_v3 }
  0x26   :  { %2839 = vmatmul.mubr.msk.f32.gmra.mxu0 %vm77_vm1, %v3643_v42 }
  0x27   :  { %2865 = vmatmul.mubr.msk.f32.gmra.mxu1 %vm77_vm1, %v3632_v41  ;;  %269 = vmatprep.mubr.f32.mxu0 %v5626_v3 }
  0x28   :  { %487 = vmatprep.mubr.f32.mxu1 %v5626_v3 }
  0x2a   :  { %2840 = vmatmul.mubr.msk.f32.gmra.mxu0 %vm77_vm1, %v3654_v43 }
  0x2b   :  { %2866 = vmatmul.mubr.msk.f32.gmra.mxu1 %vm77_vm1, %v3643_v42  ;;  %275 = vmatprep.mubr.f32.mxu0 %v5626_v3 }
  0x2c   :  { %493 = vmatprep.mubr.f32.mxu1 %v5626_v3 }
  0x2e   :  { %2841 = vmatmul.mubr.msk.f32.gmra.mxu0 %vm77_vm1, %v3665_v44 }
  0x2f   :  { %2867 = vmatmul.mubr.msk.f32.gmra.mxu1 %vm77_vm1, %v3654_v43  ;;  %281 = vmatprep.mubr.f32.mxu0 %v5626_v3 }
  0x30   :  { %499 = vmatprep.mubr.f32.mxu1 %v5626_v3 }
  0x32   :  { %2842 = vmatmul.mubr.msk.f32.gmra.mxu0 %vm77_vm1, %v3676_v45 }
  0x33   :  { %2868 = vmatmul.mubr.msk.f32.gmra.mxu1 %vm77_vm1, %v3665_v44  ;;  %287 = vmatprep.mubr.f32.mxu0 %v5626_v3 }
  0x34   :  { %505 = vmatprep.mubr.f32.mxu1 %v5626_v3 }
  0x36   :  { %2843 = vmatmul.mubr.msk.f32.gmra.mxu0 %vm77_vm1, %v3687_v46 }
  0x37   :  { %2869 = vmatmul.mubr.msk.f32.gmra.mxu1 %vm77_vm1, %v3676_v45  ;;  %293 = vmatprep.mubr.f32.mxu0 %v5626_v3 }
  0x38   :  { %511 = vmatprep.mubr.f32.mxu1 %v5626_v3 }
  0x3a   :  { %2844 = vmatmul.mubr.msk.f32.gmra.mxu0 %vm77_vm1, %v3698_v47 }
  0x3b   :  { %2870 = vmatmul.mubr.msk.f32.gmra.mxu1 %vm77_vm1, %v3687_v46  ;;  %299 = vmatprep.mubr.f32.mxu0 %v5626_v3 }
  0x3c   :  { %517 = vmatprep.mubr.f32.mxu1 %v5626_v3 }
  0x3e   :  { %2845 = vmatmul.mubr.msk.f32.gmra.mxu0 %vm77_vm1, %v3709_v48 }
  0x3f   :  { %2871 = vmatmul.mubr.msk.f32.gmra.mxu1 %vm77_vm1, %v3698_v47  ;;  %305 = vmatprep.mubr.f32.mxu0 %v5626_v3 }
  0x40   :  { %523 = vmatprep.mubr.f32.mxu1 %v5626_v3 }
  0x42   :  { %2846 = vmatmul.mubr.msk.f32.gmra.mxu0 %vm77_vm1, %v3720_v49 }
  0x43   :  { %2872 = vmatmul.mubr.msk.f32.gmra.mxu1 %vm77_vm1, %v3709_v48  ;;  %311 = vmatprep.mubr.f32.mxu0 %v5626_v3 }
  0x44   :  { %529 = vmatprep.mubr.f32.mxu1 %v5626_v3 }
  0x46   :  { %2847 = vmatmul.mubr.msk.f32.gmra.mxu0 %vm77_vm1, %v3731_v50 }
  0x47   :  { %2873 = vmatmul.mubr.msk.f32.gmra.mxu1 %vm77_vm1, %v3720_v49  ;;  %317 = vmatprep.mubr.f32.mxu0 %v5626_v3 }
  0x48   :  { %535 = vmatprep.mubr.f32.mxu1 %v5626_v3 }
  0x4a   :  { %2848 = vmatmul.mubr.msk.f32.gmra.mxu0 %vm77_vm1, %v3742_v51 }
  0x4b   :  { %2874 = vmatmul.mubr.msk.f32.gmra.mxu1 %vm77_vm1, %v3731_v50  ;;  %323 = vmatprep.mubr.f32.mxu0 %v5626_v3 }
  0x4c   :  { %541 = vmatprep.mubr.f32.mxu1 %v5626_v3 }
  0x4e   :  { %2849 = vmatmul.mubr.msk.f32.gmra.mxu0 %vm77_vm1, %v3753_v52 }
  0x4f   :  { %2875 = vmatmul.mubr.msk.f32.gmra.mxu1 %vm77_vm1, %v3742_v51  ;;  %329 = vmatprep.mubr.f32.mxu0 %v5626_v3 }
  0x50   :  { %547 = vmatprep.mubr.f32.mxu1 %v5626_v3 }
  0x52   :  { %2850 = vmatmul.mubr.msk.f32.gmra.mxu0 %vm77_vm1, %v3764_v53 }
  0x53   :  { %2876 = vmatmul.mubr.msk.f32.gmra.mxu1 %vm77_vm1, %v3753_v52  ;;  %335 = vmatprep.mubr.f32.mxu0 %v5626_v3 }
  0x54   :  { %553 = vmatprep.mubr.f32.mxu1 %v5626_v3 }
  0x56   :  { %2851 = vmatmul.mubr.msk.f32.gmra.mxu0 %vm77_vm1, %v3775_v54 }
  0x57   :  { %2877 = vmatmul.mubr.msk.f32.gmra.mxu1 %vm77_vm1, %v3764_v53  ;;  %341 = vmatprep.mubr.f32.mxu0 %v5626_v3 }
  0x58   :  { %559 = vmatprep.mubr.f32.mxu1 %v5626_v3 }
  0x5a   :  { %2852 = vmatmul.mubr.msk.f32.gmra.mxu0 %vm77_vm1, %v3786_v55 }
  0x5b   :  { %2878 = vmatmul.mubr.msk.f32.gmra.mxu1 %vm77_vm1, %v3775_v54  ;;  %347 = vmatprep.mubr.f32.mxu0 %v5626_v3 }
  0x5c   :  { %565 = vmatprep.mubr.f32.mxu1 %v5626_v3 }
  0x5e   :  { %2853 = vmatmul.mubr.msk.f32.gmra.mxu0 %vm77_vm1, %v3797_v56 }
  0x5f   :  { %2879 = vmatmul.mubr.msk.f32.gmra.mxu1 %vm77_vm1, %v3786_v55  ;;  %353 = vmatprep.mubr.f32.mxu0 %v5626_v3 }
  0x60   :  { %571 = vmatprep.mubr.f32.mxu1 %v5626_v3 }
  0x62   :  { %2854 = vmatmul.mubr.msk.f32.gmra.mxu0 %vm77_vm1, %v3808_v57 }
  0x63   :  { %2880 = vmatmul.mubr.msk.f32.gmra.mxu1 %vm77_vm1, %v3797_v56  ;;  %359 = vmatprep.mubr.f32.mxu0 %v5626_v3 }
  0x64   :  { %577 = vmatprep.mubr.f32.mxu1 %v5626_v3 }
  0x66   :  { %2855 = vmatmul.mubr.msk.f32.gmra.mxu0 %vm77_vm1, %v3819_v58 }
  0x67   :  { %2881 = vmatmul.mubr.msk.f32.gmra.mxu1 %vm77_vm1, %v3808_v57  ;;  %666 = vmatprep.mubr.f32.mxu0 %v5626_v3 }
  0x68   :  { %941 = vmatprep.mubr.f32.mxu1 %v5626_v3 }
  0x6a   :  { %2892 = vmatmul.mubr.msk.f32.vlgmr.msra.gmra.mxu0 %vm77_vm1, %v3531_v22 }
  0x6b   :  { %2926 = vmatmul.mubr.msk.f32.vlgmr.msra.gmra.mxu1 %vm77_vm1, %v3549_v25  ;;  %2959 = vmatpush1.msk.msra.mxu0 %vm150_vm0, %v2956_v59 }
  0x6c   :  { %672 = vmatprep.mubr.f32.mxu0 %v5626_v3  ;;  %947 = vmatprep.mubr.f32.mxu1 %v5626_v3 }
  0x6d   :  { %1178 = vmatprep.subr.mxu0 %v2955_v60  ;;  %v3012_v60 = vld [vmem:[%s5618_s3 + $0x1e0] sm:$0xff] }
  0x6e   :  { %1179 = vmatpush1.msra.mxu0 %v2954_v61 }
  0x6f   :  { %2893 = vmatmul.mubr.msk.f32.gmra.mxu0 %vm77_vm1, %v3549_v25  ;;  %2927 = vmatmul.mubr.msk.f32.gmra.mxu1 %vm77_vm1, %v3572_v30 }
  0x70   :  { %678 = vmatprep.mubr.f32.mxu0 %v5626_v3  ;;  %953 = vmatprep.mubr.f32.mxu1 %v5626_v3 }
  0x71   :  { %1180 = vmatprep.subr.mxu0 %v2953_v62 }
  0x72   :  { %1181 = vmatpush1.msra.mxu0 %v2952_v63 }
  0x73   :  { %2894 = vmatmul.mubr.msk.f32.gmra.mxu0 %vm77_vm1, %v3572_v30  ;;  %2928 = vmatmul.mubr.msk.f32.gmra.mxu1 %vm77_vm1, %v3597_v35 }
  0x74   :  { %684 = vmatprep.mubr.f32.mxu0 %v5626_v3  ;;  %959 = vmatprep.mubr.f32.mxu1 %v5626_v3 }
  0x75   :  { %1182 = vmatprep.subr.mxu0 %v2951_v0 }
  0x76   :  { %1183 = vmatpush1.msra.mxu0 %v2950_v1  ;;  %v3011_v1 = vld [vmem:[%s5618_s3 + $0x1d8] sm:$0xff] }
  0x77   :  { %2895 = vmatmul.mubr.msk.f32.gmra.mxu0 %vm77_vm1, %v3597_v35  ;;  %2929 = vmatmul.mubr.msk.f32.gmra.mxu1 %vm77_vm1, %v3615_v38 }
  0x78   :  { %690 = vmatprep.mubr.f32.mxu0 %v5626_v3  ;;  %965 = vmatprep.mubr.f32.mxu1 %v5626_v3 }
  0x7b   :  { %2896 = vmatmul.mubr.msk.f32.gmra.mxu0 %vm77_vm1, %v3615_v38  ;;  %2930 = vmatmul.mubr.msk.f32.gmra.mxu1 %vm77_vm1, %v3632_v41 }
  0x7c   :  { %696 = vmatprep.mubr.f32.mxu0 %v5626_v3  ;;  %971 = vmatprep.mubr.f32.mxu1 %v5626_v3 }
  0x7f   :  { %2897 = vmatmul.mubr.msk.f32.gmra.mxu0 %vm77_vm1, %v3632_v41  ;;  %2931 = vmatmul.mubr.msk.f32.gmra.mxu1 %vm77_vm1, %v3643_v42 }
  0x80   :  { %702 = vmatprep.mubr.f32.mxu0 %v5626_v3  ;;  %977 = vmatprep.mubr.f32.mxu1 %v5626_v3 }
  0x83   :  { %2898 = vmatmul.mubr.msk.f32.gmra.mxu0 %vm77_vm1, %v3643_v42  ;;  %2932 = vmatmul.mubr.msk.f32.gmra.mxu1 %vm77_vm1, %v3654_v43 }
  0x84   :  { %708 = vmatprep.mubr.f32.mxu0 %v5626_v3  ;;  %983 = vmatprep.mubr.f32.mxu1 %v5626_v3 }
  0x87   :  { %2899 = vmatmul.mubr.msk.f32.gmra.mxu0 %vm77_vm1, %v3654_v43  ;;  %2933 = vmatmul.mubr.msk.f32.gmra.mxu1 %vm77_vm1, %v3665_v44 }
  0x88   :  { %714 = vmatprep.mubr.f32.mxu0 %v5626_v3  ;;  %989 = vmatprep.mubr.f32.mxu1 %v5626_v3 }
  0x8b   :  { %2900 = vmatmul.mubr.msk.f32.gmra.mxu0 %vm77_vm1, %v3665_v44  ;;  %2934 = vmatmul.mubr.msk.f32.gmra.mxu1 %vm77_vm1, %v3676_v45 }
  0x8c   :  { %720 = vmatprep.mubr.f32.mxu0 %v5626_v3  ;;  %995 = vmatprep.mubr.f32.mxu1 %v5626_v3 }
  0x8f   :  { %2901 = vmatmul.mubr.msk.f32.gmra.mxu0 %vm77_vm1, %v3676_v45  ;;  %2935 = vmatmul.mubr.msk.f32.gmra.mxu1 %vm77_vm1, %v3687_v46 }
  0x90   :  { %726 = vmatprep.mubr.f32.mxu0 %v5626_v3  ;;  %1001 = vmatprep.mubr.f32.mxu1 %v5626_v3 }
  0x93   :  { %2902 = vmatmul.mubr.msk.f32.gmra.mxu0 %vm77_vm1, %v3687_v46  ;;  %2936 = vmatmul.mubr.msk.f32.gmra.mxu1 %vm77_vm1, %v3698_v47 }
  0x94   :  { %732 = vmatprep.mubr.f32.mxu0 %v5626_v3  ;;  %1007 = vmatprep.mubr.f32.mxu1 %v5626_v3 }
  0x97   :  { %2903 = vmatmul.mubr.msk.f32.gmra.mxu0 %vm77_vm1, %v3698_v47  ;;  %2937 = vmatmul.mubr.msk.f32.gmra.mxu1 %vm77_vm1, %v3709_v48 }
  0x98   :  { %738 = vmatprep.mubr.f32.mxu0 %v5626_v3  ;;  %1013 = vmatprep.mubr.f32.mxu1 %v5626_v3 }
  0x9b   :  { %2904 = vmatmul.mubr.msk.f32.gmra.mxu0 %vm77_vm1, %v3709_v48  ;;  %2938 = vmatmul.mubr.msk.f32.gmra.mxu1 %vm77_vm1, %v3720_v49 }
  0x9c   :  { %744 = vmatprep.mubr.f32.mxu0 %v5626_v3  ;;  %1019 = vmatprep.mubr.f32.mxu1 %v5626_v3 }
  0x9f   :  { %2905 = vmatmul.mubr.msk.f32.gmra.mxu0 %vm77_vm1, %v3720_v49  ;;  %2939 = vmatmul.mubr.msk.f32.gmra.mxu1 %vm77_vm1, %v3731_v50 }
  0xa0   :  { %750 = vmatprep.mubr.f32.mxu0 %v5626_v3  ;;  %1025 = vmatprep.mubr.f32.mxu1 %v5626_v3 }
  0xa3   :  { %2906 = vmatmul.mubr.msk.f32.gmra.mxu0 %vm77_vm1, %v3731_v50  ;;  %2940 = vmatmul.mubr.msk.f32.gmra.mxu1 %vm77_vm1, %v3742_v51 }
  0xa4   :  { %756 = vmatprep.mubr.f32.mxu0 %v5626_v3  ;;  %1031 = vmatprep.mubr.f32.mxu1 %v5626_v3 }
  0xa7   :  { %2907 = vmatmul.mubr.msk.f32.gmra.mxu0 %vm77_vm1, %v3742_v51  ;;  %2941 = vmatmul.mubr.msk.f32.gmra.mxu1 %vm77_vm1, %v3753_v52 }
  0xa8   :  { %762 = vmatprep.mubr.f32.mxu0 %v5626_v3  ;;  %1037 = vmatprep.mubr.f32.mxu1 %v5626_v3 }
  0xab   :  { %2908 = vmatmul.mubr.msk.f32.gmra.mxu0 %vm77_vm1, %v3753_v52  ;;  %2942 = vmatmul.mubr.msk.f32.gmra.mxu1 %vm77_vm1, %v3764_v53 }
  0xac   :  { %768 = vmatprep.mubr.f32.mxu0 %v5626_v3  ;;  %1043 = vmatprep.mubr.f32.mxu1 %v5626_v3 }
  0xaf   :  { %2909 = vmatmul.mubr.msk.f32.gmra.mxu0 %vm77_vm1, %v3764_v53  ;;  %2943 = vmatmul.mubr.msk.f32.gmra.mxu1 %vm77_vm1, %v3775_v54 }
  0xb0   :  { %774 = vmatprep.mubr.f32.mxu0 %v5626_v3  ;;  %1049 = vmatprep.mubr.f32.mxu1 %v5626_v3 }
  0xb3   :  { %2910 = vmatmul.mubr.msk.f32.gmra.mxu0 %vm77_vm1, %v3775_v54  ;;  %2944 = vmatmul.mubr.msk.f32.gmra.mxu1 %vm77_vm1, %v3786_v55 }
  0xb4   :  { %780 = vmatprep.mubr.f32.mxu0 %v5626_v3  ;;  %1055 = vmatprep.mubr.f32.mxu1 %v5626_v3 }
  0xb7   :  { %2911 = vmatmul.mubr.msk.f32.gmra.mxu0 %vm77_vm1, %v3786_v55  ;;  %2945 = vmatmul.mubr.msk.f32.gmra.mxu1 %vm77_vm1, %v3797_v56 }
  0xb8   :  { %786 = vmatprep.mubr.f32.mxu0 %v5626_v3  ;;  %1061 = vmatprep.mubr.f32.mxu1 %v5626_v3 }
  0xbb   :  { %2912 = vmatmul.mubr.msk.f32.gmra.mxu0 %vm77_vm1, %v3797_v56  ;;  %2946 = vmatmul.mubr.msk.f32.gmra.mxu1 %vm77_vm1, %v3808_v57 }
  0xbc   :  { %792 = vmatprep.mubr.f32.mxu0 %v5626_v3  ;;  %1067 = vmatprep.mubr.f32.mxu1 %v5626_v3 }
  0xbf   :  { %2913 = vmatmul.mubr.msk.f32.gmra.mxu0 %vm77_vm1, %v3808_v57  ;;  %2947 = vmatmul.mubr.msk.f32.gmra.mxu1 %vm77_vm1, %v3819_v58 }
  0xc0   :  { %798 = vmatprep.mubr.f32.mxu0 %v5626_v3  ;;  %1073 = vmatprep.mubr.f32.mxu1 %v5626_v3 }
  0xc3   :  { %2914 = vmatmul.mubr.msk.f32.gmra.mxu0 %vm77_vm1, %v3819_v58  ;;  %2948 = vmatmul.mubr.msk.f32.gmra.mxu1 %vm77_vm1, %v3984_v2 }
  0xc4   :  { %804 = vmatprep.mubr.f32.mxu0 %v5626_v3  ;;  %1079 = vmatprep.mubr.f32.mxu1 %v5626_v3 }
  0xc7   :  { %2915 = vmatmul.mubr.msk.f32.gmra.mxu0 %vm77_vm1, %v3984_v2  ;;  %2949 = vmatmul.mubr.msk.f32.gmra.mxu1 %vm77_vm1, %v3995_v4 }
  0xc8   :  { %1216 = vmatprep.mubr.f32.mxu0 %v5626_v3  ;;  %1658 = vmatprep.mubr.f32.mxu1 %v5626_v3 }
  0xca   :  { %v223_v5 = vpop.f32.mrf.mxu0 }
  0xcb   :  { %v441_v6 = vpop.f32.mrf.mxu1  ;;  %2960 = vmatmul.mubr.msk.f32.vlgmr.msra.gmra.mxu0 %vm77_vm1, %v3572_v30 }
  0xcc   :  { %v4005_v7 = vadd.f32 %v441_v6, %v223_v5  ;;  %1222 = vmatprep.mubr.f32.mxu0 %v5626_v3  ;;  %v4008_v8 = vpop.f32.mrf.mxu0 }
  0xcd   :  { %v4010_v9 = vpop.f32.mrf.mxu1 }
  0xce   :  { %v229_v10 = vpop.f32.mrf.mxu0 }
  0xcf   :  { %v447_v11 = vpop.f32.mrf.mxu1  ;;  %2961 = vmatmul.mubr.msk.f32.gmra.mxu0 %vm77_vm1, %v3597_v35  ;;  %v3015_v35 = vld [vmem:[%s5618_s3 + $0x1f8] sm:$0xff] }
  0xd0   :  { %v4014_v12 = vadd.f32 %v447_v11, %v229_v10  ;;  %1228 = vmatprep.mubr.f32.mxu0 %v5626_v3  ;;  %v4017_v13 = vpop.f32.mrf.mxu0  ;;  %1594 = vmatprep.subr.mxu1 %v3015_v35  ;;  %v3010_v10 = vld [vmem:[%s5618_s3 + $0x1d0] sm:$0xff] }
  0xd1   :  { %5631 = vst [vmem:[#allocation2_spill] sm:$0xff] %v4017_v13  ;;  %v4019_v14 = vpop.f32.mrf.mxu1  ;;  %1595 = vmatpush1.msra.mxu1 %v3014_v36 }
  0xd2   :  { %5632 = vst [vmem:[#allocation3_spill] sm:$0xff] %v4019_v14  ;;  %v235_v15 = vpop.f32.mrf.mxu0 }
  0xd3   :  { %v453_v16 = vpop.f32.mrf.mxu1  ;;  %2962 = vmatmul.mubr.msk.f32.gmra.mxu0 %vm77_vm1, %v3615_v38 }
  0xd4   :  { %v4023_v17 = vadd.f32 %v453_v16, %v235_v15  ;;  %1234 = vmatprep.mubr.f32.mxu0 %v5626_v3  ;;  %v4026_v18 = vpop.f32.mrf.mxu0 }
  0xd5   :  { %5633 = vst [vmem:[#allocation4_spill] sm:$0xff] %v4026_v18  ;;  %v4028_v19 = vpop.f32.mrf.mxu1 }
  0xd6   :  { %5634 = vst [vmem:[#allocation5_spill] sm:$0xff] %v4028_v19  ;;  %v241_v20 = vpop.f32.mrf.mxu0 }
  0xd7   :  { %v459_v21 = vpop.f32.mrf.mxu1  ;;  %2963 = vmatmul.mubr.msk.f32.gmra.mxu0 %vm77_vm1, %v3632_v41 }
  0xd8   :  { %v4032_v22 = vadd.f32 %v459_v21, %v241_v20  ;;  %1240 = vmatprep.mubr.f32.mxu0 %v5626_v3  ;;  %v4035_v23 = vpop.f32.mrf.mxu0  ;;  %v3009_v21 = vld [vmem:[%s5618_s3 + $0x1c8] sm:$0xff] }
  0xd9   :  { %v4037_v24 = vpop.f32.mrf.mxu1 }
  0xda   :  { %v247_v25 = vpop.f32.mrf.mxu0 }
  0xdb   :  { %v465_v26 = vpop.f32.mrf.mxu1  ;;  %2964 = vmatmul.mubr.msk.f32.gmra.mxu0 %vm77_vm1, %v3643_v42  ;;  %v3013_v42 = vld [vmem:[%s5618_s3 + $0x1e8] sm:$0xff] }
  0xdc   :  { %v4041_v27 = vadd.f32 %v465_v26, %v247_v25  ;;  %1246 = vmatprep.mubr.f32.mxu0 %v5626_v3  ;;  %v4044_v28 = vpop.f32.mrf.mxu0  ;;  %1596 = vmatprep.subr.mxu1 %v3013_v42 }
  0xdd   :  { %v4046_v29 = vpop.f32.mrf.mxu1  ;;  %1597 = vmatpush1.msra.mxu1 %v3012_v60 }
  0xde   :  { %v253_v30 = vpop.f32.mrf.mxu0  ;;  %1598 = vmatprep.subr.mxu1 %v3011_v1 }
  0xdf   :  { %v471_v31 = vpop.f32.mrf.mxu1  ;;  %2965 = vmatmul.mubr.msk.f32.gmra.mxu0 %vm77_vm1, %v3654_v43  ;;  %1599 = vmatpush1.msra.mxu1 %v3010_v10  ;;  %v3005_v10 = vld [vmem:[%s5618_s3 + $0x1a8] sm:$0xff] }
  0xe0   :  { %v4050_v32 = vadd.f32 %v471_v31, %v253_v30  ;;  %1252 = vmatprep.mubr.f32.mxu0 %v5626_v3  ;;  %v4053_v33 = vpop.f32.mrf.mxu0  ;;  %1600 = vmatprep.subr.mxu1 %v3009_v21  ;;  %v3008_v30 = vld [vmem:[%s5618_s3 + $0x1c0] sm:$0xff] }
  0xe1   :  { %v4055_v34 = vpop.f32.mrf.mxu1  ;;  %1601 = vmatpush1.msra.mxu1 %v3008_v30  ;;  %v3004_v21 = vld [vmem:[%s5618_s3 + $0x1a0] sm:$0xff] }
  0xe2   :  { %v259_v37 = vpop.f32.mrf.mxu0 }
  0xe3   :  { %v477_v38 = vpop.f32.mrf.mxu1  ;;  %2966 = vmatmul.mubr.msk.f32.gmra.mxu0 %vm77_vm1, %v3665_v44 }
  0xe4   :  { %v4065_v39 = vadd.f32 %v477_v38, %v259_v37  ;;  %1258 = vmatprep.mubr.f32.mxu0 %v5626_v3  ;;  %v4068_v40 = vpop.f32.mrf.mxu0  ;;  %v3007_v38 = vld [vmem:[%s5618_s3 + $0x1b8] sm:$0xff] }
  0xe5   :  { %v4070_v41 = vpop.f32.mrf.mxu1  ;;  %1602 = vmatprep.subr.mxu1 %v3007_v38 }
  0xe6   :  { %v265_v43 = vpop.f32.mrf.mxu0 }
  0xe7   :  { %v483_v59 = vpop.f32.mrf.mxu1  ;;  %2967 = vmatmul.mubr.msk.f32.gmra.mxu0 %vm77_vm1, %v3676_v45 }
  0xe8   :  { %v4077_v44 = vadd.f32 %v483_v59, %v265_v43  ;;  %1264 = vmatprep.mubr.f32.mxu0 %v5626_v3  ;;  %v4083_v61 = vpop.f32.mrf.mxu0  ;;  %v3006_v59 = vld [vmem:[%s5618_s3 + $0x1b0] sm:$0xff] }
  0xe9   :  { %v4085_v62 = vpop.f32.mrf.mxu1  ;;  %1603 = vmatpush1.msra.mxu1 %v3006_v59 }
  0xea   :  { %v271_v63 = vpop.f32.mrf.mxu0  ;;  %1604 = vmatprep.subr.mxu1 %v3005_v10 }
  0xeb   :  { %v489_v0 = vpop.f32.mrf.mxu1  ;;  %2968 = vmatmul.mubr.msk.f32.gmra.mxu0 %vm77_vm1, %v3687_v46  ;;  %1605 = vmatpush1.msra.mxu1 %v3004_v21  ;;  %v3001_v21 = vld [vmem:[%s5618_s3 + $0x188] sm:$0xff] }
  0xec   :  { %v4089_v45 = vadd.f32 %v489_v0, %v271_v63  ;;  %1270 = vmatprep.mubr.f32.mxu0 %v5626_v3  ;;  %v4095_v5 = vpop.f32.mrf.mxu0 }
  0xed   :  { %v4097_v6 = vpop.f32.mrf.mxu1 }
  0xee   :  { %v277_v11 = vpop.f32.mrf.mxu0 }
  0xef   :  { %v495_v15 = vpop.f32.mrf.mxu1  ;;  %2969 = vmatmul.mubr.msk.f32.gmra.mxu0 %vm77_vm1, %v3698_v47 }
  0xf0   :  { %v4104_v46 = vadd.f32 %v495_v15, %v277_v11  ;;  %1276 = vmatprep.mubr.f32.mxu0 %v5626_v3  ;;  %v4107_v16 = vpop.f32.mrf.mxu0 }
  0xf1   :  { %v4109_v20 = vpop.f32.mrf.mxu1 }
  0xf2   :  { %v283_v25 = vpop.f32.mrf.mxu0 }
  0xf3   :  { %v501_v26 = vpop.f32.mrf.mxu1  ;;  %2970 = vmatmul.mubr.msk.f32.gmra.mxu0 %vm77_vm1, %v3709_v48 }
  0xf4   :  { %v4116_v47 = vadd.f32 %v501_v26, %v283_v25  ;;  %1282 = vmatprep.mubr.f32.mxu0 %v5626_v3  ;;  %v4122_v31 = vpop.f32.mrf.mxu0 }
  0xf5   :  { %v4124_v35 = vpop.f32.mrf.mxu1 }
  0xf6   :  { %v289_v36 = vpop.f32.mrf.mxu0 }
  0xf7   :  { %v507_v37 = vpop.f32.mrf.mxu1  ;;  %2971 = vmatmul.mubr.msk.f32.gmra.mxu0 %vm77_vm1, %v3720_v49 }
  0xf8   :  { %v4128_v48 = vadd.f32 %v507_v37, %v289_v36  ;;  %1288 = vmatprep.mubr.f32.mxu0 %v5626_v3  ;;  %v4134_v42 = vpop.f32.mrf.mxu0  ;;  %v3003_v37 = vld [vmem:[%s5618_s3 + $0x198] sm:$0xff] }
  0xf9   :  { %v4136_v43 = vpop.f32.mrf.mxu1  ;;  %1606 = vmatprep.subr.mxu1 %v3003_v37 }
  0xfa   :  { %v295_v60 = vpop.f32.mrf.mxu0 }
  0xfb   :  { %v513_v63 = vpop.f32.mrf.mxu1  ;;  %2972 = vmatmul.mubr.msk.f32.gmra.mxu0 %vm77_vm1, %v3731_v50 }
  0xfc   :  { %v4143_v49 = vadd.f32 %v513_v63, %v295_v60  ;;  %1294 = vmatprep.mubr.f32.mxu0 %v5626_v3  ;;  %v4146_v0 = vpop.f32.mrf.mxu0  ;;  %v3002_v60 = vld [vmem:[%s5618_s3 + $0x190] sm:$0xff] }
  0xfd   :  { %v4148_v1 = vpop.f32.mrf.mxu1  ;;  %1607 = vmatpush1.msra.mxu1 %v3002_v60 }
  0xfe   :  { %v301_v11 = vpop.f32.mrf.mxu0  ;;  %1608 = vmatprep.subr.mxu1 %v3001_v21 }
  0xff   :  { %v519_v15 = vpop.f32.mrf.mxu1  ;;  %2973 = vmatmul.mubr.msk.f32.gmra.mxu0 %vm77_vm1, %v3742_v51 }
 0x100   :  { %v4155_v50 = vadd.f32 %v519_v15, %v301_v11  ;;  %1300 = vmatprep.mubr.f32.mxu0 %v5626_v3  ;;  %v4161_v25 = vpop.f32.mrf.mxu0 }
 0x101   :  { %v4163_v26 = vpop.f32.mrf.mxu1 }
 0x102   :  { %v307_v30 = vpop.f32.mrf.mxu0 }
 0x103   :  { %v525_v36 = vpop.f32.mrf.mxu1  ;;  %2974 = vmatmul.mubr.msk.f32.gmra.mxu0 %vm77_vm1, %v3753_v52 }
 0x104   :  { %v4167_v51 = vadd.f32 %v525_v36, %v307_v30  ;;  %1306 = vmatprep.mubr.f32.mxu0 %v5626_v3  ;;  %v4173_v38 = vpop.f32.mrf.mxu0 }
 0x105   :  { %v4175_v59 = vpop.f32.mrf.mxu1 }
 0x106   :  { %v313_v63 = vpop.f32.mrf.mxu0 }
 0x107   :  { %v531_v10 = vpop.f32.mrf.mxu1  ;;  %2975 = vmatmul.mubr.msk.f32.gmra.mxu0 %vm77_vm1, %v3764_v53 }
 0x108   :  { %v4182_v52 = vadd.f32 %v531_v10, %v313_v63  ;;  %1312 = vmatprep.mubr.f32.mxu0 %v5626_v3  ;;  %v4185_v11 = vpop.f32.mrf.mxu0  ;;  %v3000_v63 = vld [vmem:[%s5618_s3 + $0x180] sm:$0xff] }
 0x109   :  { %v4187_v15 = vpop.f32.mrf.mxu1  ;;  %1609 = vmatpush1.msra.mxu1 %v3000_v63  ;;  %v2998_v63 = vld [vmem:[%s5618_s3 + $0x170] sm:$0xff] }
 0x10a   :  { %v319_v30 = vpop.f32.mrf.mxu0 }
 0x10b   :  { %v537_v36 = vpop.f32.mrf.mxu1  ;;  %2976 = vmatmul.mubr.msk.f32.gmra.mxu0 %vm77_vm1, %v3775_v54 }
 0x10c   :  { %v4194_v53 = vadd.f32 %v537_v36, %v319_v30  ;;  %1318 = vmatprep.mubr.f32.mxu0 %v5626_v3  ;;  %v4197_v37 = vpop.f32.mrf.mxu0 }
 0x10d   :  { %5635 = vst [vmem:[#allocation6_spill] sm:$0xff] %v4197_v37  ;;  %v4199_v60 = vpop.f32.mrf.mxu1  ;;  %v2999_v37 = vld [vmem:[%s5618_s3 + $0x178] sm:$0xff] }
 0x10e   :  { %5636 = vst [vmem:[#allocation7_spill] sm:$0xff] %v4199_v60  ;;  %v325_v10 = vpop.f32.mrf.mxu0  ;;  %1610 = vmatprep.subr.mxu1 %v2999_v37  ;;  %v3077_v37 = vld [vmem:[%s5618_s3 + $0x3e8] sm:$0xff] }
 0x10f   :  { %v543_v19 = vpop.f32.mrf.mxu1  ;;  %2977 = vmatmul.mubr.msk.f32.gmra.mxu0 %vm77_vm1, %v3786_v55  ;;  %v3079_v55 = vld [vmem:[%s5618_s3 + $0x3f8] sm:$0xff]  ;;  %1611 = vmatpush1.msra.mxu1 %v2998_v63 }
 0x110   :  { %v4206_v54 = vadd.f32 %v543_v19, %v325_v10  ;;  %1324 = vmatprep.mubr.f32.mxu0 %v5626_v3  ;;  %v4209_v21 = vpop.f32.mrf.mxu0  ;;  %2015 = vmatprep.subr.mxu0 %v3079_v55 }
 0x111   :  { %5637 = vst [vmem:[#allocation8_spill] sm:$0xff] %v4209_v21  ;;  %v4211_v30 = vpop.f32.mrf.mxu1  ;;  %v2994_v21 = vld [vmem:[%s5618_s3 + $0x150] sm:$0xff] }
 0x112   :  { %5638 = vst [vmem:[#allocation9_spill] sm:$0xff] %v4211_v30  ;;  %v331_v36 = vpop.f32.mrf.mxu0 }
 0x113   :  { %v549_v60 = vpop.f32.mrf.mxu1  ;;  %2978 = vmatmul.mubr.msk.f32.gmra.mxu0 %vm77_vm1, %v3797_v56  ;;  %v3078_v56 = vld [vmem:[%s5618_s3 + $0x3f0] sm:$0xff] }
 0x114   :  { %v4221_v19 = vadd.f32 %v549_v60, %v331_v36  ;;  %1330 = vmatprep.mubr.f32.mxu0 %v5626_v3  ;;  %v4230_v10 = vpop.f32.mrf.mxu0  ;;  %v2997_v60 = vld [vmem:[%s5618_s3 + $0x168] sm:$0xff]  ;;  %2016 = vmatpush1.msra.mxu0 %v3078_v56  ;;  %v2996_v36 = vld [vmem:[%s5618_s3 + $0x160] sm:$0xff]  ;;  %v3075_v56 = vld [vmem:[%s5618_s3 + $0x3d8] sm:$0xff] }
 0x115   :  { %5639 = vst [vmem:[#allocation10_spill] sm:$0xff] %v4230_v10  ;;  %v4232_v30 = vpop.f32.mrf.mxu1  ;;  %1612 = vmatprep.subr.mxu1 %v2997_v60  ;;  %v3076_v3 = vld [vmem:[%s5618_s3 + $0x3e0] sm:$0xff]  ;;  %2017 = vmatprep.subr.mxu0 %v3077_v37  ;;  %v5641_v10 = vmov 0.0   ;;  %v3074_v37 = vld [vmem:[%s5618_s3 + $0x3d0] sm:$0xff] }
 0x116   :  { %5640 = vst [vmem:[#allocation11_spill] sm:$0xff] %v4232_v30  ;;  %v337_v63 = vpop.f32.mrf.mxu0  ;;  %v2995_v30 = vld [vmem:[%s5618_s3 + $0x158] sm:$0xff]  ;;  %1613 = vmatpush1.msra.mxu1 %v2996_v36  ;;  %2018 = vmatpush1.msra.mxu0 %v3076_v3  ;;  %v3073_v36 = vld [vmem:[%s5618_s3 + $0x3c8] sm:$0xff] }
 0x117   :  { %v555_v55 = vpop.f32.mrf.mxu1  ;;  %2979 = vmatmul.mubr.msk.f32.gmra.mxu0 %vm77_vm1, %v3808_v57  ;;  %1614 = vmatprep.subr.mxu1 %v2995_v30 }
 0x118   :  { %v4254_v60 = vadd.f32 %v555_v55, %v337_v63  ;;  %1336 = vmatprep.mubr.f32.mxu0 %v5641_v10  ;;  %v4260_v18 = vpop.f32.mrf.mxu0  ;;  %v2993_v63 = vld [vmem:[%s5618_s3 + $0x148] sm:$0xff]  ;;  %2019 = vmatprep.subr.mxu0 %v3075_v56  ;;  %v2992_v55 = vld [vmem:[%s5618_s3 + $0x140] sm:$0xff] }
 0x119   :  { %5642 = vst [vmem:[#allocation12_spill] sm:$0xff] %v4260_v18  ;;  %v4262_v57 = vpop.f32.mrf.mxu1  ;;  %1615 = vmatpush1.msra.mxu1 %v2994_v21  ;;  %v2991_v21 = vld [vmem:[%s5618_s3 + $0x138] sm:$0xff]  ;;  %2020 = vmatpush1.msra.mxu0 %v3074_v37  ;;  %v3070_v37 = vld [vmem:[%s5618_s3 + $0x3b0] sm:$0xff] }
 0x11a   :  { %5643 = vst [vmem:[#allocation13_spill] sm:$0xff] %v4262_v57  ;;  %v343_v3 = vpop.f32.mrf.mxu0  ;;  %1616 = vmatprep.subr.mxu1 %v2993_v63  ;;  %v3072_v57 = vld [vmem:[%s5618_s3 + $0x3c0] sm:$0xff]  ;;  %v3071_v18 = vld [vmem:[%s5618_s3 + $0x3b8] sm:$0xff]  ;;  %2021 = vmatprep.subr.mxu0 %v3073_v36  ;;  %v2990_v63 = vld [vmem:[%s5618_s3 + $0x130] sm:$0xff] }
 0x11b   :  { %v561_v30 = vpop.f32.mrf.mxu1  ;;  %2980 = vmatmul.mubr.msk.f32.gmra.mxu0 %vm77_vm1, %v3819_v58  ;;  %1617 = vmatpush1.msra.mxu1 %v2992_v55  ;;  %v3069_v36 = vld [vmem:[%s5618_s3 + $0x3a8] sm:$0xff] }
 0x11c   :  { %v4284_v56 = vadd.f32 %v561_v30, %v343_v3  ;;  %1342 = vmatprep.mubr.f32.mxu0 %v5641_v10  ;;  %v4290_v14 = vpop.f32.mrf.mxu0  ;;  %2022 = vmatpush1.msra.mxu0 %v3072_v57  ;;  %v2989_v3 = vld [vmem:[%s5618_s3 + $0x128] sm:$0xff]  ;;  %v2988_v57 = vld [vmem:[%s5618_s3 + $0x120] sm:$0xff] }
 0x11d   :  { %5644 = vst [vmem:[#allocation14_spill] sm:$0xff] %v4290_v14  ;;  %v4292_v58 = vpop.f32.mrf.mxu1  ;;  %1618 = vmatprep.subr.mxu1 %v2991_v21  ;;  %2023 = vmatprep.subr.mxu0 %v3071_v18  ;;  %v2987_v21 = vld [vmem:[%s5618_s3 + $0x118] sm:$0xff]  ;;  %v3068_v18 = vld [vmem:[%s5618_s3 + $0x3a0] sm:$0xff] }
 0x11e   :  { %5645 = vst [vmem:[#allocation15_spill] sm:$0xff] %v4292_v58  ;;  %v349_v30 = vpop.f32.mrf.mxu0  ;;  %1619 = vmatpush1.msra.mxu1 %v2990_v63  ;;  %2024 = vmatpush1.msra.mxu0 %v3070_v37  ;;  %v2986_v63 = vld [vmem:[%s5618_s3 + $0x110] sm:$0xff] }
 0x11f   :  { %v567_v14 = vpop.f32.mrf.mxu1  ;;  %2981 = vmatmul.mubr.msk.f32.gmra.mxu0 %vm77_vm1, %v3984_v2  ;;  %1620 = vmatprep.subr.mxu1 %v2989_v3  ;;  %v3066_v37 = vld [vmem:[%s5618_s3 + $0x390] sm:$0xff]  ;;  %v2985_v3 = vld [vmem:[%s5618_s3 + $0x108] sm:$0xff] }
 0x120   :  { %v4311_v55 = vadd.f32 %v567_v14, %v349_v30  ;;  %1348 = vmatprep.mubr.f32.mxu0 %v5641_v10  ;;  %v4317_v58 = vpop.f32.mrf.mxu0  ;;  %2025 = vmatprep.subr.mxu0 %v3069_v36  ;;  %v3067_v14 = vld [vmem:[%s5618_s3 + $0x398] sm:$0xff] }
 0x121   :  { %5646 = vst [vmem:[#allocation16_spill] sm:$0xff] %v4317_v58  ;;  %v4319_v2 = vpop.f32.mrf.mxu1  ;;  %1621 = vmatpush1.msra.mxu1 %v2988_v57  ;;  %v59_v57 = vld [vmem:[%s5617_s0 + $0xd8] sm:$0xff]  ;;  %2026 = vmatpush1.msra.mxu0 %v3068_v18 }
 0x122   :  { %5647 = vst [vmem:[#allocation17_spill] sm:$0xff] %v4319_v2  ;;  %v355_v30 = vpop.f32.mrf.mxu0  ;;  %1622 = vmatprep.subr.mxu1 %v2987_v21  ;;  %2027 = vmatprep.subr.mxu0 %v3067_v14  ;;  %v3063_v18 = vld [vmem:[%s5618_s3 + $0x378] sm:$0xff]  ;;  %v3062_v14 = vld [vmem:[%s5618_s3 + $0x370] sm:$0xff] }
 0x123   :  { %v573_v58 = vpop.f32.mrf.mxu1  ;;  %2982 = vmatmul.mubr.msk.f32.gmra.mxu0 %vm77_vm1, %v3995_v4  ;;  %v3065_v4 = vld [vmem:[%s5618_s3 + $0x388] sm:$0xff]  ;;  %1623 = vmatpush1.msra.mxu1 %v2986_v63 }
 0x124   :  { %v4338_v36 = vadd.f32 %v573_v58, %v355_v30  ;;  %1354 = vmatprep.mubr.f32.mxu0 %v5641_v10  ;;  %v4347_v21 = vpop.f32.mrf.mxu0  ;;  %v2984_v58 = vld [vmem:[%s5618_s3 + $0x100] sm:$0xff]  ;;  %2028 = vmatpush1.msra.mxu0 %v3066_v37  ;;  %v3061_v37 = vld [vmem:[%s5618_s3 + $0x368] sm:$0xff] }
 0x125   :  { %5648 = vst [vmem:[#allocation18_spill] sm:$0xff] %v4347_v21  ;;  %v4349_v2 = vpop.f32.mrf.mxu1  ;;  %v3064_v30 = vld [vmem:[%s5618_s3 + $0x380] sm:$0xff]  ;;  %1624 = vmatprep.subr.mxu1 %v2985_v3  ;;  %2029 = vmatprep.subr.mxu0 %v3065_v4 }
 0x126   :  { %5649 = vst [vmem:[#allocation19_spill] sm:$0xff] %v4349_v2  ;;  %v361_v13 = vpop.f32.mrf.mxu0  ;;  %1625 = vmatpush1.msra.mxu1 %v2984_v58  ;;  %2030 = vmatpush1.msra.mxu0 %v3064_v30  ;;  %v3058_v58 = vld [vmem:[%s5618_s3 + $0x350] sm:$0xff] }
 0x127   :  { %v579_v21 = vpop.f32.mrf.mxu1  ;;  %2983 = vmatmul.mubr.msk.f32.gmra.mxu0 %vm77_vm1, %v59_v57  ;;  %2031 = vmatprep.subr.mxu0 %v3063_v18  ;;  %v3060_v57 = vld [vmem:[%s5618_s3 + $0x360] sm:$0xff]  ;;  %v3057_v18 = vld [vmem:[%s5618_s3 + $0x348] sm:$0xff] }
 0x128   :  { %v4364_v63 = vadd.f32 %v579_v21, %v361_v13  ;;  %v4369_v3 = vpop.f32.mrf.mxu0  ;;  %2079 = vmatprep.mubr.f32.mxu0 %v5641_v10  ;;  %2032 = vmatpush1.msra.mxu0 %v3062_v14  ;;  %v3059_v13 = vld [vmem:[%s5618_s3 + $0x358] sm:$0xff] }
 0x129   :  { %5651 = vst [vmem:[#allocation21_spill] sm:$0xff] %v4369_v3  ;;  %v4371_v2 = vpop.f32.mrf.mxu1  ;;  %2033 = vmatprep.subr.mxu0 %v3061_v37  ;;  %v3056_v37 = vld [vmem:[%s5618_s3 + $0x340] sm:$0xff] }
 0x12a   :  { %5650 = vst [vmem:[#allocation20_spill] sm:$0xff] %v4364_v63  ;;  %5652 = vst [vmem:[#allocation22_spill] sm:$0xff] %v4371_v2  ;;  %v668_v4 = vpop.f32.mrf.mxu0  ;;  %2034 = vmatpush1.msra.mxu0 %v3060_v57  ;;  %v3054_v63 = vld [vmem:[%s5618_s3 + $0x330] sm:$0xff] }
 0x12b   :  { %v943_v21 = vpop.f32.mrf.mxu1  ;;  %v811_v30 = vadd.f32 %v668_v4, %v4005_v7  ;;  %2035 = vmatprep.subr.mxu0 %v3059_v13  ;;  %v3055_v7 = vld [vmem:[%s5618_s3 + $0x338] sm:$0xff] }
 0x12c   :  { %v4387_v2 = vpop.f32.mrf.mxu0  ;;  %2036 = vmatpush1.msra.mxu0 %v3058_v58  ;;  %v3052_v58 = vld [vmem:[%s5618_s3 + $0x320] sm:$0xff] }
 0x12d   :  { %v4389_v14 = vpop.f32.mrf.mxu1  ;;  %v4394_v3 = vadd.f32 %v943_v21, %v811_v30  ;;  %2037 = vmatprep.subr.mxu0 %v3057_v18  ;;  %v3053_v21 = vld [vmem:[%s5618_s3 + $0x328] sm:$0xff]  ;;  %v3051_v18 = vld [vmem:[%s5618_s3 + $0x318] sm:$0xff] }
 0x12e   :  { %2038 = vmatpush1.msra.mxu0 %v3056_v37  ;;  %v3050_v37 = vld [vmem:[%s5618_s3 + $0x310] sm:$0xff] }
 0x12f   :  { %5653 = vst [vmem:[#allocation23_spill] sm:$0xff] %v4394_v3  ;;  %v674_v57 = vpop.f32.mrf.mxu0  ;;  %v949_v4 = vpop.f32.mrf.mxu1  ;;  %2039 = vmatprep.subr.mxu0 %v3055_v7 }
 0x130   :  { %v813_v13 = vadd.f32 %v674_v57, %v4014_v12  ;;  %2040 = vmatpush1.msra.mxu0 %v3054_v63  ;;  %v3049_v63 = vld [vmem:[%s5618_s3 + $0x308] sm:$0xff] }
 0x131   :  { %v4406_v30 = vpop.f32.mrf.mxu0  ;;  %2041 = vmatprep.subr.mxu0 %v3053_v21  ;;  %v4422_v7 = vpop.f32.mrf.mxu1 }
 0x132   :  { %v4411_v3 = vadd.f32 %v949_v4, %v813_v13  ;;  %2042 = vmatpush1.msra.mxu0 %v3052_v58  ;;  %v3048_v13 = vld [vmem:[%s5618_s3 + $0x300] sm:$0xff] }
 0x133   :  { %v680_v12 = vpop.f32.mrf.mxu0  ;;  %2043 = vmatprep.subr.mxu0 %v3051_v18 }
 0x134   :  { %5654 = vst [vmem:[#allocation24_spill] sm:$0xff] %v4411_v3  ;;  %v4420_v57 = vadd.f32 %v680_v12, %v4023_v17  ;;  %2044 = vmatpush1.msra.mxu0 %v3050_v37  ;;  %v462_v17 = vadd.f32 %v4037_v24, %v4035_v23  ;;  %v4434_v12 = vpop.f32.mrf.mxu1  ;;  %v468_v37 = vadd.f32 %v4046_v29, %v4044_v28 }
 0x135   :  { %v4427_v4 = vpop.f32.mrf.mxu0  ;;  %2045 = vmatprep.subr.mxu0 %v3049_v63 }
 0x136   :  { %5655 = vst [vmem:[#allocation25_spill] sm:$0xff] %v4420_v57  ;;  %5656 = vst [vmem:[#allocation26_spill] sm:$0xff] %v4427_v4  ;;  %2046 = vmatpush1.msra.mxu0 %v3048_v13  ;;  %v4444_v4 = vpop.f32.mrf.mxu1  ;;  %v1560_v13 = vld [vmem:[%s5618_s3 + $0xf8] sm:$0xff] }
 0x137   :  { %v686_v21 = vpop.f32.mrf.mxu0  ;;  %3240 = vmatprep.subr.mxu0 %v5641_v10  ;;  %1707 = vmatprep.subr.mxu1 %v1560_v13 }
 0x138   :  { %v4437_v58 = vadd.f32 %v686_v21, %v4032_v22  ;;  %v4456_v21 = vpop.f32.mrf.mxu1 }
 0x139   :  { %v688_v57 = vpop.f32.mrf.mxu0 }
 0x13a   :  { %v4440_v18 = vadd.f32 %v688_v57, %v462_v17  ;;  %v474_v57 = vadd.f32 %v4055_v34, %v4053_v33  ;;  %v480_v17 = vadd.f32 %v4070_v41, %v4068_v40 }
 0x13b   :  { %v692_v3 = vpop.f32.mrf.mxu0 }
 0x13c   :  { %v4447_v63 = vadd.f32 %v692_v3, %v4041_v27 }
 0x13d   :  { %v694_v23 = vpop.f32.mrf.mxu0 }
 0x13e   :  { %v4449_v24 = vadd.f32 %v694_v23, %v468_v37  ;;  %v4465_v37 = vpop.f32.mrf.mxu1 }
 0x13f   :  { %v698_v22 = vpop.f32.mrf.mxu0 }
 0x140   :  { %v4459_v28 = vadd.f32 %v698_v22, %v4050_v32  ;;  %v486_v32 = vadd.f32 %v4085_v62, %v4083_v61  ;;  %v4474_v22 = vpop.f32.mrf.mxu1 }
 0x141   :  { %v700_v29 = vpop.f32.mrf.mxu0 }
 0x142   :  { %v4461_v27 = vadd.f32 %v700_v29, %v474_v57  ;;  %v4483_v41 = vpop.f32.mrf.mxu1 }
 0x143   :  { %v704_v3 = vpop.f32.mrf.mxu0 }
 0x144   :  { %v4468_v23 = vadd.f32 %v704_v3, %v4065_v39  ;;  %v492_v39 = vadd.f32 %v4097_v6, %v4095_v5  ;;  %v4492_v62 = vpop.f32.mrf.mxu1 }
 0x145   :  { %v706_v10 = vpop.f32.mrf.mxu0 }
 0x146   :  { %v4470_v33 = vadd.f32 %v706_v10, %v480_v17  ;;  %v4501_v6 = vpop.f32.mrf.mxu1 }
 0x147   :  { %v710_v34 = vpop.f32.mrf.mxu0 }
 0x148   :  { %v4477_v13 = vadd.f32 %v710_v34, %v4077_v44  ;;  %v498_v44 = vadd.f32 %v4109_v20, %v4107_v16  ;;  %v4510_v20 = vpop.f32.mrf.mxu1 }
 0x149   :  { %v712_v57 = vpop.f32.mrf.mxu0 }
 0x14a   :  { %v4479_v29 = vadd.f32 %v712_v57, %v486_v32 }
 0x14b   :  { %v716_v40 = vpop.f32.mrf.mxu0 }
 0x14c   :  { %v4486_v10 = vadd.f32 %v716_v40, %v4089_v45  ;;  %v504_v45 = vadd.f32 %v4124_v35, %v4122_v31  ;;  %v4519_v35 = vpop.f32.mrf.mxu1 }
 0x14d   :  { %v718_v3 = vpop.f32.mrf.mxu0 }
 0x14e   :  { %v4488_v17 = vadd.f32 %v718_v3, %v492_v39 }
 0x14f   :  { %v722_v61 = vpop.f32.mrf.mxu0 }
 0x150   :  { %v4495_v34 = vadd.f32 %v722_v61, %v4104_v46  ;;  %v510_v46 = vadd.f32 %v4136_v43, %v4134_v42  ;;  %v4528_v43 = vpop.f32.mrf.mxu1 }
 0x151   :  { %v724_v32 = vpop.f32.mrf.mxu0 }
 0x152   :  { %v4497_v57 = vadd.f32 %v724_v32, %v498_v44 }
 0x153   :  { %v728_v5 = vpop.f32.mrf.mxu0 }
 0x154   :  { %v4504_v40 = vadd.f32 %v728_v5, %v4116_v47  ;;  %v516_v47 = vadd.f32 %v4148_v1, %v4146_v0  ;;  %v4537_v1 = vpop.f32.mrf.mxu1 }
 0x155   :  { %v730_v39 = vpop.f32.mrf.mxu0 }
 0x156   :  { %v4506_v3 = vadd.f32 %v730_v39, %v504_v45 }
 0x157   :  { %v734_v16 = vpop.f32.mrf.mxu0 }
 0x158   :  { %v4513_v61 = vadd.f32 %v734_v16, %v4128_v48  ;;  %v522_v48 = vadd.f32 %v4163_v26, %v4161_v25  ;;  %v4546_v26 = vpop.f32.mrf.mxu1 }
 0x159   :  { %v736_v44 = vpop.f32.mrf.mxu0 }
 0x15a   :  { %v4515_v32 = vadd.f32 %v736_v44, %v510_v46 }
 0x15b   :  { %v740_v31 = vpop.f32.mrf.mxu0 }
 0x15c   :  { %v4522_v5 = vadd.f32 %v740_v31, %v4143_v49  ;;  %v528_v49 = vadd.f32 %v4175_v59, %v4173_v38  ;;  %v4553_v59 = vpop.f32.mrf.mxu1 }
 0x15d   :  { %v742_v45 = vpop.f32.mrf.mxu0 }
 0x15e   :  { %v4524_v39 = vadd.f32 %v742_v45, %v516_v47 }
 0x15f   :  { %v746_v42 = vpop.f32.mrf.mxu0 }
 0x160   :  { %5657 = vst [vmem:[#allocation27_spill] sm:$0xff] %v4524_v39  ;;  %v4531_v16 = vadd.f32 %v746_v42, %v4155_v50  ;;  %v534_v50 = vadd.f32 %v4187_v15, %v4185_v11 }
 0x161   :  { %v748_v46 = vpop.f32.mrf.mxu0 }
 0x162   :  { %5658 = vst [vmem:[#allocation28_spill] sm:$0xff] %v4531_v16  ;;  %v4533_v44 = vadd.f32 %v748_v46, %v522_v48 }
 0x163   :  { %v752_v0 = vpop.f32.mrf.mxu0 }
 0x164   :  { %5659 = vst [vmem:[#allocation29_spill] sm:$0xff] %v4533_v44  ;;  %v4540_v31 = vadd.f32 %v752_v0, %v4167_v51 }
 0x165   :  { %v754_v47 = vpop.f32.mrf.mxu0 }
 0x166   :  { %5660 = vst [vmem:[#allocation30_spill] sm:$0xff] %v4540_v31  ;;  %v4542_v45 = vadd.f32 %v754_v47, %v528_v49  ;;  %v4560_v47 = vpop.f32.mrf.mxu1 }
 0x167   :  { %v758_v25 = vpop.f32.mrf.mxu0 }
 0x168   :  { %5661 = vst [vmem:[#allocation31_spill] sm:$0xff] %v4542_v45  ;;  %v4549_v42 = vadd.f32 %v758_v25, %v4182_v52  ;;  %v4567_v25 = vpop.f32.mrf.mxu1  ;;  %v5689_v45 = vld [vmem:[#allocation5_spill] sm:$0xff] }
 0x169   :  { %v760_v48 = vpop.f32.mrf.mxu0 }
 0x16a   :  { %5662 = vst [vmem:[#allocation32_spill] sm:$0xff] %v4549_v42  ;;  %v4551_v46 = vadd.f32 %v760_v48, %v534_v50 }
 0x16b   :  { %v764_v38 = vpop.f32.mrf.mxu0 }
 0x16c   :  { %5663 = vst [vmem:[#allocation33_spill] sm:$0xff] %v4551_v46  ;;  %v4556_v51 = vadd.f32 %v764_v38, %v4194_v53  ;;  %v4574_v38 = vpop.f32.mrf.mxu1 }
 0x16d   :  { %v4558_v0 = vpop.f32.mrf.mxu0 }
 0x16e   :  { %5664 = vst [vmem:[#allocation34_spill] sm:$0xff] %v4556_v51  ;;  %5665 = vst [vmem:[#allocation35_spill] sm:$0xff] %v4558_v0 }
 0x16f   :  { %v770_v49 = vpop.f32.mrf.mxu0 }
 0x170   :  { %v4563_v11 = vadd.f32 %v770_v49, %v4206_v54  ;;  %v4581_v49 = vpop.f32.mrf.mxu1 }
 0x171   :  { %v4565_v15 = vpop.f32.mrf.mxu0 }
 0x172   :  { %5666 = vst [vmem:[#allocation36_spill] sm:$0xff] %v4563_v11  ;;  %5667 = vst [vmem:[#allocation37_spill] sm:$0xff] %v4565_v15 }
 0x173   :  { %v776_v52 = vpop.f32.mrf.mxu0 }
 0x174   :  { %v4570_v50 = vadd.f32 %v776_v52, %v4221_v19  ;;  %v4588_v52 = vpop.f32.mrf.mxu1 }
 0x175   :  { %v4572_v48 = vpop.f32.mrf.mxu0 }
 0x176   :  { %5668 = vst [vmem:[#allocation38_spill] sm:$0xff] %v4570_v50  ;;  %5669 = vst [vmem:[#allocation39_spill] sm:$0xff] %v4572_v48  ;;  %v1411_v48 = vlaneseq }
 0x177   :  { %v782_v53 = vpop.f32.mrf.mxu0 }
 0x178   :  { %v4577_v51 = vadd.f32 %v782_v53, %v4254_v60  ;;  %v4595_v53 = vpop.f32.mrf.mxu1 }
 0x179   :  { %v4579_v0 = vpop.f32.mrf.mxu0 }
 0x17a   :  { %5670 = vst [vmem:[#allocation40_spill] sm:$0xff] %v4577_v51  ;;  %5671 = vst [vmem:[#allocation41_spill] sm:$0xff] %v4579_v0  ;;  %v4600_v0 = vshrl.u32 %v1411_v48, 7  ;;  %v5682_v48 = vld [vmem:[#allocation3_spill] sm:$0xff] }
 0x17b   :  { %v788_v54 = vpop.f32.mrf.mxu0 }
 0x17c   :  { %v4584_v11 = vadd.f32 %v788_v54, %v4284_v56  ;;  %5677 = vst [vmem:[#allocation47_spill] sm:$0xff] %v4600_v0  ;;  %v444_v54 = vadd.f32 %v4010_v9, %v4008_v8  ;;  %v1409_v8 = vld [vmem:[%s5619_s2] sm:$0x3] }
 0x17d   :  { %v4586_v15 = vpop.f32.mrf.mxu0 }
 0x17e   :  { %5672 = vst [vmem:[#allocation42_spill] sm:$0xff] %v4584_v11  ;;  %5673 = vst [vmem:[#allocation43_spill] sm:$0xff] %v4586_v15 }
 0x17f   :  { %v794_v19 = vpop.f32.mrf.mxu0 }
 0x180   :  { %v4591_v50 = vadd.f32 %v794_v19, %v4311_v55  ;;  %v812_v55 = vadd.f32 %v4387_v2, %v444_v54  ;;  %v4607_v19 = vpop.f32.mrf.mxu1 }
 0x181   :  { %v4593_v46 = vpop.f32.mrf.mxu0 }
 0x182   :  { %5674 = vst [vmem:[#allocation44_spill] sm:$0xff] %v4591_v50  ;;  %5675 = vst [vmem:[#allocation45_spill] sm:$0xff] %v4593_v46  ;;  %v5679_v50 = vld [vmem:[#allocation20_spill] sm:$0xff]  ;;  %v1087_v54 = vadd.f32 %v4389_v14, %v812_v55  ;;  %v5690_v55 = vld [vmem:[#allocation26_spill] sm:$0xff] }
 0x183   :  { %v800_v60 = vpop.f32.mrf.mxu0 }
 0x184   :  { %v4598_v51 = vadd.f32 %v800_v60, %v4338_v36  ;;  %v5681_v60 = vld [vmem:[#allocation2_spill] sm:$0xff]  ;;  %v5686_v36 = vsub.s32 0, %v4600_v0 }
 0x185   :  { %v4602_v56 = vpop.f32.mrf.mxu0 }
 0x186   :  { %5676 = vst [vmem:[#allocation46_spill] sm:$0xff] %v4598_v51  ;;  %5678 = vst [vmem:[#allocation48_spill] sm:$0xff] %v4602_v56  ;;  %v450_v51 = vadd.f32 %v5682_v48, %v5681_v60  ;;  %v5687_v60 = vsub.s32 1, %v4600_v0  ;;  %v5688_v56 = vld [vmem:[#allocation4_spill] sm:$0xff] }
 0x187   :  { %v806_v11 = vpop.f32.mrf.mxu0  ;;  %v456_v31 = vadd.f32 %v5689_v45, %v5688_v56 }
 0x188   :  { %v4610_v46 = vadd.f32 %v806_v11, %v5679_v50  ;;  %v814_v9 = vadd.f32 %v4406_v30, %v450_v51  ;;  %v4623_v11 = vpop.f32.mrf.mxu1  ;;  %v5685_v50 = vld [vmem:[#allocation23_spill] sm:$0xff]  ;;  %v4632_v48 = vrot.slane %v1409_v8, %v5687_v60  ;;  %v5692_v60 = vld [vmem:[#allocation25_spill] sm:$0xff] }
 0x189   :  { %v4616_v42 = vpop.f32.mrf.mxu0  ;;  %5684 = vst [vmem:[#allocation3_spill] sm:$0xff] %v4623_v11  ;;  %v816_v44 = vadd.f32 %v5690_v55, %v456_v31  ;;  %v1090_v11 = vadd.f32 %v4434_v12, %v5692_v60  ;;  %v1093_v12 = vadd.f32 %v4465_v37, %v4440_v18 }
 0x18a   :  { %5680 = vst [vmem:[#allocation20_spill] sm:$0xff] %v4610_v46  ;;  %5683 = vst [vmem:[#allocation2_spill] sm:$0xff] %v4616_v42  ;;  %v4628_v46 = vrot.slane %v1409_v8, %v5686_v36  ;;  %v1089_v51 = vadd.f32 %v4422_v7, %v814_v9  ;;  %v4638_v16 = vpop.f32.mrf.mxu1 }
 0x18b   :  { %v1218_v2 = vpop.f32.mrf.mxu0  ;;  %v1091_v7 = vadd.f32 %v4444_v4, %v816_v44 }
 0x18c   :  { %v1361_v15 = vadd.f32 %v1218_v2, %v5685_v50  ;;  %v5691_v50 = vld [vmem:[#allocation24_spill] sm:$0xff]  ;;  %v4646_v56 = vpop.f32.mrf.mxu1 }
 0x18d   :  { %v1220_v42 = vpop.f32.mrf.mxu0 }
 0x18e   :  { %v1362_v30 = vadd.f32 %v1220_v42, %v1087_v54  ;;  %v1421_v2 = vadd.f32 %v4628_v46, %v1361_v15  ;;  %v4656_v4 = vpop.f32.mrf.mxu1 }
 0x18f   :  { %v1224_v14 = vpop.f32.mrf.mxu0 }
 0x190   :  { %v1422_v36 = vadd.f32 %v4632_v48, %v1362_v30  ;;  %v1363_v0 = vadd.f32 %v1224_v14, %v5691_v50  ;;  %v1092_v30 = vadd.f32 %v4456_v21, %v4437_v58  ;;  %v1094_v58 = vadd.f32 %v4474_v22, %v4447_v63  ;;  %v4668_v60 = vpop.f32.mrf.mxu1 }
 0x191   :  { %v1226_v8 = vpop.f32.mrf.mxu0  ;;  %v1096_v63 = vadd.f32 %v4492_v62, %v4459_v28 }
 0x192   :  { %v1469_v39 = vmax.f32 %v1421_v2, %v1422_v36  ;;  %v1364_v45 = vadd.f32 %v1226_v8, %v1089_v51  ;;  %v1423_v31 = vadd.f32 %v4628_v46, %v1363_v0  ;;  %v1095_v8 = vadd.f32 %v4483_v41, %v4449_v24 }
 0x193   :  { %v1230_v42 = vpop.f32.mrf.mxu0 }
 0x194   :  { %v1424_v9 = vadd.f32 %v4632_v48, %v1364_v45  ;;  %v1365_v15 = vadd.f32 %v1230_v42, %v1090_v11  ;;  %v4654_v51 = vmax.f32 %v1469_v39, 0.0 }
 0x195   :  { %v1232_v54 = vpop.f32.mrf.mxu0 }
 0x196   :  { %v1470_v14 = vmax.f32 %v1423_v31, %v1424_v9  ;;  %v1366_v55 = vadd.f32 %v1232_v54, %v1091_v7  ;;  %v1425_v0 = vadd.f32 %v4628_v46, %v1365_v15  ;;  %v1097_v15 = vadd.f32 %v4501_v6, %v4461_v27  ;;  %v1559_v27 = vld [vmem:[%s5618_s3 + $0xf0] sm:$0xff] }
 0x197   :  { %v1236_v2 = vpop.f32.mrf.mxu0 }
 0x198   :  { %v4658_v44 = vmax.f32 %v1470_v14, 0.0  ;;  %v1426_v11 = vadd.f32 %v4632_v48, %v1366_v55  ;;  %v1367_v36 = vadd.f32 %v1236_v2, %v1092_v30  ;;  %v4676_v14 = vpop.f32.mrf.mxu1 }
 0x199   :  { %v1238_v50 = vpop.f32.mrf.mxu0 }
 0x19a   :  { %v1517_v21 = vmax.f32 %v4654_v51, %v4658_v44  ;;  %v1471_v18 = vmax.f32 %v1425_v0, %v1426_v11  ;;  %v1368_v37 = vadd.f32 %v1238_v50, %v1093_v12  ;;  %v1427_v45 = vadd.f32 %v4628_v46, %v1367_v36  ;;  %v1558_v36 = vld [vmem:[%s5618_s3 + $0xe8] sm:$0xff] }
 0x19b   :  { %v1242_v39 = vpop.f32.mrf.mxu0  ;;  %v1098_v0 = vadd.f32 %v4510_v20, %v4468_v23  ;;  %v1099_v50 = vadd.f32 %v4519_v35, %v4470_v33  ;;  %v1556_v33 = vld [vmem:[%s5618_s3 + $0xd8] sm:$0xff]  ;;  %v1100_v35 = vadd.f32 %v4528_v43, %v4477_v13 }
 0x19c   :  { %v1428_v42 = vadd.f32 %v4632_v48, %v1368_v37  ;;  %v1369_v7 = vadd.f32 %v1242_v39, %v1094_v58  ;;  %v1495_v54 = vmax.f32 %v1471_v18, 0.0  ;;  %v4692_v58 = vpop.f32.mrf.mxu1  ;;  %v1557_v37 = vld [vmem:[%s5618_s3 + $0xe0] sm:$0xff] }
 0x19d   :  { %v1244_v31 = vpop.f32.mrf.mxu0 }
 0x19e   :  { %v1472_v22 = vmax.f32 %v1427_v45, %v1428_v42  ;;  %v1370_v9 = vadd.f32 %v1244_v31, %v1095_v8  ;;  %v1429_v41 = vadd.f32 %v4628_v46, %v1369_v7  ;;  %v5693_v8 = vmov 0.0   ;;  %v1555_v7 = vld [vmem:[%s5618_s3 + $0xd0] sm:$0xff] }
 0x19f   :  { %v1248_v30 = vpop.f32.mrf.mxu0  ;;  %v1101_v31 = vadd.f32 %v4537_v1, %v4479_v29  ;;  %v1553_v29 = vld [vmem:[%s5618_s3 + $0xc0] sm:$0xff] }
 0x1a0   :  { %v1496_v24 = vmax.f32 %v1472_v22, 0.0  ;;  %v1430_v55 = vadd.f32 %v4632_v48, %v1370_v9  ;;  %v1371_v12 = vadd.f32 %v1248_v30, %v1096_v63  ;;  %v1554_v9 = vld [vmem:[%s5618_s3 + $0xc8] sm:$0xff] }
 0x1a1   :  { %v1250_v2 = vpop.f32.mrf.mxu0 }
 0x1a2   :  { %v4682_v28 = vmax.f32 %v1495_v54, %v1496_v24  ;;  %v1473_v62 = vmax.f32 %v1429_v41, %v1430_v55  ;;  %v1372_v11 = vadd.f32 %v1250_v2, %v1097_v15  ;;  %v1431_v23 = vadd.f32 %v4628_v46, %v1371_v12  ;;  %v4714_v15 = vpop.f32.mrf.mxu1  ;;  %v1552_v24 = vld [vmem:[%s5618_s3 + $0xb8] sm:$0xff] }
 0x1a3   :  { %v1254_v6 = vpop.f32.mrf.mxu0  ;;  %v1102_v41 = vadd.f32 %v4546_v26, %v4486_v10 }
 0x1a4   :  { %v1432_v20 = vadd.f32 %v4632_v48, %v1372_v11  ;;  %v1373_v18 = vadd.f32 %v1254_v6, %v1098_v0  ;;  %1659 = vmatmul.mubr.f32.vlgmr.msra.gmra.mxu1 %v4682_v28  ;;  %v1497_v63 = vmax.f32 %v1473_v62, 0.0  ;;  %v1551_v0 = vld [vmem:[%s5618_s3 + $0xb0] sm:$0xff]  ;;  %v1103_v62 = vadd.f32 %v4553_v59, %v4488_v17  ;;  %v4736_v6 = vpop.f32.mrf.mxu1  ;;  %v1549_v17 = vld [vmem:[%s5618_s3 + $0xa0] sm:$0xff] }
 0x1a5   :  { %v1256_v39 = vpop.f32.mrf.mxu0  ;;  %1664 = vmatprep.mubr.f32.mxu1 %v5693_v8  ;;  %1708 = vmatpush1.msra.mxu1 %v1559_v27  ;;  %v1550_v27 = vld [vmem:[%s5618_s3 + $0xa8] sm:$0xff] }
 0x1a6   :  { %v1474_v45 = vmax.f32 %v1431_v23, %v1432_v20  ;;  %v1374_v42 = vadd.f32 %v1256_v39, %v1099_v50  ;;  %1709 = vmatprep.subr.mxu1 %v1558_v36  ;;  %v1433_v43 = vadd.f32 %v4628_v46, %v1373_v18  ;;  %v1548_v50 = vld [vmem:[%s5618_s3 + $0x98] sm:$0xff]  ;;  %v1104_v23 = vadd.f32 %v4560_v47, %v4495_v34 }
 0x1a7   :  { %v1260_v22 = vpop.f32.mrf.mxu0  ;;  %1710 = vmatpush1.msra.mxu1 %v1557_v37  ;;  %v1547_v37 = vld [vmem:[%s5618_s3 + $0x90] sm:$0xff]  ;;  %v1105_v39 = vadd.f32 %v4567_v25, %v4497_v57  ;;  %v1545_v57 = vld [vmem:[%s5618_s3 + $0x80] sm:$0xff] }
 0x1a8   :  { %v1498_v13 = vmax.f32 %v1474_v45, 0.0  ;;  %v1434_v54 = vadd.f32 %v4632_v48, %v1374_v42  ;;  %v1375_v30 = vadd.f32 %v1260_v22, %v1100_v35  ;;  %1711 = vmatprep.subr.mxu1 %v1556_v33  ;;  %v1546_v45 = vld [vmem:[%s5618_s3 + $0x88] sm:$0xff]  ;;  %v4758_v42 = vpop.f32.mrf.mxu1 }
 0x1a9   :  { %v1262_v1 = vpop.f32.mrf.mxu0  ;;  %1712 = vmatpush1.msra.mxu1 %v1555_v7 }
 0x1aa   :  { %v1475_v55 = vmax.f32 %v1433_v43, %v1434_v54  ;;  %v1376_v12 = vadd.f32 %v1262_v1, %v1101_v31  ;;  %v4726_v2 = vmax.f32 %v1497_v63, %v1498_v13  ;;  %1713 = vmatprep.subr.mxu1 %v1554_v9  ;;  %v1435_v10 = vadd.f32 %v4628_v46, %v1375_v30  ;;  %v1544_v30 = vld [vmem:[%s5618_s3 + $0x78] sm:$0xff] }
 0x1ab   :  { %v1266_v11 = vpop.f32.mrf.mxu0  ;;  %1714 = vmatpush1.msra.mxu1 %v1553_v29  ;;  %v1106_v63 = vadd.f32 %v4574_v38, %v4504_v40  ;;  %v1107_v43 = vadd.f32 %v4581_v49, %v4506_v3  ;;  %v4774_v29 = vpop.f32.mrf.mxu1  ;;  %v1543_v3 = vld [vmem:[%s5618_s3 + $0x70] sm:$0xff] }
 0x1ac   :  { %v1436_v26 = vadd.f32 %v4632_v48, %v1376_v12  ;;  %v1377_v36 = vadd.f32 %v1266_v11, %v1102_v41  ;;  %1665 = vmatmul.mubr.f32.gmra.mxu1 %v4726_v2  ;;  %1715 = vmatprep.subr.mxu1 %v1552_v24  ;;  %v1499_v33 = vmax.f32 %v1475_v55, 0.0  ;;  %v1542_v24 = vld [vmem:[%s5618_s3 + $0x68] sm:$0xff]  ;;  %v1108_v41 = vadd.f32 %v4588_v52, %v4513_v61 }
 0x1ad   :  { %v1268_v59 = vpop.f32.mrf.mxu0  ;;  %1670 = vmatprep.mubr.f32.mxu1 %v5693_v8  ;;  %1716 = vmatpush1.msra.mxu1 %v1551_v0  ;;  %v1541_v0 = vld [vmem:[%s5618_s3 + $0x60] sm:$0xff] }
 0x1ae   :  { %v1476_v20 = vmax.f32 %v1435_v10, %v1436_v26  ;;  %v1378_v18 = vadd.f32 %v1268_v59, %v1103_v62  ;;  %1717 = vmatprep.subr.mxu1 %v1550_v27  ;;  %v1437_v47 = vadd.f32 %v4628_v46, %v1377_v36  ;;  %v1109_v62 = vadd.f32 %v4595_v53, %v4515_v32  ;;  %v1540_v10 = vld [vmem:[%s5618_s3 + $0x58] sm:$0xff]  ;;  %v4798_v26 = vpop.f32.mrf.mxu1  ;;  %v1539_v32 = vld [vmem:[%s5618_s3 + $0x50] sm:$0xff] }
 0x1af   :  { %v1272_v35 = vpop.f32.mrf.mxu0  ;;  %1718 = vmatpush1.msra.mxu1 %v1549_v17  ;;  %v1110_v59 = vadd.f32 %v4607_v19, %v4522_v5 }
 0x1b0   :  { %v1500_v34 = vmax.f32 %v1476_v20, 0.0  ;;  %v1438_v7 = vadd.f32 %v4632_v48, %v1378_v18  ;;  %v1379_v31 = vadd.f32 %v1272_v35, %v1104_v23  ;;  %1719 = vmatprep.subr.mxu1 %v1548_v50  ;;  %v5694_v18 = vld [vmem:[#allocation27_spill] sm:$0xff] }
 0x1b1   :  { %v1274_v25 = vpop.f32.mrf.mxu0  ;;  %1720 = vmatpush1.msra.mxu1 %v1547_v37  ;;  %v5695_v37 = vld [vmem:[#allocation3_spill] sm:$0xff] }
 0x1b2   :  { %v4767_v22 = vmax.f32 %v1499_v33, %v1500_v34  ;;  %v1477_v9 = vmax.f32 %v1437_v47, %v1438_v7  ;;  %v1380_v13 = vadd.f32 %v1274_v25, %v1105_v39  ;;  %1721 = vmatprep.subr.mxu1 %v1546_v45  ;;  %v1439_v1 = vadd.f32 %v4628_v46, %v1379_v31  ;;  %v1538_v35 = vld [vmem:[%s5618_s3 + $0x48] sm:$0xff]  ;;  %v4814_v45 = vpop.f32.mrf.mxu1  ;;  %v1537_v47 = vld [vmem:[%s5618_s3 + $0x40] sm:$0xff]  ;;  %v1536_v31 = vld [vmem:[%s5618_s3 + $0x38] sm:$0xff] }
 0x1b3   :  { %v1278_v54 = vpop.f32.mrf.mxu0  ;;  %1722 = vmatpush1.msra.mxu1 %v1545_v57  ;;  %v1111_v39 = vadd.f32 %v5695_v37, %v5694_v18  ;;  %v5696_v57 = vld [vmem:[#allocation28_spill] sm:$0xff]  ;;  %v1530_v18 = vld [vmem:[%s5618_s3 + $0x8] sm:$0xff] }
 0x1b4   :  { %v1440_v40 = vadd.f32 %v4632_v48, %v1380_v13  ;;  %v1381_v38 = vadd.f32 %v1278_v54, %v1106_v63  ;;  %1671 = vmatmul.mubr.f32.gmra.mxu1 %v4767_v22  ;;  %2080 = vmatmul.mubr.f32.vlgmr.msra.gmra.mxu0 %v4767_v22  ;;  %v1501_v11 = vmax.f32 %v1477_v9, 0.0  ;;  %v1112_v25 = vadd.f32 %v4638_v16, %v5696_v57  ;;  %v1535_v13 = vld [vmem:[%s5618_s3 + $0x30] sm:$0xff] }
 0x1b5   :  { %v1280_v49 = vpop.f32.mrf.mxu0  ;;  %1676 = vmatprep.mubr.f32.mxu1 %v5693_v8  ;;  %2085 = vmatprep.mubr.f32.mxu0 %v5693_v8  ;;  %v5702_v37 = vld [vmem:[#allocation32_spill] sm:$0xff] }
 0x1b6   :  { %v1478_v55 = vmax.f32 %v1439_v1, %v1440_v40  ;;  %v1382_v12 = vadd.f32 %v1280_v49, %v1107_v43  ;;  %1723 = vmatprep.subr.mxu1 %v1544_v30  ;;  %v1441_v52 = vadd.f32 %v4628_v46, %v1381_v38  ;;  %v5697_v43 = vld [vmem:[#allocation29_spill] sm:$0xff]  ;;  %v1534_v40 = vld [vmem:[%s5618_s3 + $0x28] sm:$0xff]  ;;  %v4838_v38 = vpop.f32.mrf.mxu1 }
 0x1b7   :  { %v1284_v27 = vpop.f32.mrf.mxu0  ;;  %1724 = vmatpush1.msra.mxu1 %v1543_v3  ;;  %v1113_v54 = vadd.f32 %v4646_v56, %v5697_v43  ;;  %v1533_v56 = vld [vmem:[%s5618_s3 + $0x20] sm:$0xff] }
 0x1b8   :  { %v1502_v61 = vmax.f32 %v1478_v55, 0.0  ;;  %v1442_v36 = vadd.f32 %v4632_v48, %v1382_v12  ;;  %v1383_v17 = vadd.f32 %v1284_v27, %v1108_v41  ;;  %1725 = vmatprep.subr.mxu1 %v1542_v24  ;;  %v5698_v55 = vld [vmem:[#allocation30_spill] sm:$0xff]  ;;  %v5699_v27 = vld [vmem:[#allocation31_spill] sm:$0xff] }
 0x1b9   :  { %v1286_v53 = vpop.f32.mrf.mxu0  ;;  %1726 = vmatpush1.msra.mxu1 %v1541_v0  ;;  %v1114_v12 = vadd.f32 %v4656_v4, %v5698_v55 }
 0x1ba   :  { %v4807_v50 = vmax.f32 %v1501_v11, %v1502_v61  ;;  %v1479_v23 = vmax.f32 %v1441_v52, %v1442_v36  ;;  %v1384_v20 = vadd.f32 %v1286_v53, %v1109_v62  ;;  %1727 = vmatprep.subr.mxu1 %v1540_v10  ;;  %v1443_v34 = vadd.f32 %v4628_v46, %v1383_v17  ;;  %v1532_v52 = vld [vmem:[%s5618_s3 + $0x18] sm:$0xff]  ;;  %v4854_v36 = vpop.f32.mrf.mxu1  ;;  %v5700_v53 = vld [vmem:[#allocation6_spill] sm:$0xff] }
 0x1bb   :  { %v1290_v33 = vpop.f32.mrf.mxu0  ;;  %1728 = vmatpush1.msra.mxu1 %v1539_v32  ;;  %v1115_v10 = vadd.f32 %v4668_v60, %v5699_v27  ;;  %v1531_v60 = vld [vmem:[%s5618_s3 + $0x10] sm:$0xff] }
 0x1bc   :  { %v1444_v5 = vadd.f32 %v4632_v48, %v1384_v20  ;;  %v1385_v19 = vadd.f32 %v1290_v33, %v1110_v59  ;;  %1677 = vmatmul.mubr.f32.gmra.mxu1 %v4807_v50  ;;  %2086 = vmatmul.mubr.f32.gmra.mxu0 %v4807_v50  ;;  %v1503_v30 = vmax.f32 %v1479_v23, 0.0  ;;  %v5701_v59 = vld [vmem:[#allocation7_spill] sm:$0xff] }
 0x1bd   :  { %v1292_v7 = vpop.f32.mrf.mxu0  ;;  %1682 = vmatprep.mubr.f32.mxu1 %v5693_v8  ;;  %2091 = vmatprep.mubr.f32.mxu0 %v5693_v8  ;;  %v540_v23 = vadd.f32 %v5701_v59, %v5700_v53  ;;  %v5712_v59 = vld [vmem:[#allocation39_spill] sm:$0xff] }
 0x1be   :  { %v1480_v63 = vmax.f32 %v1443_v34, %v1444_v5  ;;  %v1386_v9 = vadd.f32 %v1292_v7, %v1111_v39  ;;  %1729 = vmatprep.subr.mxu1 %v1538_v35  ;;  %v1445_v3 = vadd.f32 %v4628_v46, %v1385_v19  ;;  %v1116_v39 = vadd.f32 %v4676_v14, %v5702_v37  ;;  %v1529_v34 = vld [vmem:[%s5618_s3] sm:$0xff]  ;;  %v5703_v5 = vld [vmem:[#allocation33_spill] sm:$0xff]  ;;  %v4881_v14 = vpop.f32.mrf.mxu1 }
 0x1bf   :  { %v1296_v1 = vpop.f32.mrf.mxu0  ;;  %1730 = vmatpush1.msra.mxu1 %v1537_v47  ;;  %v1117_v19 = vadd.f32 %v4692_v58, %v5703_v5  ;;  %v5704_v47 = vld [vmem:[#allocation35_spill] sm:$0xff]  ;;  %v5706_v58 = vld [vmem:[#allocation9_spill] sm:$0xff]  ;;  %v5713_v5 = vld [vmem:[#allocation12_spill] sm:$0xff] }
 0x1c0   :  { %v1504_v16 = vmax.f32 %v1480_v63, 0.0  ;;  %v1446_v49 = vadd.f32 %v4632_v48, %v1386_v9  ;;  %v1387_v24 = vadd.f32 %v1296_v1, %v1112_v25  ;;  %1731 = vmatprep.subr.mxu1 %v1536_v31  ;;  %v844_v7 = vadd.f32 %v5704_v47, %v540_v23  ;;  %v3047_v25 = vld [vmem:[%s5618_s3 + $0x2f8] sm:$0xff] }
 0x1c1   :  { %v1298_v41 = vpop.f32.mrf.mxu0  ;;  %1732 = vmatpush1.msra.mxu1 %v1535_v13 }
 0x1c2   :  { %v4847_v0 = vmax.f32 %v1503_v30, %v1504_v16  ;;  %v1481_v62 = vmax.f32 %v1445_v3, %v1446_v49  ;;  %v1388_v11 = vadd.f32 %v1298_v41, %v1113_v54  ;;  %1733 = vmatprep.subr.mxu1 %v1534_v40  ;;  %v1447_v17 = vadd.f32 %v4628_v46, %v1387_v24  ;;  %v5705_v54 = vld [vmem:[#allocation8_spill] sm:$0xff]  ;;  %v5707_v40 = vld [vmem:[#allocation34_spill] sm:$0xff]  ;;  %v5708_v41 = vld [vmem:[#allocation37_spill] sm:$0xff] }
 0x1c3   :  { %v1302_v61 = vpop.f32.mrf.mxu0  ;;  %1734 = vmatpush1.msra.mxu1 %v1533_v56  ;;  %v546_v30 = vadd.f32 %v5706_v58, %v5705_v54  ;;  %v1118_v16 = vadd.f32 %v4714_v15, %v5707_v40  ;;  %v1119_v56 = vadd.f32 %v4736_v6, %v844_v7  ;;  %v5709_v15 = vld [vmem:[#allocation10_spill] sm:$0xff]  ;;  %v5711_v6 = vld [vmem:[#allocation36_spill] sm:$0xff]  ;;  %v5718_v40 = vld [vmem:[#allocation15_spill] sm:$0xff] }
 0x1c4   :  { %v1448_v4 = vadd.f32 %v4632_v48, %v1388_v11  ;;  %v1389_v32 = vadd.f32 %v1302_v61, %v1114_v12  ;;  %1683 = vmatmul.mubr.f32.gmra.mxu1 %v4847_v0  ;;  %2092 = vmatmul.mubr.f32.gmra.mxu0 %v4847_v0  ;;  %v1505_v31 = vmax.f32 %v1481_v62, 0.0  ;;  %v1065_v62 = vpop.f32.mrf.mxu1  ;;  %v5710_v61 = vld [vmem:[#allocation11_spill] sm:$0xff] }
 0x1c5   :  { %v1304_v20 = vpop.f32.mrf.mxu0  ;;  %1688 = vmatprep.mubr.f32.mxu1 %v5693_v8  ;;  %2097 = vmatprep.mubr.f32.mxu0 %v5693_v8  ;;  %v846_v55 = vadd.f32 %v5708_v41, %v546_v30 }
 0x1c6   :  { %v1482_v33 = vmax.f32 %v1447_v17, %v1448_v4  ;;  %v1390_v35 = vadd.f32 %v1304_v20, %v1115_v10  ;;  %1735 = vmatprep.subr.mxu1 %v1532_v52  ;;  %v1449_v9 = vadd.f32 %v4628_v46, %v1389_v32  ;;  %v552_v52 = vadd.f32 %v5710_v61, %v5709_v15  ;;  %v1069_v37 = vpop.f32.mrf.mxu1 }
 0x1c7   :  { %v1308_v57 = vpop.f32.mrf.mxu0  ;;  %1736 = vmatpush1.msra.mxu1 %v1531_v60  ;;  %v1120_v4 = vadd.f32 %v4758_v42, %v5711_v6  ;;  %v1121_v53 = vadd.f32 %v4774_v29, %v846_v55  ;;  %v5715_v42 = vld [vmem:[#allocation38_spill] sm:$0xff] }
 0x1c8   :  { %v1506_v63 = vmax.f32 %v1482_v33, 0.0  ;;  %v1450_v13 = vadd.f32 %v4632_v48, %v1390_v35  ;;  %v1391_v43 = vadd.f32 %v1308_v57, %v1116_v39  ;;  %1737 = vmatprep.subr.mxu1 %v1530_v18  ;;  %v848_v23 = vadd.f32 %v5712_v59, %v552_v52  ;;  %v1071_v54 = vpop.f32.mrf.mxu1 }
 0x1c9   :  { %v1310_v1 = vpop.f32.mrf.mxu0  ;;  %1738 = vmatpush1.msra.mxu1 %v1529_v34 }
 0x1ca   :  { %v4889_v3 = vmax.f32 %v1505_v31, %v1506_v63  ;;  %v1483_v49 = vmax.f32 %v1449_v9, %v1450_v13  ;;  %v1392_v24 = vadd.f32 %v1310_v1, %v1117_v19  ;;  %1853 = vmatprep.subr.mxu1 %v3047_v25  ;;  %v1451_v11 = vadd.f32 %v4628_v46, %v1391_v43  ;;  %v5714_v19 = vld [vmem:[#allocation13_spill] sm:$0xff]  ;;  %v1075_v15 = vpop.f32.mrf.mxu1 }
 0x1cb   :  { %v1314_v12 = vpop.f32.mrf.mxu0  ;;  %v558_v47 = vadd.f32 %v5714_v19, %v5713_v5  ;;  %v1122_v31 = vadd.f32 %v4798_v26, %v5715_v42  ;;  %v1123_v63 = vadd.f32 %v4814_v45, %v848_v23  ;;  %v5716_v9 = vld [vmem:[#allocation41_spill] sm:$0xff]  ;;  %v5717_v26 = vld [vmem:[#allocation14_spill] sm:$0xff]  ;;  %v5719_v45 = vld [vmem:[#allocation40_spill] sm:$0xff] }
 0x1cc   :  { %v1452_v27 = vadd.f32 %v4632_v48, %v1392_v24  ;;  %v1393_v10 = vadd.f32 %v1314_v12, %v1118_v16  ;;  %1689 = vmatmul.mubr.f32.gmra.mxu1 %v4889_v3  ;;  %2098 = vmatmul.mubr.f32.gmra.mxu0 %v4889_v3  ;;  %v1507_v20 = vmax.f32 %v1483_v49, 0.0  ;;  %v564_v16 = vadd.f32 %v5718_v40, %v5717_v26  ;;  %v5720_v12 = vld [vmem:[#allocation43_spill] sm:$0xff] }
 0x1cd   :  { %v1316_v17 = vpop.f32.mrf.mxu0  ;;  %1694 = vmatprep.mubr.f32.mxu1 %v5693_v8  ;;  %2103 = vmatprep.mubr.f32.mxu0 %v5693_v8  ;;  %v850_v13 = vadd.f32 %v5716_v9, %v558_v47  ;;  %v1124_v24 = vadd.f32 %v4838_v38, %v5719_v45  ;;  %v5723_v38 = vld [vmem:[#allocation42_spill] sm:$0xff]  ;;  %v3046_v9 = vld [vmem:[%s5618_s3 + $0x2f0] sm:$0xff]  ;;  %v3045_v26 = vld [vmem:[%s5618_s3 + $0x2e8] sm:$0xff] }
 0x1ce   :  { %v1484_v32 = vmax.f32 %v1451_v11, %v1452_v27  ;;  %v1394_v60 = vadd.f32 %v1316_v17, %v1119_v56  ;;  %v1453_v33 = vadd.f32 %v4628_v46, %v1393_v10  ;;  %v852_v11 = vadd.f32 %v5720_v12, %v564_v16  ;;  %v3043_v12 = vld [vmem:[%s5618_s3 + $0x2d8] sm:$0xff] }
 0x1cf   :  { %v1320_v18 = vpop.f32.mrf.mxu0  ;;  %v1125_v55 = vadd.f32 %v4854_v36, %v850_v13  ;;  %v1126_v59 = vadd.f32 %v4881_v14, %v5723_v38  ;;  %v5726_v14 = vld [vmem:[#allocation19_spill] sm:$0xff]  ;;  %v3040_v38 = vld [vmem:[%s5618_s3 + $0x2c0] sm:$0xff] }
 0x1d0   :  { %v1508_v39 = vmax.f32 %v1484_v32, 0.0  ;;  %v1454_v35 = vadd.f32 %v4632_v48, %v1394_v60  ;;  %v1395_v34 = vadd.f32 %v1320_v18, %v1120_v4  ;;  %v5721_v4 = vld [vmem:[#allocation16_spill] sm:$0xff]  ;;  %v5722_v32 = vld [vmem:[#allocation17_spill] sm:$0xff]  ;;  %v1127_v18 = vadd.f32 %v1065_v62, %v852_v11  ;;  %v5731_v11 = vld [vmem:[#allocation46_spill] sm:$0xff] }
 0x1d1   :  { %v1322_v7 = vpop.f32.mrf.mxu0  ;;  %v570_v60 = vadd.f32 %v5722_v32, %v5721_v4  ;;  %v5727_v62 = vld [vmem:[#allocation44_spill] sm:$0xff]  ;;  %v3041_v4 = vld [vmem:[%s5618_s3 + $0x2c8] sm:$0xff] }
 0x1d2   :  { %v4911_v57 = vmax.f32 %v1507_v20, %v1508_v39  ;;  %v1485_v29 = vmax.f32 %v1453_v33, %v1454_v35  ;;  %v1396_v25 = vadd.f32 %v1322_v7, %v1121_v53  ;;  %v1455_v58 = vadd.f32 %v4628_v46, %v1395_v34  ;;  %v5724_v39 = vld [vmem:[#allocation45_spill] sm:$0xff]  ;;  %v1077_v34 = vpop.f32.mrf.mxu1  ;;  %v5725_v7 = vld [vmem:[#allocation18_spill] sm:$0xff] }
 0x1d3   :  { %v1326_v43 = vpop.f32.mrf.mxu0  ;;  %v854_v33 = vadd.f32 %v5724_v39, %v570_v60  ;;  %v576_v42 = vadd.f32 %v5726_v14, %v5725_v7 }
 0x1d4   :  { %v1456_v30 = vadd.f32 %v4632_v48, %v1396_v25  ;;  %v1397_v1 = vadd.f32 %v1326_v43, %v1122_v31  ;;  %1695 = vmatmul.mubr.f32.gmra.mxu1 %v4911_v57  ;;  %2104 = vmatmul.mubr.f32.gmra.mxu0 %v4911_v57  ;;  %v1509_v27 = vmax.f32 %v1485_v29, 0.0  ;;  %v1128_v29 = vadd.f32 %v1069_v37, %v5727_v62  ;;  %v5728_v43 = vld [vmem:[#allocation48_spill] sm:$0xff]  ;;  %v1081_v40 = vpop.f32.mrf.mxu1 }
 0x1d5   :  { %v1328_v49 = vpop.f32.mrf.mxu0  ;;  %1700 = vmatprep.mubr.f32.mxu1 %v5693_v8  ;;  %2109 = vmatprep.mubr.f32.mxu0 %v5693_v8  ;;  %v1129_v13 = vadd.f32 %v1071_v54, %v854_v33  ;;  %v3044_v54 = vld [vmem:[%s5618_s3 + $0x2e0] sm:$0xff] }
 0x1d6   :  { %v1486_v56 = vmax.f32 %v1455_v58, %v1456_v30  ;;  %v1398_v41 = vadd.f32 %v1328_v49, %v1123_v63  ;;  %v1457_v52 = vadd.f32 %v4628_v46, %v1397_v1  ;;  %v856_v58 = vadd.f32 %v5728_v43, %v576_v42  ;;  %v1083_v32 = vpop.f32.mrf.mxu1  ;;  %v3033_v43 = vld [vmem:[%s5618_s3 + $0x288] sm:$0xff] }
 0x1d7   :  { %v1332_v10 = vpop.f32.mrf.mxu0 }
 0x1d8   :  { %v1510_v61 = vmax.f32 %v1486_v56, 0.0  ;;  %v1458_v17 = vadd.f32 %v4632_v48, %v1398_v41  ;;  %v1399_v6 = vadd.f32 %v1332_v10, %v1124_v24  ;;  %v5729_v24 = vld [vmem:[#allocation21_spill] sm:$0xff]  ;;  %v5730_v56 = vld [vmem:[#allocation22_spill] sm:$0xff] }
 0x1d9   :  { %v1334_v53 = vpop.f32.mrf.mxu0  ;;  %v582_v41 = vadd.f32 %v5730_v56, %v5729_v24  ;;  %v3026_v24 = vld [vmem:[%s5618_s3 + $0x250] sm:$0xff]  ;;  %v3025_v56 = vld [vmem:[%s5618_s3 + $0x248] sm:$0xff] }
 0x1da   :  { %v4933_v23 = vmax.f32 %v1509_v27, %v1510_v61  ;;  %v1487_v36 = vmax.f32 %v1457_v52, %v1458_v17  ;;  %v1400_v20 = vadd.f32 %v1334_v53, %v1125_v55  ;;  %v1459_v5 = vadd.f32 %v4628_v46, %v1399_v6  ;;  %v5732_v52 = vld [vmem:[#allocation2_spill] sm:$0xff] }
 0x1db   :  { %v1338_v35 = vpop.f32.mrf.mxu0  ;;  %v1130_v27 = vadd.f32 %v1075_v15, %v5731_v11  ;;  %v1131_v61 = vadd.f32 %v1077_v34, %v856_v58  ;;  %v858_v17 = vadd.f32 %v5732_v52, %v582_v41  ;;  %v3024_v41 = vld [vmem:[%s5618_s3 + $0x240] sm:$0xff]  ;;  %v3021_v11 = vld [vmem:[%s5618_s3 + $0x228] sm:$0xff]  ;;  %v3111_v52 = vld [vmem:[%s5618_s3 + $0x4f8] sm:$0xff] }
 0x1dc   :  { %v1460_v19 = vadd.f32 %v4632_v48, %v1400_v20  ;;  %v1401_v47 = vadd.f32 %v1338_v35, %v1126_v59  ;;  %1701 = vmatmul.mubr.f32.gmra.mxu1 %v4933_v23  ;;  %2110 = vmatmul.mubr.f32.gmra.mxu0 %v4933_v23  ;;  %v1511_v30 = vmax.f32 %v1487_v36, 0.0  ;;  %v3039_v36 = vld [vmem:[%s5618_s3 + $0x2b8] sm:$0xff]  ;;  %v5733_v20 = vld [vmem:[#allocation20_spill] sm:$0xff] }
 0x1dd   :  { %v1340_v31 = vpop.f32.mrf.mxu0  ;;  %1771 = vmatprep.mubr.f32.mxu1 %v5693_v8  ;;  %2115 = vmatprep.mubr.f32.mxu0 %v5693_v8  ;;  %v1133_v35 = vadd.f32 %v1083_v32, %v858_v17  ;;  %v3110_v17 = vld [vmem:[%s5618_s3 + $0x4f0] sm:$0xff]  ;;  %v3107_v32 = vld [vmem:[%s5618_s3 + $0x4d8] sm:$0xff] }
 0x1de   :  { %v1488_v25 = vmax.f32 %v1459_v5, %v1460_v19  ;;  %v1402_v63 = vadd.f32 %v1340_v31, %v1127_v18  ;;  %v1461_v49 = vadd.f32 %v4628_v46, %v1401_v47  ;;  %v1132_v18 = vadd.f32 %v1081_v40, %v5733_v20  ;;  %v3037_v19 = vld [vmem:[%s5618_s3 + $0x2a8] sm:$0xff]  ;;  %v3036_v31 = vld [vmem:[%s5618_s3 + $0x2a0] sm:$0xff]  ;;  %v3098_v20 = vld [vmem:[%s5618_s3 + $0x490] sm:$0xff] }
 0x1df   :  { %v1344_v1 = vpop.f32.mrf.mxu0 }
 0x1e0   :  { %v1512_v16 = vmax.f32 %v1488_v25, 0.0  ;;  %v1462_v37 = vadd.f32 %v4632_v48, %v1402_v63  ;;  %v1403_v45 = vadd.f32 %v1344_v1, %v1128_v29  ;;  %1772 = vmatmul.mubr.f32.vlgmr.msra.gmra.mxu1 %v1517_v21  ;;  %v3042_v21 = vld [vmem:[%s5618_s3 + $0x2d0] sm:$0xff]  ;;  %v3035_v29 = vld [vmem:[%s5618_s3 + $0x298] sm:$0xff]  ;;  %v3032_v1 = vld [vmem:[%s5618_s3 + $0x280] sm:$0xff] }
 0x1e1   :  { %v1346_v55 = vpop.f32.mrf.mxu0  ;;  %1854 = vmatpush1.msra.mxu1 %v3046_v9  ;;  %1777 = vmatprep.mubr.f32.mxu1 %v5693_v8 }
 0x1e2   :  { %v4967_v10 = vmax.f32 %v1511_v30, %v1512_v16  ;;  %v1489_v51 = vmax.f32 %v1461_v49, %v1462_v37  ;;  %v1404_v44 = vadd.f32 %v1346_v55, %v1129_v13  ;;  %1855 = vmatprep.subr.mxu1 %v3045_v26  ;;  %v1463_v15 = vadd.f32 %v4628_v46, %v1403_v45  ;;  %v3034_v13 = vld [vmem:[%s5618_s3 + $0x290] sm:$0xff]  ;;  %v3031_v26 = vld [vmem:[%s5618_s3 + $0x278] sm:$0xff]  ;;  %v3028_v37 = vld [vmem:[%s5618_s3 + $0x260] sm:$0xff] }
 0x1e3   :  { %v1350_v6 = vpop.f32.mrf.mxu0  ;;  %1856 = vmatpush1.msra.mxu1 %v3044_v54  ;;  %v3027_v45 = vld [vmem:[%s5618_s3 + $0x258] sm:$0xff] }
 0x1e4   :  { %v1464_v60 = vadd.f32 %v4632_v48, %v1404_v44  ;;  %v1405_v53 = vadd.f32 %v1350_v6, %v1130_v27  ;;  %1778 = vmatmul.mubr.f32.gmra.mxu1 %v4682_v28  ;;  %1857 = vmatprep.subr.mxu1 %v3043_v12  ;;  %v3038_v28 = vld [vmem:[%s5618_s3 + $0x2b0] sm:$0xff]  ;;  %v1513_v34 = vmax.f32 %v1489_v51, 0.0  ;;  %v3023_v55 = vld [vmem:[%s5618_s3 + $0x238] sm:$0xff]  ;;  %v3020_v27 = vld [vmem:[%s5618_s3 + $0x220] sm:$0xff] }
 0x1e5   :  { %2116 = vmatmul.mubr.f32.gmra.mxu0 %v4967_v10  ;;  %v1352_v59 = vpop.f32.mrf.mxu0  ;;  %1858 = vmatpush1.msra.mxu1 %v3042_v21  ;;  %v3022_v12 = vld [vmem:[%s5618_s3 + $0x230] sm:$0xff]  ;;  %v3019_v51 = vld [vmem:[%s5618_s3 + $0x218] sm:$0xff]  ;;  %v3017_v21 = vld [vmem:[%s5618_s3 + $0x208] sm:$0xff] }
 0x1e6   :  { %v1490_v39 = vmax.f32 %v1463_v15, %v1464_v60  ;;  %v1406_v33 = vadd.f32 %v1352_v59, %v1131_v61  ;;  %1859 = vmatprep.subr.mxu1 %v3041_v4  ;;  %1783 = vmatprep.mubr.f32.mxu1 %v5693_v8  ;;  %v1465_v7 = vadd.f32 %v4628_v46, %v1405_v53  ;;  %v3018_v44 = vld [vmem:[%s5618_s3 + $0x210] sm:$0xff]  ;;  %v3016_v61 = vld [vmem:[%s5618_s3 + $0x200] sm:$0xff]  ;;  %v3109_v6 = vld [vmem:[%s5618_s3 + $0x4e8] sm:$0xff] }
 0x1e7   :  { %v1356_v5 = vpop.f32.mrf.mxu0  ;;  %1860 = vmatpush1.msra.mxu1 %v3040_v38  ;;  %2121 = vmatprep.mubr.f32.mxu0 %v5693_v8  ;;  %v3108_v4 = vld [vmem:[%s5618_s3 + $0x4e0] sm:$0xff]  ;;  %v3106_v15 = vld [vmem:[%s5618_s3 + $0x4d0] sm:$0xff]  ;;  %v3103_v53 = vld [vmem:[%s5618_s3 + $0x4b8] sm:$0xff] }
 0x1e8   :  { %v1514_v47 = vmax.f32 %v1490_v39, 0.0  ;;  %v1466_v14 = vadd.f32 %v4632_v48, %v1406_v33  ;;  %v1407_v42 = vadd.f32 %v1356_v5, %v1132_v18  ;;  %1784 = vmatmul.mubr.f32.gmra.mxu1 %v4726_v2  ;;  %1861 = vmatprep.subr.mxu1 %v3039_v36  ;;  %v3104_v60 = vld [vmem:[%s5618_s3 + $0x4c0] sm:$0xff]  ;;  %v3102_v38 = vld [vmem:[%s5618_s3 + $0x4b0] sm:$0xff]  ;;  %v3099_v36 = vld [vmem:[%s5618_s3 + $0x498] sm:$0xff] }
 0x1e9   :  { %v1358_v62 = vpop.f32.mrf.mxu0  ;;  %1862 = vmatpush1.msra.mxu1 %v3038_v28  ;;  %1789 = vmatprep.mubr.f32.mxu1 %v5693_v8  ;;  %v3100_v59 = vld [vmem:[%s5618_s3 + $0x4a0] sm:$0xff]  ;;  %v3097_v18 = vld [vmem:[%s5618_s3 + $0x488] sm:$0xff]  ;;  %v3095_v33 = vld [vmem:[%s5618_s3 + $0x478] sm:$0xff] }
 0x1ea   :  { %v5005_v25 = vmax.f32 %v1513_v34, %v1514_v47  ;;  %v1491_v63 = vmax.f32 %v1465_v7, %v1466_v14  ;;  %v1408_v9 = vadd.f32 %v1358_v62, %v1133_v35  ;;  %1863 = vmatprep.subr.mxu1 %v3037_v19  ;;  %v1467_v58 = vadd.f32 %v4628_v46, %v1407_v42  ;;  %v3030_v46 = vld [vmem:[%s5618_s3 + $0x270] sm:$0xff]  ;;  %v3096_v39 = vld [vmem:[%s5618_s3 + $0x480] sm:$0xff]  ;;  %v3093_v35 = vld [vmem:[%s5618_s3 + $0x468] sm:$0xff] }
 0x1eb   :  { %1864 = vmatpush1.msra.mxu1 %v3036_v31  ;;  %v3094_v28 = vld [vmem:[%s5618_s3 + $0x470] sm:$0xff]  ;;  %v3092_v34 = vld [vmem:[%s5618_s3 + $0x460] sm:$0xff]  ;;  %v3091_v5 = vld [vmem:[%s5618_s3 + $0x458] sm:$0xff] }
 0x1ec   :  { %v1468_v30 = vadd.f32 %v4632_v48, %v1408_v9  ;;  %1790 = vmatmul.mubr.f32.gmra.mxu1 %v4767_v22  ;;  %1865 = vmatprep.subr.mxu1 %v3035_v29  ;;  %v3029_v48 = vld [vmem:[%s5618_s3 + $0x268] sm:$0xff]  ;;  %v5030_v16 = vmax.f32 %v1491_v63, 0.0  ;;  %v3090_v19 = vld [vmem:[%s5618_s3 + $0x450] sm:$0xff]  ;;  %v3088_v7 = vld [vmem:[%s5618_s3 + $0x440] sm:$0xff] }
 0x1ed   :  { %2122 = vmatmul.mubr.f32.gmra.mxu0 %v5005_v25  ;;  %1866 = vmatpush1.msra.mxu1 %v3034_v13  ;;  %v3089_v47 = vld [vmem:[%s5618_s3 + $0x448] sm:$0xff]  ;;  %v3087_v14 = vld [vmem:[%s5618_s3 + $0x438] sm:$0xff]  ;;  %v3086_v42 = vld [vmem:[%s5618_s3 + $0x430] sm:$0xff] }
 0x1ee   :  { %v1492_v40 = vmax.f32 %v1467_v58, %v1468_v30  ;;  %1867 = vmatprep.subr.mxu1 %v3033_v43  ;;  %1795 = vmatprep.mubr.f32.mxu1 %v5693_v8  ;;  %v3085_v31 = vld [vmem:[%s5618_s3 + $0x428] sm:$0xff]  ;;  %v3084_v62 = vld [vmem:[%s5618_s3 + $0x420] sm:$0xff]  ;;  %v3083_v29 = vld [vmem:[%s5618_s3 + $0x418] sm:$0xff] }
 0x1ef   :  { %1868 = vmatpush1.msra.mxu1 %v3032_v1  ;;  %v3082_v63 = vld [vmem:[%s5618_s3 + $0x410] sm:$0xff]  ;;  %v3081_v9 = vld [vmem:[%s5618_s3 + $0x408] sm:$0xff]  ;;  %v3080_v13 = vld [vmem:[%s5618_s3 + $0x400] sm:$0xff]  ;;  %3272 = vmatprep.mubr.msk.f32.mxu0 %vm3404_vm2, %v5693_v8 }
 0x1f0   :  { %v5032_v49 = vmax.f32 %v1492_v40, 0.0  ;;  %1796 = vmatmul.mubr.f32.gmra.mxu1 %v4807_v50  ;;  %1869 = vmatprep.subr.mxu1 %v3031_v26  ;;  %v2364_v43 = vld [vmem:[%s5620_s5 + $0x50] sm:$0xff]  ;;  %v3125_v58 = vld [vmem:[%s5620_s5 + $0xe8] sm:$0xff]  ;;  %v3124_v1 = vld [vmem:[%s5620_s5 + $0xe0] sm:$0xff] }
 0x1f1   :  { %1870 = vmatpush1.msra.mxu1 %v3030_v46  ;;  %1801 = vmatprep.mubr.f32.mxu1 %v5693_v8  ;;  %v2363_v30 = vld [vmem:[%s5620_s5 + $0x48] sm:$0xff]  ;;  %v2362_v26 = vld [vmem:[%s5620_s5 + $0x40] sm:$0xff]  ;;  %v3123_v40 = vld [vmem:[%s5620_s5 + $0xd8] sm:$0xff] }
 0x1f2   :  { %v1528_v54 = vmax.f32 %v5030_v16, %v5032_v49  ;;  %1871 = vmatprep.subr.mxu1 %v3029_v48  ;;  %v2361_v46 = vld [vmem:[%s5620_s5 + $0x38] sm:$0xff]  ;;  %v3122_v48 = vld [vmem:[%s5620_s5 + $0xd0] sm:$0xff]  ;;  %v3121_v49 = vld [vmem:[%s5620_s5 + $0xc8] sm:$0xff] }
 0x1f3   :  { %1872 = vmatpush1.msra.mxu1 %v3028_v37  ;;  %v2360_v16 = vld [vmem:[%s5620_s5 + $0x30] sm:$0xff]  ;;  %v2359_v37 = vld [vmem:[%s5620_s5 + $0x28] sm:$0xff] }
 0x1f4   :  { %1802 = vmatmul.mubr.f32.gmra.mxu1 %v4847_v0  ;;  %1873 = vmatprep.subr.mxu1 %v3027_v45  ;;  %v3120_v45 = vld [vmem:[%s5620_s5 + $0xc0] sm:$0xff] }
 0x1f5   :  { %1874 = vmatpush1.msra.mxu1 %v3026_v24  ;;  %1807 = vmatprep.mubr.f32.mxu1 %v5693_v8  ;;  %v3119_v24 = vld [vmem:[%s5620_s5 + $0xb8] sm:$0xff] }
 0x1f6   :  { %1875 = vmatprep.subr.mxu1 %v3025_v56  ;;  %v2357_v56 = vld [vmem:[%s5620_s5 + $0x18] sm:$0xff] }
 0x1f7   :  { %1876 = vmatpush1.msra.mxu1 %v3024_v41  ;;  %v3118_v41 = vld [vmem:[%s5620_s5 + $0xb0] sm:$0xff] }
 0x1f8   :  { %1808 = vmatmul.mubr.f32.gmra.mxu1 %v4889_v3  ;;  %1877 = vmatprep.subr.mxu1 %v3023_v55  ;;  %v2356_v55 = vld [vmem:[%s5620_s5 + $0x10] sm:$0xff] }
 0x1f9   :  { %1878 = vmatpush1.msra.mxu1 %v3022_v12  ;;  %1813 = vmatprep.mubr.f32.mxu1 %v5693_v8  ;;  %v3117_v12 = vld [vmem:[%s5620_s5 + $0xa8] sm:$0xff] }
 0x1fa   :  { %1879 = vmatprep.subr.mxu1 %v3021_v11  ;;  %v2355_v11 = vld [vmem:[%s5620_s5 + $0x8] sm:$0xff] }
 0x1fb   :  { %1880 = vmatpush1.msra.mxu1 %v3020_v27  ;;  %v3116_v27 = vld [vmem:[%s5620_s5 + $0xa0] sm:$0xff] }
 0x1fc   :  { %1814 = vmatmul.mubr.f32.gmra.mxu1 %v4911_v57  ;;  %1881 = vmatprep.subr.mxu1 %v3019_v51  ;;  %v2354_v51 = vld [vmem:[%s5620_s5] sm:$0xff] }
 0x1fd   :  { %1882 = vmatpush1.msra.mxu1 %v3018_v44  ;;  %1917 = vmatprep.mubr.f32.mxu1 %v5693_v8  ;;  %v3115_v44 = vld [vmem:[%s5620_s5 + $0x98] sm:$0xff] }
 0x1fe   :  { %1883 = vmatprep.subr.mxu1 %v3017_v21 }
 0x1ff   :  { %1884 = vmatpush1.msra.mxu1 %v3016_v61  ;;  %v3114_v61 = vld [vmem:[%s5620_s5 + $0x90] sm:$0xff] }
 0x200   :  { %1918 = vmatmul.mubr.f32.vlgmr.msra.gmra.mxu1 %v4726_v2  ;;  %2177 = vmatprep.subr.mxu1 %v3111_v52  ;;  %v3105_v2 = vld [vmem:[%s5618_s3 + $0x4c8] sm:$0xff] }
 0x201   :  { %2178 = vmatpush1.msra.mxu1 %v3110_v17  ;;  %1923 = vmatprep.mubr.f32.mxu1 %v5693_v8  ;;  %v3113_v52 = vld [vmem:[%s5620_s5 + $0x88] sm:$0xff] }
 0x202   :  { %2179 = vmatprep.subr.mxu1 %v3109_v6  ;;  %v3112_v6 = vld [vmem:[%s5620_s5 + $0x80] sm:$0xff] }
 0x203   :  { %2180 = vmatpush1.msra.mxu1 %v3108_v4 }
 0x204   :  { %1924 = vmatmul.mubr.f32.gmra.mxu1 %v4767_v22  ;;  %2181 = vmatprep.subr.mxu1 %v3107_v32  ;;  %v3101_v22 = vld [vmem:[%s5618_s3 + $0x4a8] sm:$0xff] }
 0x205   :  { %2182 = vmatpush1.msra.mxu1 %v3106_v15  ;;  %1929 = vmatprep.mubr.f32.mxu1 %v5693_v8 }
 0x206   :  { %2183 = vmatprep.subr.mxu1 %v3105_v2 }
 0x207   :  { %2184 = vmatpush1.msra.mxu1 %v3104_v60 }
 0x208   :  { %1930 = vmatmul.mubr.f32.gmra.mxu1 %v4807_v50  ;;  %2185 = vmatprep.subr.mxu1 %v3103_v53 }
 0x209   :  { %2186 = vmatpush1.msra.mxu1 %v3102_v38  ;;  %1935 = vmatprep.mubr.f32.mxu1 %v5693_v8 }
 0x20a   :  { %2187 = vmatprep.subr.mxu1 %v3101_v22 }
 0x20b   :  { %2188 = vmatpush1.msra.mxu1 %v3100_v59 }
 0x20c   :  { %1936 = vmatmul.mubr.f32.gmra.mxu1 %v4847_v0  ;;  %2189 = vmatprep.subr.mxu1 %v3099_v36 }
 0x20d   :  { %2190 = vmatpush1.msra.mxu1 %v3098_v20  ;;  %1941 = vmatprep.mubr.f32.mxu1 %v5693_v8 }
 0x20e   :  { %2191 = vmatprep.subr.mxu1 %v3097_v18 }
 0x20f   :  { %2192 = vmatpush1.msra.mxu1 %v3096_v39 }
 0x210   :  { %1942 = vmatmul.mubr.f32.gmra.mxu1 %v4889_v3  ;;  %2193 = vmatprep.subr.mxu1 %v3095_v33 }
 0x211   :  { %2194 = vmatpush1.msra.mxu1 %v3094_v28  ;;  %1947 = vmatprep.mubr.f32.mxu1 %v5693_v8 }
 0x212   :  { %2195 = vmatprep.subr.mxu1 %v3093_v35 }
 0x213   :  { %2196 = vmatpush1.msra.mxu1 %v3092_v34 }
 0x214   :  { %1948 = vmatmul.mubr.f32.gmra.mxu1 %v4911_v57  ;;  %2197 = vmatprep.subr.mxu1 %v3091_v5 }
 0x215   :  { %2198 = vmatpush1.msra.mxu1 %v3090_v19  ;;  %1953 = vmatprep.mubr.f32.mxu1 %v5693_v8 }
 0x216   :  { %2199 = vmatprep.subr.mxu1 %v3089_v47 }
 0x217   :  { %2200 = vmatpush1.msra.mxu1 %v3088_v7 }
 0x218   :  { %1954 = vmatmul.mubr.f32.gmra.mxu1 %v4933_v23  ;;  %2201 = vmatprep.subr.mxu1 %v3087_v14 }
 0x219   :  { %2202 = vmatpush1.msra.mxu1 %v3086_v42  ;;  %1959 = vmatprep.mubr.f32.mxu1 %v5693_v8 }
 0x21a   :  { %2203 = vmatprep.subr.mxu1 %v3085_v31 }
 0x21b   :  { %2204 = vmatpush1.msra.mxu1 %v3084_v62 }
 0x21c   :  { %1960 = vmatmul.mubr.f32.gmra.mxu1 %v4967_v10  ;;  %2205 = vmatprep.subr.mxu1 %v3083_v29 }
 0x21d   :  { %2206 = vmatpush1.msra.mxu1 %v3082_v63  ;;  %2241 = vmatprep.mubr.f32.mxu1 %v5693_v8 }
 0x21e   :  { %2207 = vmatprep.subr.mxu1 %v3081_v9 }
 0x21f   :  { %2208 = vmatpush1.msra.mxu1 %v3080_v13 }
 0x220   :  { %2242 = vmatmul.mubr.f32.vlgmr.msra.gmra.mxu1 %v4807_v50  ;;  %3275 = vmatprep.subr.mxu1 %v5693_v8  ;;  %v2369_v50 = vld [vmem:[%s5620_s5 + $0x78] sm:$0xff] }
 0x221   :  { %2247 = vmatprep.mubr.f32.mxu1 %v5693_v8  ;;  %3276 = vmatpush3.msra.mxu1 %v2369_v50 }
 0x222   :  { %3277 = vmatprep.subr.mxu1 %v5693_v8 }
 0x224   :  { %2248 = vmatmul.mubr.f32.gmra.mxu1 %v4847_v0  ;;  %v2368_v0 = vld [vmem:[%s5620_s5 + $0x70] sm:$0xff] }
 0x225   :  { %2253 = vmatprep.mubr.f32.mxu1 %v5693_v8  ;;  %3278 = vmatpush3.msra.mxu1 %v2368_v0 }
 0x226   :  { %3279 = vmatprep.subr.mxu1 %v5693_v8 }
 0x228   :  { %2254 = vmatmul.mubr.f32.gmra.mxu1 %v4889_v3  ;;  %v2367_v3 = vld [vmem:[%s5620_s5 + $0x68] sm:$0xff] }
 0x229   :  { %2259 = vmatprep.mubr.f32.mxu1 %v5693_v8  ;;  %3280 = vmatpush3.msra.mxu1 %v2367_v3 }
 0x22a   :  { %3281 = vmatprep.subr.mxu1 %v5693_v8 }
 0x22c   :  { %2260 = vmatmul.mubr.f32.gmra.mxu1 %v4911_v57  ;;  %v2366_v57 = vld [vmem:[%s5620_s5 + $0x60] sm:$0xff] }
 0x22d   :  { %2265 = vmatprep.mubr.f32.mxu1 %v5693_v8  ;;  %3282 = vmatpush3.msra.mxu1 %v2366_v57 }
 0x22e   :  { %3283 = vmatprep.subr.mxu1 %v5693_v8 }
 0x230   :  { %2266 = vmatmul.mubr.f32.gmra.mxu1 %v4933_v23  ;;  %v3127_v23 = vld [vmem:[%s5620_s5 + $0xf8] sm:$0xff] }
 0x231   :  { %2271 = vmatprep.mubr.f32.mxu1 %v5693_v8  ;;  %3241 = vmatpush3.msra.mxu0 %v3127_v23 }
 0x232   :  { %3242 = vmatprep.subr.mxu0 %v5693_v8 }
 0x234   :  { %2272 = vmatmul.mubr.f32.gmra.mxu1 %v4967_v10  ;;  %v2365_v10 = vld [vmem:[%s5620_s5 + $0x58] sm:$0xff] }
 0x235   :  { %2277 = vmatprep.mubr.f32.mxu1 %v5693_v8  ;;  %3284 = vmatpush3.msra.mxu1 %v2365_v10 }
 0x236   :  { %3285 = vmatprep.subr.mxu1 %v5693_v8 }
 0x237   :  { %3286 = vmatpush3.msra.mxu1 %v2364_v43 }
 0x238   :  { %2278 = vmatmul.mubr.f32.gmra.mxu1 %v5005_v25  ;;  %v3126_v25 = vld [vmem:[%s5620_s5 + $0xf0] sm:$0xff]  ;;  %3287 = vmatprep.subr.mxu1 %v5693_v8 }
 0x239   :  { %2283 = vmatprep.mubr.f32.mxu1 %v5693_v8  ;;  %3243 = vmatpush3.msra.mxu0 %v3126_v25 }
 0x23a   :  { %3244 = vmatprep.subr.mxu0 %v5693_v8  ;;  %3288 = vmatpush3.msra.mxu1 %v2363_v30 }
 0x23b   :  { %3245 = vmatpush3.msra.mxu0 %v3125_v58  ;;  %3289 = vmatprep.subr.mxu1 %v5693_v8 }
 0x23c   :  { %2284 = vmatmul.mubr.f32.gmra.mxu1 %v1528_v54  ;;  %3246 = vmatprep.subr.mxu0 %v5693_v8  ;;  %v2358_v54 = vld [vmem:[%s5620_s5 + $0x20] sm:$0xff] }
 0x23d   :  { %3247 = vmatpush3.msra.mxu0 %v3124_v1  ;;  %3290 = vmatpush3.msra.mxu1 %v2362_v26 }
 0x23e   :  { %3248 = vmatprep.subr.mxu0 %v5693_v8  ;;  %3291 = vmatprep.subr.mxu1 %v5693_v8 }
 0x23f   :  { %3249 = vmatpush3.msra.mxu0 %v3123_v40  ;;  %3292 = vmatpush3.msra.mxu1 %v2361_v46 }
 0x240   :  { %3250 = vmatprep.subr.mxu0 %v5693_v8  ;;  %3293 = vmatprep.subr.mxu1 %v5693_v8 }
 0x241   :  { %3251 = vmatpush3.msra.mxu0 %v3122_v48  ;;  %3294 = vmatpush3.msra.mxu1 %v2360_v16 }
 0x242   :  { %3252 = vmatprep.subr.mxu0 %v5693_v8  ;;  %3295 = vmatprep.subr.mxu1 %v5693_v8 }
 0x243   :  { %3253 = vmatpush3.msra.mxu0 %v3121_v49  ;;  %3296 = vmatpush3.msra.mxu1 %v2359_v37 }
 0x244   :  { %3254 = vmatprep.subr.mxu0 %v5693_v8  ;;  %3297 = vmatprep.subr.mxu1 %v5693_v8 }
 0x245   :  { %3255 = vmatpush3.msra.mxu0 %v3120_v45  ;;  %3298 = vmatpush3.msra.mxu1 %v2358_v54 }
 0x246   :  { %3256 = vmatprep.subr.mxu0 %v5693_v8  ;;  %3299 = vmatprep.subr.mxu1 %v5693_v8 }
 0x247   :  { %3257 = vmatpush3.msra.mxu0 %v3119_v24  ;;  %3300 = vmatpush3.msra.mxu1 %v2357_v56 }
 0x248   :  { %3258 = vmatprep.subr.mxu0 %v5693_v8  ;;  %3301 = vmatprep.subr.mxu1 %v5693_v8 }
 0x249   :  { %3259 = vmatpush3.msra.mxu0 %v3118_v41  ;;  %3302 = vmatpush3.msra.mxu1 %v2356_v55 }
 0x24a   :  { %3260 = vmatprep.subr.mxu0 %v5693_v8  ;;  %3303 = vmatprep.subr.mxu1 %v5693_v8 }
 0x24b   :  { %3261 = vmatpush3.msra.mxu0 %v3117_v12  ;;  %3304 = vmatpush3.msra.mxu1 %v2355_v11 }
 0x24c   :  { %3262 = vmatprep.subr.mxu0 %v5693_v8  ;;  %3305 = vmatprep.subr.mxu1 %v5693_v8 }
 0x24d   :  { %3263 = vmatpush3.msra.mxu0 %v3116_v27  ;;  %3306 = vmatpush3.msra.mxu1 %v2354_v51 }
 0x24e   :  { %3264 = vmatprep.subr.mxu0 %v5693_v8  ;;  %3307 = vmatprep.mubr.msk.f32.mxu1 %vm3404_vm2, %v5693_v8 }
 0x24f   :  { %3345 = vmatprep.subr.mxu1 %v5693_v8  ;;  %3265 = vmatpush3.msra.mxu0 %v3115_v44 }
 0x250   :  { %3266 = vmatprep.subr.mxu0 %v5693_v8 }
 0x251   :  { %3267 = vmatpush3.msra.mxu0 %v3114_v61 }
 0x252   :  { %3268 = vmatprep.subr.mxu0 %v5693_v8 }
 0x253   :  { %3269 = vmatpush3.msra.mxu0 %v3113_v52 }
 0x254   :  { %3270 = vmatprep.subr.mxu0 %v5693_v8 }
 0x255   :  { %3271 = vmatpush3.msra.mxu0 %v3112_v6 }
 0x256   :  { %3310 = vmatprep.subr.mxu0 %v5693_v8 }
 0x264   :  { %v1660_v21 = vpop.f32.mrf.mxu1 }
 0x266   :  { %v5340_v17 = vpop.f32.mrf.mxu1 }
 0x26c   :  { %v5346_v4 = vpop.f32.mrf.mxu1 }
 0x26e   :  { %v5349_v32 = vpop.f32.mrf.mxu1 }
 0x274   :  { %v1672_v15 = vpop.f32.mrf.mxu1  ;;  %v2081_v45 = vpop.f32.mrf.mxu0 }
 0x276   :  { %v5351_v2 = vpop.f32.mrf.mxu1  ;;  %v2083_v56 = vpop.f32.mrf.mxu0 }
 0x27c   :  { %v5353_v60 = vpop.f32.mrf.mxu1  ;;  %v2087_v55 = vpop.f32.mrf.mxu0 }
 0x27e   :  { %v5355_v53 = vpop.f32.mrf.mxu1  ;;  %v2089_v27 = vpop.f32.mrf.mxu0 }
 0x284   :  { %v1684_v38 = vpop.f32.mrf.mxu1  ;;  %v2093_v44 = vpop.f32.mrf.mxu0 }
 0x286   :  { %v1686_v22 = vpop.f32.mrf.mxu1 }
 0x28c   :  { %v1690_v59 = vpop.f32.mrf.mxu1 }
 0x28e   :  { %v1692_v36 = vpop.f32.mrf.mxu1 }
 0x294   :  { %v1696_v20 = vpop.f32.mrf.mxu1 }
 0x296   :  { %v1698_v18 = vpop.f32.mrf.mxu1 }
 0x29c   :  { %v1702_v39 = vpop.f32.mrf.mxu1 }
 0x29e   :  { %v1704_v33 = vpop.f32.mrf.mxu1 }
 0x2a0   :  { %v1773_v28 = vpop.f32.mrf.mxu1 }
 0x2a1   :  { %v1774_v35 = vadd.f32 %v1773_v28, %v1660_v21 }
 0x2a2   :  { %v1775_v34 = vpop.f32.mrf.mxu1 }
 0x2a3   :  { %v1776_v61 = vadd.f32 %v1775_v34, %v5340_v17  ;;  %v5734_v34 = vld [vmem:[#allocation47_spill] sm:$0xff] }
 0x2a4   :  { %v1779_v5 = vpop.f32.mrf.mxu1 }
 0x2a6   :  { %v1781_v19 = vpop.f32.mrf.mxu1 }
 0x2a8   :  { %v1785_v47 = vpop.f32.mrf.mxu1 }
 0x2a9   :  { %v1786_v7 = vadd.f32 %v1785_v47, %v1672_v15  ;;  %v2095_v15 = vpop.f32.mrf.mxu0  ;;  %v5735_v47 = vsub.s32 0, %v5734_v34 }
 0x2aa   :  { %v1787_v14 = vpop.f32.mrf.mxu1 }
 0x2ac   :  { %v1791_v42 = vpop.f32.mrf.mxu1 }
 0x2ae   :  { %v5357_v31 = vpop.f32.mrf.mxu1 }
 0x2b0   :  { %v1797_v62 = vpop.f32.mrf.mxu1 }
 0x2b1   :  { %v5359_v29 = vadd.f32 %v1797_v62, %v1684_v38  ;;  %v1780_v38 = vadd.f32 %v1779_v5, %v5346_v4  ;;  %v5736_v5 = vsub.s32 1, %v5734_v34 }
 0x2b2   :  { %v1799_v63 = vpop.f32.mrf.mxu1 }
 0x2b3   :  { %v5361_v9 = vadd.f32 %v1799_v63, %v1686_v22 }
 0x2b4   :  { %v1803_v13 = vpop.f32.mrf.mxu1 }
 0x2b5   :  { %v5363_v50 = vadd.f32 %v1803_v13, %v1690_v59  ;;  %v1782_v59 = vadd.f32 %v1781_v19, %v5349_v32  ;;  %v1788_v13 = vadd.f32 %v1787_v14, %v5351_v2 }
 0x2b6   :  { %v1805_v0 = vpop.f32.mrf.mxu1 }
 0x2b7   :  { %v5365_v3 = vadd.f32 %v1805_v0, %v1692_v36 }
 0x2b8   :  { %v1809_v57 = vpop.f32.mrf.mxu1 }
 0x2b9   :  { %v5367_v23 = vadd.f32 %v1809_v57, %v1696_v20  ;;  %v2306_v20 = vld [vmem:[%s5621_s4] sm:$0x3] }
 0x2ba   :  { %v1811_v10 = vpop.f32.mrf.mxu1  ;;  %v5395_v62 = vrot.slane %v2306_v20, %v5735_v47  ;;  %v5399_v32 = vrot.slane %v2306_v20, %v5736_v5 }
 0x2bb   :  { %v5369_v25 = vadd.f32 %v1811_v10, %v1698_v18  ;;  %v2099_v18 = vpop.f32.mrf.mxu0 }
 0x2bc   :  { %v1815_v43 = vpop.f32.mrf.mxu1 }
 0x2bd   :  { %v5371_v58 = vadd.f32 %v1815_v43, %v1702_v39  ;;  %v2101_v63 = vpop.f32.mrf.mxu0  ;;  %v1792_v43 = vadd.f32 %v1791_v42, %v5353_v60 }
 0x2be   :  { %v1817_v30 = vpop.f32.mrf.mxu1 }
 0x2bf   :  { %v5373_v1 = vadd.f32 %v1817_v30, %v1704_v33 }
 0x2c0   :  { %v1919_v26 = vpop.f32.mrf.mxu1 }
 0x2c1   :  { %v1966_v52 = vadd.f32 %v1919_v26, %v1774_v35 }
 0x2c2   :  { %v1921_v40 = vpop.f32.mrf.mxu1 }
 0x2c3   :  { %v1967_v22 = vadd.f32 %v1921_v40, %v1776_v61  ;;  %v2128_v33 = vadd.f32 %v2081_v45, %v1966_v52  ;;  %v2105_v40 = vpop.f32.mrf.mxu0  ;;  %v1794_v61 = vadd.f32 %v5357_v31, %v5355_v53 }
 0x2c4   :  { %v1925_v46 = vpop.f32.mrf.mxu1 }
 0x2c5   :  { %v1968_v39 = vadd.f32 %v1925_v46, %v1780_v38  ;;  %v2129_v4 = vadd.f32 %v2083_v56, %v1967_v22  ;;  %v2107_v60 = vpop.f32.mrf.mxu0 }
 0x2c6   :  { %v1927_v48 = vpop.f32.mrf.mxu1 }
 0x2c7   :  { %v1969_v28 = vadd.f32 %v1927_v48, %v1782_v59  ;;  %v2130_v10 = vadd.f32 %v2087_v55, %v1968_v39  ;;  %v2111_v39 = vpop.f32.mrf.mxu0 }
 0x2c8   :  { %v1931_v16 = vpop.f32.mrf.mxu1 }
 0x2c9   :  { %v1970_v0 = vadd.f32 %v1931_v16, %v1786_v7  ;;  %v2131_v26 = vadd.f32 %v2089_v27, %v1969_v28  ;;  %v2113_v5 = vpop.f32.mrf.mxu0 }
 0x2ca   :  { %v1933_v49 = vpop.f32.mrf.mxu1 }
 0x2cb   :  { %v1971_v46 = vadd.f32 %v1933_v49, %v1788_v13  ;;  %v2132_v14 = vadd.f32 %v2093_v44, %v1970_v0  ;;  %v2117_v13 = vpop.f32.mrf.mxu0 }
 0x2cc   :  { %v1937_v37 = vpop.f32.mrf.mxu1 }
 0x2cd   :  { %v1972_v38 = vadd.f32 %v1937_v37, %v1792_v43  ;;  %v2133_v22 = vadd.f32 %v2095_v15, %v1971_v46 }
 0x2ce   :  { %v1939_v54 = vpop.f32.mrf.mxu1 }
 0x2cf   :  { %v1973_v16 = vadd.f32 %v1939_v54, %v1794_v61  ;;  %v2134_v31 = vadd.f32 %v2099_v18, %v1972_v38 }
 0x2d0   :  { %v1943_v24 = vpop.f32.mrf.mxu1 }
 0x2d1   :  { %v1974_v59 = vadd.f32 %v1943_v24, %v5359_v29  ;;  %v2135_v54 = vadd.f32 %v2101_v63, %v1973_v16 }
 0x2d2   :  { %v1945_v41 = vpop.f32.mrf.mxu1 }
 0x2d3   :  { %v1975_v37 = vadd.f32 %v1945_v41, %v5361_v9  ;;  %v2136_v15 = vadd.f32 %v2105_v40, %v1974_v59  ;;  %v3159_v9 = vld [vmem:[%s5620_s5 + $0x1f8] sm:$0xff]  ;;  %v3157_v40 = vld [vmem:[%s5620_s5 + $0x1e8] sm:$0xff] }
 0x2d4   :  { %v5375_v12 = vpop.f32.mrf.mxu1 }
 0x2d5   :  { %v1976_v29 = vadd.f32 %v5375_v12, %v5363_v50  ;;  %v2137_v43 = vadd.f32 %v2107_v60, %v1975_v37  ;;  %v3158_v50 = vld [vmem:[%s5620_s5 + $0x1f0] sm:$0xff] }
 0x2d6   :  { %v5377_v11 = vpop.f32.mrf.mxu1 }
 0x2d7   :  { %v1977_v41 = vadd.f32 %v5377_v11, %v5365_v3 }
 0x2d8   :  { %v5379_v51 = vpop.f32.mrf.mxu1 }
 0x2d9   :  { %v1978_v12 = vadd.f32 %v5379_v51, %v5367_v23  ;;  %v2139_v51 = vadd.f32 %v2113_v5, %v1977_v41  ;;  %v3140_v5 = vld [vmem:[%s5620_s5 + $0x160] sm:$0xff]  ;;  %v3139_v41 = vld [vmem:[%s5620_s5 + $0x158] sm:$0xff] }
 0x2da   :  { %v5381_v21 = vpop.f32.mrf.mxu1 }
 0x2db   :  { %v1979_v46 = vadd.f32 %v5381_v21, %v5369_v25  ;;  %v2140_v25 = vadd.f32 %v2117_v13, %v1978_v12 }
 0x2dc   :  { %v5384_v6 = vpop.f32.mrf.mxu1 }
 0x2de   :  { %v5388_v36 = vpop.f32.mrf.mxu1 }
 0x2e0   :  { %v2243_v17 = vpop.f32.mrf.mxu1 }
 0x2e1   :  { %v2290_v35 = vadd.f32 %v2243_v17, %v2128_v33 }
 0x2e2   :  { %v2245_v19 = vpop.f32.mrf.mxu1 }
 0x2e3   :  { %v2291_v57 = vadd.f32 %v2245_v19, %v2129_v4  ;;  %v2318_v48 = vadd.f32 %v5395_v62, %v2290_v35 }
 0x2e4   :  { %v2249_v30 = vpop.f32.mrf.mxu1 }
 0x2e5   :  { %v2319_v45 = vadd.f32 %v5399_v32, %v2291_v57  ;;  %v2292_v56 = vadd.f32 %v2249_v30, %v2130_v10 }
 0x2e6   :  { %v2251_v52 = vpop.f32.mrf.mxu1 }
 0x2e7   :  { %v2334_v2 = vmax.f32 %v2318_v48, %v2319_v45  ;;  %v2293_v7 = vadd.f32 %v2251_v52, %v2131_v26  ;;  %v2320_v42 = vadd.f32 %v5395_v62, %v2292_v56  ;;  %v2138_v26 = vadd.f32 %v2111_v39, %v1976_v29  ;;  %v2119_v45 = vpop.f32.mrf.mxu0  ;;  %v3142_v39 = vld [vmem:[%s5620_s5 + $0x170] sm:$0xff] }
 0x2e8   :  { %v2255_v55 = vpop.f32.mrf.mxu1  ;;  %v2141_v59 = vadd.f32 %v2119_v45, %v1979_v46  ;;  %v3134_v46 = vld [vmem:[%s5620_s5 + $0x130] sm:$0xff]  ;;  %v3132_v45 = vld [vmem:[%s5620_s5 + $0x120] sm:$0xff] }
 0x2e9   :  { %v2321_v49 = vadd.f32 %v5399_v32, %v2293_v7  ;;  %v2294_v27 = vadd.f32 %v2255_v55, %v2132_v14  ;;  %v2342_v28 = vmax.f32 %v2334_v2, 0.0  ;;  %v3156_v2 = vld [vmem:[%s5620_s5 + $0x1e0] sm:$0xff]  ;;  %v2123_v21 = vpop.f32.mrf.mxu0  ;;  %v1980_v14 = vadd.f32 %v5384_v6, %v5371_v58 }
 0x2ea   :  { %v2257_v20 = vpop.f32.mrf.mxu1 }
 0x2eb   :  { %v2335_v33 = vmax.f32 %v2320_v42, %v2321_v49  ;;  %v2295_v53 = vadd.f32 %v2257_v20, %v2133_v22  ;;  %v2322_v35 = vadd.f32 %v5395_v62, %v2294_v27  ;;  %v3143_v42 = vld [vmem:[%s5620_s5 + $0x178] sm:$0xff]  ;;  %v1981_v27 = vadd.f32 %v5388_v36, %v5373_v1  ;;  %v2125_v36 = vpop.f32.mrf.mxu0 }
 0x2ec   :  { %v2261_v44 = vpop.f32.mrf.mxu1  ;;  %v3155_v49 = vld [vmem:[%s5620_s5 + $0x1d8] sm:$0xff]  ;;  %v2142_v37 = vadd.f32 %v2123_v21, %v1980_v14  ;;  %v2716_v21 = vld [vmem:[%s5622_s7 + $0x20] sm:$0xff] }
 0x2ed   :  { %v2343_v17 = vmax.f32 %v2335_v33, 0.0  ;;  %v2323_v34 = vadd.f32 %v5399_v32, %v2295_v53  ;;  %v2296_v47 = vadd.f32 %v2261_v44, %v2134_v31  ;;  %v3154_v33 = vld [vmem:[%s5620_s5 + $0x1d0] sm:$0xff]  ;;  %v3153_v44 = vld [vmem:[%s5620_s5 + $0x1c8] sm:$0xff]  ;;  %v2715_v14 = vld [vmem:[%s5622_s7 + $0x18] sm:$0xff] }
 0x2ee   :  { %v2263_v4 = vpop.f32.mrf.mxu1 }
 0x2ef   :  { %v2350_v24 = vmax.f32 %v2342_v28, %v2343_v17  ;;  %v2336_v19 = vmax.f32 %v2322_v35, %v2323_v34  ;;  %v2297_v18 = vadd.f32 %v2263_v4, %v2135_v54  ;;  %v2324_v0 = vadd.f32 %v5395_v62, %v2296_v47  ;;  %v3141_v28 = vld [vmem:[%s5620_s5 + $0x168] sm:$0xff] }
 0x2f0   :  { %v2267_v63 = vpop.f32.mrf.mxu1  ;;  %v2143_v35 = vadd.f32 %v2125_v36, %v1981_v27 }
 0x2f1   :  { %v2325_v57 = vadd.f32 %v5399_v32, %v2297_v18  ;;  %v2298_v10 = vadd.f32 %v2267_v63, %v2136_v15  ;;  %3308 = vmatmul.mubr.f32.vlgmr.msra.gmra.mxu1 %v2350_v24  ;;  %v2344_v48 = vmax.f32 %v2336_v19, 0.0  ;;  %v3152_v24 = vld [vmem:[%s5620_s5 + $0x1c0] sm:$0xff]  ;;  %v3151_v63 = vld [vmem:[%s5620_s5 + $0x1b8] sm:$0xff] }
 0x2f2   :  { %3346 = vmatpush3.msra.mxu1 %v3159_v9  ;;  %v2269_v30 = vpop.f32.mrf.mxu1  ;;  %3377 = vmatprep.mubr.msk.f32.mxu1 %vm3404_vm2, %v5693_v8 }
 0x2f3   :  { %v2337_v3 = vmax.f32 %v2324_v0, %v2325_v57  ;;  %v2299_v11 = vadd.f32 %v2269_v30, %v2137_v43  ;;  %3347 = vmatprep.subr.mxu1 %v5693_v8  ;;  %v2326_v61 = vadd.f32 %v5395_v62, %v2298_v10  ;;  %v3138_v57 = vld [vmem:[%s5620_s5 + $0x150] sm:$0xff]  ;;  %v3136_v30 = vld [vmem:[%s5620_s5 + $0x140] sm:$0xff] }
 0x2f4   :  { %3348 = vmatpush3.msra.mxu1 %v3158_v50  ;;  %v2273_v23 = vpop.f32.mrf.mxu1  ;;  %v3150_v10 = vld [vmem:[%s5620_s5 + $0x1b0] sm:$0xff] }
 0x2f5   :  { %v2345_v56 = vmax.f32 %v2337_v3, 0.0  ;;  %v2327_v52 = vadd.f32 %v5399_v32, %v2299_v11  ;;  %v2300_v38 = vadd.f32 %v2273_v23, %v2138_v26  ;;  %3349 = vmatprep.subr.mxu1 %v5693_v8  ;;  %v3148_v3 = vld [vmem:[%s5620_s5 + $0x1a0] sm:$0xff]  ;;  %v3135_v26 = vld [vmem:[%s5620_s5 + $0x138] sm:$0xff]  ;;  %v3133_v23 = vld [vmem:[%s5620_s5 + $0x128] sm:$0xff] }
 0x2f6   :  { %3350 = vmatpush3.msra.mxu1 %v3157_v40  ;;  %v2275_v7 = vpop.f32.mrf.mxu1  ;;  %v3147_v40 = vld [vmem:[%s5620_s5 + $0x198] sm:$0xff] }
 0x2f7   :  { %v2351_v16 = vmax.f32 %v2344_v48, %v2345_v56  ;;  %v2338_v55 = vmax.f32 %v2326_v61, %v2327_v52  ;;  %v2301_v60 = vadd.f32 %v2275_v7, %v2139_v51  ;;  %3351 = vmatprep.subr.mxu1 %v5693_v8  ;;  %v2328_v58 = vadd.f32 %v5395_v62, %v2300_v38  ;;  %v3146_v48 = vld [vmem:[%s5620_s5 + $0x190] sm:$0xff]  ;;  %v3145_v51 = vld [vmem:[%s5620_s5 + $0x188] sm:$0xff]  ;;  %v3144_v56 = vld [vmem:[%s5620_s5 + $0x180] sm:$0xff] }
 0x2f8   :  { %3352 = vmatpush3.msra.mxu1 %v3156_v2  ;;  %v2279_v22 = vpop.f32.mrf.mxu1  ;;  %v3131_v61 = vld [vmem:[%s5620_s5 + $0x118] sm:$0xff]  ;;  %v3130_v52 = vld [vmem:[%s5620_s5 + $0x110] sm:$0xff]  ;;  %v3129_v38 = vld [vmem:[%s5620_s5 + $0x108] sm:$0xff] }
 0x2f9   :  { %v2329_v6 = vadd.f32 %v5399_v32, %v2301_v60  ;;  %v2302_v20 = vadd.f32 %v2279_v22, %v2140_v25  ;;  %3353 = vmatprep.subr.mxu1 %v5693_v8  ;;  %3273 = vmatmul.mubr.f32.vlgmr.msra.gmra.mxu0 %v2351_v16  ;;  %v5469_v54 = vmax.f32 %v2338_v55, 0.0  ;;  %v3128_v2 = vld [vmem:[%s5620_s5 + $0x100] sm:$0xff]  ;;  %v2718_v7 = vld [vmem:[%s5622_s7 + $0x30] sm:$0x3]  ;;  %v2717_v25 = vld [vmem:[%s5622_s7 + $0x28] sm:$0xff] }
 0x2fa   :  { %3311 = vmatpush3.msra.mxu0 %v3143_v42  ;;  %3354 = vmatpush3.msra.mxu1 %v3155_v49  ;;  %v2281_v1 = vpop.f32.mrf.mxu1  ;;  %v2714_v16 = vld [vmem:[%s5622_s7 + $0x10] sm:$0xff]  ;;  %v2713_v55 = vld [vmem:[%s5622_s7 + $0x8] sm:$0xff]  ;;  %v2712_v60 = vld [vmem:[%s5622_s7] sm:$0xff] }
 0x2fb   :  { %v2339_v53 = vmax.f32 %v2328_v58, %v2329_v6  ;;  %v2303_v31 = vadd.f32 %v2281_v1, %v2141_v59  ;;  %3312 = vmatprep.subr.mxu0 %v5693_v8  ;;  %3355 = vmatprep.subr.mxu1 %v5693_v8  ;;  %v2330_v47 = vadd.f32 %v5395_v62, %v2302_v20 }
 0x2fc   :  { %3313 = vmatpush3.msra.mxu0 %v3142_v39  ;;  %3356 = vmatpush3.msra.mxu1 %v3154_v33  ;;  %v2285_v17 = vpop.f32.mrf.mxu1  ;;  %v3160_v33 = vld [vmem:[%s5623_s6] ss:$0 sm:$0xff] }
 0x2fd   :  { %v5471_v34 = vmax.f32 %v2339_v53, 0.0  ;;  %v2331_v4 = vadd.f32 %v5399_v32, %v2303_v31  ;;  %v2304_v15 = vadd.f32 %v2285_v17, %v2142_v37  ;;  %3314 = vmatprep.subr.mxu0 %v5693_v8  ;;  %3357 = vmatprep.subr.mxu1 %v5693_v8 }
 0x2fe   :  { %3315 = vmatpush3.msra.mxu0 %v3141_v28  ;;  %3358 = vmatpush3.msra.mxu1 %v3153_v44  ;;  %v2287_v29 = vpop.f32.mrf.mxu1 }
 0x2ff   :  { %v2352_v19 = vmax.f32 %v5469_v54, %v5471_v34  ;;  %v2340_v18 = vmax.f32 %v2330_v47, %v2331_v4  ;;  %v2305_v9 = vadd.f32 %v2287_v29, %v2143_v35  ;;  %3316 = vmatprep.subr.mxu0 %v5693_v8  ;;  %3359 = vmatprep.subr.mxu1 %v5693_v8 }
 0x300   :  { %3317 = vmatpush3.msra.mxu0 %v3140_v5  ;;  %v2332_v13 = vadd.f32 %v5395_v62, %v2304_v15  ;;  %3360 = vmatpush3.msra.mxu1 %v3152_v24  ;;  %v3137_v62 = vld [vmem:[%s5620_s5 + $0x148] sm:$0xff] }
 0x301   :  { %v2333_v0 = vadd.f32 %v5399_v32, %v2305_v9  ;;  %3318 = vmatprep.subr.mxu0 %v5693_v8  ;;  %3361 = vmatprep.subr.mxu1 %v5693_v8  ;;  %v3149_v32 = vld [vmem:[%s5620_s5 + $0x1a8] sm:$0xff]  ;;  %v2348_v50 = vmax.f32 %v2340_v18, 0.0 }
 0x302   :  { %3319 = vmatpush3.msra.mxu0 %v3139_v41  ;;  %3362 = vmatpush3.msra.mxu1 %v3151_v63 }
 0x303   :  { %v2341_v43 = vmax.f32 %v2332_v13, %v2333_v0  ;;  %3320 = vmatprep.subr.mxu0 %v5693_v8  ;;  %3363 = vmatprep.subr.mxu1 %v5693_v8 }
 0x304   :  { %3321 = vmatpush3.msra.mxu0 %v3138_v57  ;;  %3364 = vmatpush3.msra.mxu1 %v3150_v10 }
 0x305   :  { %v2349_v12 = vmax.f32 %v2341_v43, 0.0  ;;  %3322 = vmatprep.subr.mxu0 %v5693_v8  ;;  %3365 = vmatprep.subr.mxu1 %v5693_v8 }
 0x306   :  { %3323 = vmatpush3.msra.mxu0 %v3137_v62  ;;  %3366 = vmatpush3.msra.mxu1 %v3149_v32 }
 0x307   :  { %v2353_v11 = vmax.f32 %v2348_v50, %v2349_v12  ;;  %3324 = vmatprep.subr.mxu0 %v5693_v8  ;;  %3367 = vmatprep.subr.mxu1 %v5693_v8 }
 0x308   :  { %3325 = vmatpush3.msra.mxu0 %v3136_v30  ;;  %3368 = vmatpush3.msra.mxu1 %v3148_v3 }
 0x309   :  { %3326 = vmatprep.subr.mxu0 %v5693_v8  ;;  %3369 = vmatprep.subr.mxu1 %v5693_v8 }
 0x30a   :  { %3327 = vmatpush3.msra.mxu0 %v3135_v26  ;;  %3370 = vmatpush3.msra.mxu1 %v3147_v40 }
 0x30b   :  { %3328 = vmatprep.subr.mxu0 %v5693_v8  ;;  %3371 = vmatprep.subr.mxu1 %v5693_v8 }
 0x30c   :  { %3329 = vmatpush3.msra.mxu0 %v3134_v46  ;;  %3372 = vmatpush3.msra.mxu1 %v3146_v48 }
 0x30d   :  { %3330 = vmatprep.subr.mxu0 %v5693_v8  ;;  %3373 = vmatprep.subr.mxu1 %v5693_v8 }
 0x30e   :  { %3331 = vmatpush3.msra.mxu0 %v3133_v23  ;;  %3374 = vmatpush3.msra.mxu1 %v3145_v51 }
 0x30f   :  { %3332 = vmatprep.subr.mxu0 %v5693_v8  ;;  %3375 = vmatprep.subr.mxu1 %v5693_v8 }
 0x310   :  { %3333 = vmatpush3.msra.mxu0 %v3132_v45  ;;  %3376 = vmatpush3.msra.mxu1 %v3144_v56 }
 0x311   :  { %3334 = vmatprep.subr.mxu0 %v5693_v8  ;;  %3378 = vmatmul.mubr.f32.vlgmr.msra.gmra.mxu1 %v2353_v11 }
 0x312   :  { %3335 = vmatpush3.msra.mxu0 %v3131_v61  ;;  %3342 = vmatprep.mubr.msk.f32.mxu0 %vm3404_vm2, %v5693_v8 }
 0x313   :  { %3336 = vmatprep.subr.mxu0 %v5693_v8 }
 0x314   :  { %3337 = vmatpush3.msra.mxu0 %v3130_v52 }
 0x315   :  { %3338 = vmatprep.subr.mxu0 %v5693_v8 }
 0x316   :  { %3339 = vmatpush3.msra.mxu0 %v3129_v38 }
 0x317   :  { %3340 = vmatprep.subr.mxu0 %v5693_v8 }
 0x318   :  { %3341 = vmatpush3.msra.mxu0 %v3128_v2 }
 0x319   :  { %3343 = vmatmul.mubr.f32.vlgmr.msra.gmra.mxu0 %v2352_v19  ;;  %3380 = vmatprep.subr.mxu0 %v5693_v8 }
 0x31a   :  { %3394 = vmatprep.mubr.msk.f32.mxu0 %vm3404_vm2, %v5693_v8  ;;  %3381 = vmatpush3.msk.msra.mxu0 %vm2730_vm3, %v2718_v7 }
 0x31b   :  { %3382 = vmatprep.subr.mxu0 %v5693_v8 }
 0x31c   :  { %3383 = vmatpush3.msra.mxu0 %v2717_v25 }
 0x31d   :  { %3384 = vmatprep.subr.mxu0 %v5693_v8 }
 0x31e   :  { %3385 = vmatpush3.msra.mxu0 %v2716_v21 }
 0x31f   :  { %3386 = vmatprep.subr.mxu0 %v5693_v8 }
 0x320   :  { %3387 = vmatpush3.msra.mxu0 %v2715_v14 }
 0x321   :  { %3388 = vmatprep.subr.mxu0 %v5693_v8 }
 0x322   :  { %3389 = vmatpush3.msra.mxu0 %v2714_v16 }
 0x323   :  { %3390 = vmatprep.subr.mxu0 %v5693_v8 }
 0x324   :  { %3391 = vmatpush3.msra.mxu0 %v2713_v55 }
 0x325   :  { %3392 = vmatprep.subr.mxu0 %v5693_v8  ;;  %v3161_v8 = vld [vmem:[%s5624_s8] ss:$0 sm:$0xff] }
 0x326   :  { %3393 = vmatpush3.msra.mxu0 %v2712_v60 }
 0x3b1   :  { %v2523_v42 = vpop.f32.mrf.mxu1 }
 0x3b3   :  { %v3309_v49 = vpop.f32.mrf.mxu1 }
 0x3b9   :  { %v2453_v27 = vpop.f32.mrf.mxu0 }
 0x3ba   :  { %v2524_v6 = vadd.f32 %v2523_v42, %v2453_v27 }
 0x3bb   :  { %v3274_v22 = vpop.f32.mrf.mxu0 }
 0x3d1   :  { %v2698_v59 = vpop.f32.mrf.mxu1 }
 0x3d3   :  { %v3379_v58 = vpop.f32.mrf.mxu1 }
 0x3d9   :  { %v2610_v20 = vpop.f32.mrf.mxu0 }
 0x3da   :  { %v2614_v39 = vadd.f32 %v2610_v20, %v2524_v6 }
 0x3db   :  { %v3344_v1 = vpop.f32.mrf.mxu0 }
 0x3dc   :  { %v2702_v36 = vadd.f32 %v2698_v59, %v2614_v39 }
 0x3de   :  { %v2710_v53 = vadd.f32 %v3160_v33, %v2702_v36 }
 0x3e0   :  { %v2711_v31 = vmax.f32 %v2710_v53, 0.0 }
 0x3e2   :  { %3395 = vmatmul.mubr.msk.f32.vlgmr.msra.gmra.mxu0 %vm2726_vm4, %v2711_v31 }
 0x4a2   :  { %v2800_v37 = vpop.f32.mrf.mxu0 }
 0x4a3   :  { %v2801_v28 = vadd.f32 %v3161_v8, %v2800_v37 }
 0x4a4   :  { %v3396_v44 = vpop.f32.mrf.mxu0 }
 0x4a5   :  { %v2805_v54 = vsel %vm2804_vm5, %v2801_v28, -inf }
 0x4a6   :  { %2806 = vmax.xlane.f32.xlu0 %v2805_v54 }
 0x52f   :  { %v2807_v17 = vpop.xlane.xlu0 %2806 }
 0x530   :  { %v2808_v35 = vsub.f32 %v2801_v28, %v2807_v17 }
 0x532   :  { %v2809_v34 = vmul.f32 1.442695, %v2808_v35 }
 0x534   :  { %3399 = vpow2.f32 %v2809_v34 }
 0x541   :  { %v3400_v47 = vpop.eup %3399 }
 0x542   :  { %v2811_v4 = vsel %vm2804_vm5, %v3400_v47, 0.0 }
 0x543   :  { %2812 = vadd.xlane.f32.xlu0 %v2811_v4 }
 0x5cc   :  { %v2813_v15 = vpop.xlane.xlu0 %2812 }
 0x5cd   :  { %3401 = vlog2.f32 %v2813_v15 }
 0x5da   :  { %v3402_v5 = vpop.eup %3401 }
 0x5db   :  { %v2815_v29 = vmul.f32 0.6931472, %v3402_v5 }
 0x5dd   :  { %v2816_v24 = vsub.f32 %v2808_v35, %v2815_v29 }
 0x5df   :  { %2817 = vst.msk [vmem:[%s5625_s9] sm:$0xff] %vm2804_vm5, %v2816_v24 }

</bundles_post_ra>
